<compile_context>
chip_gen: v7x
topology: tpu7x:2x2x1
jax: 0.10.0
libtpu: 0.0.40
codegen_flags: <defaults>
</compile_context>

<pallas_src>
import math

import jax
import jax.numpy as jnp
from jax import lax
from jax.experimental import pallas as pl
from jax.experimental.pallas import tpu as pltpu


# ----------------------------- helpers -----------------------------

def _round_up(n, m):
    return ((n + m - 1) // m) * m


def _nbytes(shape, dtype):
    n = 1
    for s in shape:
        n *= int(s)
    return n * jnp.dtype(dtype).itemsize


def _full_spec(shape):
    # whole-array block, grid=()  (everything fits comfortably in VMEM here)
    return pl.BlockSpec(shape, lambda: (0,) * len(shape))


def _pad_gate_weight(w, d, d_pad, h, h_pad):
    """PyTorch (3H, d) gate weight -> bf16 (d_pad, 3*h_pad), transposed, each
    gate (r|z|n) in its own lane-aligned h_pad slab, zero padded."""
    w3 = w.reshape(3, h, d)                      # row blocks r|z|n
    w3 = jnp.transpose(w3, (2, 0, 1))            # (d, 3, h)
    w3 = jnp.pad(w3, ((0, d_pad - d), (0, 0), (0, h_pad - h)))
    return w3.reshape(d_pad, 3 * h_pad).astype(jnp.bfloat16)


def _pad_gate_bias(b, h, h_pad):
    b3 = jnp.pad(b.reshape(3, h), ((0, 0), (0, h_pad - h)))
    return b3.reshape(1, 3 * h_pad).astype(jnp.float32)


# ----------------------------- fused Pallas kernel -----------------------------

def _make_gru_model_kernel(num_layers, T, Bp, Hp, use_wavefront, unroll):
    G = 3 * Hp

    def kernel(*refs):
        x_ref = refs[0]
        lrefs = [refs[1 + 4 * l: 1 + 4 * (l + 1)] for l in range(num_layers)]
        n_fixed = 1 + 4 * num_layers
        fc_w_ref = refs[n_fixed]
        fc_b_ref = refs[n_fixed + 1]
        out_ref = refs[n_fixed + 2]
        seq_ref = refs[n_fixed + 3]    # (T, Bp, Hp)  bf16 — fallback path only
        gi_ref = refs[n_fixed + 4]     # (T, Bp, 3Hp) bf16 — precomputed input gates

        def gru_cell(gi, h_prev, whh_ref, bhh_b):
            # gi: (Bp, 3Hp) f32 input gates (x @ W_ih + b_ih); h_prev f32.
            # bf16 MXU operands, f32 accumulation; gate math in f32.
            gh = jnp.dot(h_prev.astype(jnp.bfloat16), whh_ref[...],
                         preferred_element_type=jnp.float32) + bhh_b
            r = jax.nn.sigmoid(gi[:, 0:Hp] + gh[:, 0:Hp])
            z = jax.nn.sigmoid(gi[:, Hp:2 * Hp] + gh[:, Hp:2 * Hp])
            n = jnp.tanh(gi[:, 2 * Hp:] + r * gh[:, 2 * Hp:])
            return (1.0 - z) * n + z * h_prev

        def hoist_input_proj(xin, wih_ref, bih_ref):
            # One big (T*Bp, Din) x (Din, 3Hp) bf16 MXU matmul off the serial
            # chain; result stored bf16 in gi_ref.
            din = xin.shape[-1]
            gi_all = (jnp.dot(xin.reshape(T * Bp, din), wih_ref[...],
                              preferred_element_type=jnp.float32)
                      + bih_ref[...])
            gi_ref[...] = gi_all.reshape(T, Bp, G).astype(jnp.bfloat16)

        if use_wavefront:
            # ---- wavefront over (layer, time): fills MXU/EUP slots with
            # num_layers independent per-step cells and shortens the serial
            # chain to ~T + num_layers cell latencies. ----
            hoist_input_proj(x_ref[...], lrefs[0][0], lrefs[0][2])

            # Hoist the small bias broadcasts out of the wave loop
            # (JAX does not CSE broadcast_in_dim).
            bih_b = [None] + [jnp.broadcast_to(lrefs[l][2][...], (Bp, G))
                              for l in range(1, num_layers)]
            bhh_b = [jnp.broadcast_to(lrefs[l][3][...], (Bp, G))
                     for l in range(num_layers)]

            h = [jnp.zeros((Bp, Hp), jnp.float32) for _ in range(num_layers)]
            y = [None] * num_layers            # latest output of each layer
            for s in range(T + num_layers - 1):
                # Decreasing-l order: layer l consumes y[l-1] produced at wave
                # step s-1 (= layer l-1's output at the same time index t).
                for l in reversed(range(num_layers)):
                    t = s - l
                    if not (0 <= t < T):
                        continue
                    if l == 0:
                        gi = gi_ref[t].astype(jnp.float32)
                    else:
                        gi = (jnp.dot(y[l - 1].astype(jnp.bfloat16),
                                      lrefs[l][0][...],
                                      preferred_element_type=jnp.float32)
                              + bih_b[l])
                    h[l] = gru_cell(gi, h[l], lrefs[l][1], bhh_b[l])
                    y[l] = h[l]
            h_last = h[num_layers - 1]
        else:
            # ---- fallback: sequential layers, hoisted per-layer input
            # projection, fori_loop with moderate unroll (bounds live ranges,
            # keeps LLO scheduler visibility, avoids vreg spills). ----
            h_last = None
            for l in range(num_layers):
                wih_ref, whh_ref, bih_ref, bhh_ref = lrefs[l]
                is_last = (l == num_layers - 1)
                hoist_input_proj(x_ref[...] if l == 0 else seq_ref[...],
                                 wih_ref, bih_ref)
                bhh_b = jnp.broadcast_to(bhh_ref[...], (Bp, G))

                def step(t, h_prev, whh_ref=whh_ref, bhh_b=bhh_b,
                         is_last=is_last):
                    gi = gi_ref[t].astype(jnp.float32)
                    h_new = gru_cell(gi, h_prev, whh_ref, bhh_b)
                    if not is_last:
                        seq_ref[t] = h_new.astype(jnp.bfloat16)
                    return h_new

                h_last = lax.fori_loop(0, T, step,
                                       jnp.zeros((Bp, Hp), jnp.float32),
                                       unroll=unroll)

        # Fused final Linear on the last hidden state only (bf16 MXU, f32 acc).
        out_ref[...] = (jnp.dot(h_last.astype(jnp.bfloat16), fc_w_ref[...],
                                preferred_element_type=jnp.float32)
                        + fc_b_ref[...]).astype(out_ref.dtype)

    return kernel


# ----------------------------- JAX wrapper -----------------------------

@jax.jit
def gru_model_forward(x, params):
    """Equivalent of GRUModel.forward: x (B, T, D) -> (B, output_dim)."""
    B, T, D = x.shape
    num_layers = len(params["gru"])
    H = params["gru"][0]["w_hh"].shape[1]
    O = params["fc_w"].shape[0]

    Bp = _round_up(B, 8)          # sublane granule
    Dp = _round_up(D, 128)        # lane granule
    Hp = _round_up(H, 128)
    Op = _round_up(O, 128)
    G = 3 * Hp

    # time-major, padded, bf16 input (MXU-native operand dtype).
    # TODO(synk): for large T*B*D, fold this transpose into a T-tiled grid's
    # BlockSpec index_map instead of a separate mem-bound XLA op.
    x_tm = jnp.transpose(x, (1, 0, 2)).astype(jnp.float32)          # (T, B, D)
    x_p = jnp.pad(x_tm, ((0, 0), (0, Bp - B), (0, Dp - D))).astype(jnp.bfloat16)

    inputs = [x_p]
    in_specs = [_full_spec((T, Bp, Dp))]
    for l, lp in enumerate(params["gru"]):
        d_in = D if l == 0 else H
        d_in_p = Dp if l == 0 else Hp
        inputs += [
            _pad_gate_weight(lp["w_ih"], d_in, d_in_p, H, Hp),      # bf16 (Dinp, 3Hp)
            _pad_gate_weight(lp["w_hh"], H, Hp, H, Hp),             # bf16 (Hp, 3Hp)
            _pad_gate_bias(lp["b_ih"], H, Hp),                      # f32  (1, 3Hp)
            _pad_gate_bias(lp["b_hh"], H, Hp),                      # f32  (1, 3Hp)
        ]
        in_specs += [
            _full_spec((d_in_p, G)),
            _full_spec((Hp, G)),
            _full_spec((1, G)),
            _full_spec((1, G)),
        ]

    fc_w_p = jnp.pad(params["fc_w"].T,
                     ((0, Hp - H), (0, Op - O))).astype(jnp.bfloat16)  # (Hp, Op)
    fc_b_p = jnp.pad(params["fc_b"].reshape(1, O),
                     ((0, 0), (0, Op - O))).astype(jnp.float32)
    inputs += [fc_w_p, fc_b_p]
    in_specs += [_full_spec((Hp, Op)), _full_spec((1, Op))]

    scratch_shapes = [
        pltpu.VMEM((T, Bp, Hp), jnp.bfloat16),    # inter-layer sequence (fallback)
        pltpu.VMEM((T, Bp, G), jnp.bfloat16),     # precomputed input gates
    ]

    # Gate the full wavefront unroll on a rough live-vreg estimate (h + 3 gate
    # slabs per active layer, f32), not just T.
    cell_vregs = (Bp // 8) * ((Hp // 128) + 3 * (G // 128))
    use_wavefront = (T * num_layers <= 64) and (num_layers * cell_vregs <= 40)
    unroll = max(1, min(8, min(T, 40 // max(1, cell_vregs))))

    # Explicit scoped-VMEM budget (defaults are only 16/32 MiB); clamp at
    # 64 MiB so the value is also valid on v7x (raise toward ~100 MiB on
    # v5e/v6e for big configs).
    footprint = sum(_nbytes(a.shape, a.dtype) for a in inputs)
    footprint += _nbytes((T, Bp, Hp), jnp.bfloat16)
    footprint += _nbytes((T, Bp, G), jnp.bfloat16)
    footprint += _nbytes((Bp, Op), jnp.float32)
    vmem_limit = int(min(64 << 20, max(2 * footprint + (1 << 20), 16 << 20)))

    out_p = pl.pallas_call(
        _make_gru_model_kernel(num_layers, T, Bp, Hp, use_wavefront, unroll),
        out_shape=jax.ShapeDtypeStruct((Bp, Op), jnp.float32),
        in_specs=in_specs,
        out_specs=_full_spec((Bp, Op)),
        scratch_shapes=scratch_shapes,
        compiler_params=pltpu.CompilerParams(vmem_limit_bytes=vmem_limit),
    )(*inputs)
    return out_p[:B, :O]


# ----------------------------- Param init (deterministic, PyTorch layout) ---------------

def init_params(key, input_dim, hidden_dim, num_layers, output_dim):
    params = {"gru": []}
    k = 1.0 / math.sqrt(hidden_dim)
    for layer in range(num_layers):
        d_in = input_dim if layer == 0 else hidden_dim
        key, k1, k2, k3, k4 = jax.random.split(key, 5)
        params["gru"].append({
            "w_ih": jax.random.uniform(k1, (3 * hidden_dim, d_in), jnp.float32, -k, k),
            "w_hh": jax.random.uniform(k2, (3 * hidden_dim, hidden_dim), jnp.float32, -k, k),
            "b_ih": jax.random.uniform(k3, (3 * hidden_dim,), jnp.float32, -k, k),
            "b_hh": jax.random.uniform(k4, (3 * hidden_dim,), jnp.float32, -k, k),
        })
    key, k5, k6 = jax.random.split(key, 3)
    params["fc_w"] = jax.random.uniform(k5, (output_dim, hidden_dim), jnp.float32, -k, k)
    params["fc_b"] = jax.random.uniform(k6, (output_dim,), jnp.float32, -k, k)
    return params


# ----------------------------- Pure-JAX reference (for verification) -----------------------------

def gru_model_reference(x, params):
    h_seq = x  # (B, T, D)
    for lp in params["gru"]:
        B, T, _ = h_seq.shape
        H = lp["w_hh"].shape[1]
        wih_t, whh_t = lp["w_ih"].T, lp["w_hh"].T

        def cell(h_prev, x_t):
            gi = x_t @ wih_t + lp["b_ih"]
            gh = h_prev @ whh_t + lp["b_hh"]
            r = jax.nn.sigmoid(gi[:, :H] + gh[:, :H])
            z = jax.nn.sigmoid(gi[:, H:2 * H] + gh[:, H:2 * H])
            n = jnp.tanh(gi[:, 2 * H:] + r * gh[:, 2 * H:])
            h_new = (1.0 - z) * n + z * h_prev
            return h_new, h_new

        h0 = jnp.zeros((B, H), jnp.float32)
        _, outs = lax.scan(cell, h0, jnp.transpose(h_seq, (1, 0, 2)))
        h_seq = jnp.transpose(outs, (1, 0, 2))
    return h_seq[:, -1, :] @ params["fc_w"].T + params["fc_b"]


# ----------------------------- main -----------------------------

if __name__ == "__main__":
    B, T = 2, 8
    input_dim, hidden_dim, num_layers, output_dim = 4, 32, 2, 1

    key = jax.random.PRNGKey(0)
    key, kx, kp = jax.random.split(key, 3)
    x = jax.random.normal(kx, (B, T, input_dim), jnp.float32)
    params = init_params(kp, input_dim, hidden_dim, num_layers, output_dim)

    out = jax.block_until_ready(gru_model_forward(x, params))
    ref = jax.block_until_ready(gru_model_reference(x, params))

    assert out.shape == (B, output_dim), out.shape
    # Tolerance loosened for bf16 MXU operands (accumulation stays f32).
    assert jnp.allclose(out, ref, atol=3e-2, rtol=3e-2), (out, ref)
    print("KERNEL_OK")
</pallas_src>

<mosaic_0001>
module attributes {stable_mosaic.version = 11 : i64} {
  func.func @kernel(%arg0: memref<8x8x128xbf16, #tpu.memory_space<vmem>>, %arg1: memref<128x384xbf16, #tpu.memory_space<vmem>>, %arg2: memref<128x384xbf16, #tpu.memory_space<vmem>>, %arg3: memref<1x384xf32, #tpu.memory_space<vmem>>, %arg4: memref<1x384xf32, #tpu.memory_space<vmem>>, %arg5: memref<128x384xbf16, #tpu.memory_space<vmem>>, %arg6: memref<128x384xbf16, #tpu.memory_space<vmem>>, %arg7: memref<1x384xf32, #tpu.memory_space<vmem>>, %arg8: memref<1x384xf32, #tpu.memory_space<vmem>>, %arg9: memref<128x128xbf16, #tpu.memory_space<vmem>>, %arg10: memref<1x128xf32, #tpu.memory_space<vmem>>, %arg11: memref<8x128xf32, #tpu.memory_space<vmem>>, %arg12: memref<8x8x128xbf16, #tpu.memory_space<vmem>>, %arg13: memref<8x8x384xbf16, #tpu.memory_space<vmem>>) attributes {dimension_semantics = [], scalar_prefetch = 0 : i64, scratch_operands = 2 : i64, tpu.core_type = #tpu.core_type<tc>} {
    %c0 = arith.constant 0 : index
    %c0_0 = arith.constant 0 : index
    %c0_1 = arith.constant 0 : index
    %0 = vector.load %arg0[%c0, %c0_0, %c0_1] : memref<8x8x128xbf16, #tpu.memory_space<vmem>>, vector<8x8x128xbf16>
    %1 = vector.shape_cast %0 : vector<8x8x128xbf16> to vector<64x128xbf16>
    %c0_2 = arith.constant 0 : index
    %c0_3 = arith.constant 0 : index
    %2 = vector.load %arg1[%c0_2, %c0_3] : memref<128x384xbf16, #tpu.memory_space<vmem>>, vector<128x384xbf16>
    %cst = arith.constant dense<0.000000e+00> : vector<64x384xf32>
    %3 = tpu.matmul %1, %2, %cst {dimension_numbers = #tpu.dot_dimension_numbers<[1], [0], [0], [1], [0, 0, 1, 1], [], []>} : vector<64x128xbf16>, vector<128x384xbf16>, vector<64x384xf32> -> vector<64x384xf32>
    %c0_4 = arith.constant 0 : index
    %c0_5 = arith.constant 0 : index
    %4 = vector.load %arg3[%c0_4, %c0_5] : memref<1x384xf32, #tpu.memory_space<vmem>>, vector<1x384xf32>
    %5 = vector.broadcast %4 : vector<1x384xf32> to vector<64x384xf32>
    %6 = arith.addf %3, %5 : vector<64x384xf32>
    %7 = vector.shape_cast %6 : vector<64x384xf32> to vector<8x8x384xf32>
    %8 = arith.truncf %7 : vector<8x8x384xf32> to vector<8x8x384xbf16>
    %c0_6 = arith.constant 0 : index
    %c0_7 = arith.constant 0 : index
    %c0_8 = arith.constant 0 : index
    %9 = vector.load %arg13[%c0_6, %c0_7, %c0_8] : memref<8x8x384xbf16, #tpu.memory_space<vmem>>, vector<8x8x384xbf16>
    tpu.vector_store %arg13[%c0_6, %c0_7, %c0_8], %8 {strides = array<i32>} : memref<8x8x384xbf16, #tpu.memory_space<vmem>>, vector<8x8x384xbf16>,
    %c0_9 = arith.constant 0 : index
    %c0_10 = arith.constant 0 : index
    %10 = vector.load %arg7[%c0_9, %c0_10] : memref<1x384xf32, #tpu.memory_space<vmem>>, vector<1x384xf32>
    %11 = vector.shape_cast %10 : vector<1x384xf32> to vector<1x384xf32>
    %12 = vector.broadcast %11 : vector<1x384xf32> to vector<8x384xf32>
    %c0_11 = arith.constant 0 : index
    %c0_12 = arith.constant 0 : index
    %13 = vector.load %arg4[%c0_11, %c0_12] : memref<1x384xf32, #tpu.memory_space<vmem>>, vector<1x384xf32>
    %14 = vector.shape_cast %13 : vector<1x384xf32> to vector<1x384xf32>
    %15 = vector.broadcast %14 : vector<1x384xf32> to vector<8x384xf32>
    %c0_13 = arith.constant 0 : index
    %c0_14 = arith.constant 0 : index
    %16 = vector.load %arg8[%c0_13, %c0_14] : memref<1x384xf32, #tpu.memory_space<vmem>>, vector<1x384xf32>
    %17 = vector.shape_cast %16 : vector<1x384xf32> to vector<1x384xf32>
    %18 = vector.broadcast %17 : vector<1x384xf32> to vector<8x384xf32>
    %cst_15 = arith.constant 0.000000e+00 : f32
    %19 = vector.broadcast %cst_15 : f32 to vector<8x128xf32>
    %cst_16 = arith.constant 0.000000e+00 : f32
    %20 = vector.broadcast %cst_16 : f32 to vector<8x128xf32>
    %c0_17 = arith.constant 0 : index
    %c0_18 = arith.constant 0 : index
    %c0_19 = arith.constant 0 : index
    %21 = vector.load %arg13[%c0_17, %c0_18, %c0_19] : memref<8x8x384xbf16, #tpu.memory_space<vmem>>, vector<1x8x384xbf16>
    %22 = vector.shape_cast %21 : vector<1x8x384xbf16> to vector<8x384xbf16>
    %23 = arith.extf %22 : vector<8x384xbf16> to vector<8x384xf32>
    %24 = arith.truncf %19 : vector<8x128xf32> to vector<8x128xbf16>
    %c0_20 = arith.constant 0 : index
    %c0_21 = arith.constant 0 : index
    %25 = vector.load %arg2[%c0_20, %c0_21] : memref<128x384xbf16, #tpu.memory_space<vmem>>, vector<128x384xbf16>
    %cst_22 = arith.constant dense<0.000000e+00> : vector<8x384xf32>
    %26 = tpu.matmul %24, %25, %cst_22 {dimension_numbers = #tpu.dot_dimension_numbers<[1], [0], [0], [1], [0, 0, 1, 1], [], []>} : vector<8x128xbf16>, vector<128x384xbf16>, vector<8x384xf32> -> vector<8x384xf32>
    %27 = arith.addf %26, %15 : vector<8x384xf32>
    %28 = vector.extract_strided_slice %23 {offsets = [0, 0], sizes = [8, 128], strides = [1, 1]} : vector<8x384xf32> to vector<8x128xf32>
    %29 = vector.extract_strided_slice %27 {offsets = [0, 0], sizes = [8, 128], strides = [1, 1]} : vector<8x384xf32> to vector<8x128xf32>
    %30 = arith.addf %28, %29 : vector<8x128xf32>
    %31 = arith.negf %30 : vector<8x128xf32>
    %32 = math.exp %31 : vector<8x128xf32>
    %cst_23 = arith.constant 1.000000e+00 : f32
    %33 = vector.broadcast %cst_23 : f32 to vector<8x128xf32>
    %34 = arith.addf %33, %32 : vector<8x128xf32>
    %35 = arith.divf %33, %34 : vector<8x128xf32>
    %36 = vector.extract_strided_slice %23 {offsets = [0, 128], sizes = [8, 128], strides = [1, 1]} : vector<8x384xf32> to vector<8x128xf32>
    %37 = vector.extract_strided_slice %27 {offsets = [0, 128], sizes = [8, 128], strides = [1, 1]} : vector<8x384xf32> to vector<8x128xf32>
    %38 = arith.addf %36, %37 : vector<8x128xf32>
    %39 = arith.negf %38 : vector<8x128xf32>
    %40 = math.exp %39 : vector<8x128xf32>
    %cst_24 = arith.constant 1.000000e+00 : f32
    %41 = vector.broadcast %cst_24 : f32 to vector<8x128xf32>
    %42 = arith.addf %41, %40 : vector<8x128xf32>
    %43 = arith.divf %41, %42 : vector<8x128xf32>
    %44 = vector.extract_strided_slice %23 {offsets = [0, 256], sizes = [8, 128], strides = [1, 1]} : vector<8x384xf32> to vector<8x128xf32>
    %45 = vector.extract_strided_slice %27 {offsets = [0, 256], sizes = [8, 128], strides = [1, 1]} : vector<8x384xf32> to vector<8x128xf32>
    %46 = arith.mulf %35, %45 : vector<8x128xf32>
    %47 = arith.addf %44, %46 : vector<8x128xf32>
    %48 = math.tanh %47 : vector<8x128xf32>
    %cst_25 = arith.constant 1.000000e+00 : f32
    %49 = vector.broadcast %cst_25 : f32 to vector<8x128xf32>
    %50 = arith.subf %49, %43 : vector<8x128xf32>
    %51 = arith.mulf %50, %48 : vector<8x128xf32>
    %52 = arith.mulf %43, %19 : vector<8x128xf32>
    %53 = arith.addf %51, %52 : vector<8x128xf32>
    %54 = arith.truncf %53 : vector<8x128xf32> to vector<8x128xbf16>
    %c0_26 = arith.constant 0 : index
    %c0_27 = arith.constant 0 : index
    %55 = vector.load %arg5[%c0_26, %c0_27] : memref<128x384xbf16, #tpu.memory_space<vmem>>, vector<128x384xbf16>
    %cst_28 = arith.constant dense<0.000000e+00> : vector<8x384xf32>
    %56 = tpu.matmul %54, %55, %cst_28 {dimension_numbers = #tpu.dot_dimension_numbers<[1], [0], [0], [1], [0, 0, 1, 1], [], []>} : vector<8x128xbf16>, vector<128x384xbf16>, vector<8x384xf32> -> vector<8x384xf32>
    %57 = arith.addf %56, %12 : vector<8x384xf32>
    %58 = arith.truncf %20 : vector<8x128xf32> to vector<8x128xbf16>
    %c0_29 = arith.constant 0 : index
    %c0_30 = arith.constant 0 : index
    %59 = vector.load %arg6[%c0_29, %c0_30] : memref<128x384xbf16, #tpu.memory_space<vmem>>, vector<128x384xbf16>
    %cst_31 = arith.constant dense<0.000000e+00> : vector<8x384xf32>
    %60 = tpu.matmul %58, %59, %cst_31 {dimension_numbers = #tpu.dot_dimension_numbers<[1], [0], [0], [1], [0, 0, 1, 1], [], []>} : vector<8x128xbf16>, vector<128x384xbf16>, vector<8x384xf32> -> vector<8x384xf32>
    %61 = arith.addf %60, %18 : vector<8x384xf32>
    %62 = vector.extract_strided_slice %57 {offsets = [0, 0], sizes = [8, 128], strides = [1, 1]} : vector<8x384xf32> to vector<8x128xf32>
    %63 = vector.extract_strided_slice %61 {offsets = [0, 0], sizes = [8, 128], strides = [1, 1]} : vector<8x384xf32> to vector<8x128xf32>
    %64 = arith.addf %62, %63 : vector<8x128xf32>
    %65 = arith.negf %64 : vector<8x128xf32>
    %66 = math.exp %65 : vector<8x128xf32>
    %cst_32 = arith.constant 1.000000e+00 : f32
    %67 = vector.broadcast %cst_32 : f32 to vector<8x128xf32>
    %68 = arith.addf %67, %66 : vector<8x128xf32>
    %69 = arith.divf %67, %68 : vector<8x128xf32>
    %70 = vector.extract_strided_slice %57 {offsets = [0, 128], sizes = [8, 128], strides = [1, 1]} : vector<8x384xf32> to vector<8x128xf32>
    %71 = vector.extract_strided_slice %61 {offsets = [0, 128], sizes = [8, 128], strides = [1, 1]} : vector<8x384xf32> to vector<8x128xf32>
    %72 = arith.addf %70, %71 : vector<8x128xf32>
    %73 = arith.negf %72 : vector<8x128xf32>
    %74 = math.exp %73 : vector<8x128xf32>
    %cst_33 = arith.constant 1.000000e+00 : f32
    %75 = vector.broadcast %cst_33 : f32 to vector<8x128xf32>
    %76 = arith.addf %75, %74 : vector<8x128xf32>
    %77 = arith.divf %75, %76 : vector<8x128xf32>
    %78 = vector.extract_strided_slice %57 {offsets = [0, 256], sizes = [8, 128], strides = [1, 1]} : vector<8x384xf32> to vector<8x128xf32>
    %79 = vector.extract_strided_slice %61 {offsets = [0, 256], sizes = [8, 128], strides = [1, 1]} : vector<8x384xf32> to vector<8x128xf32>
    %80 = arith.mulf %69, %79 : vector<8x128xf32>
    %81 = arith.addf %78, %80 : vector<8x128xf32>
    %82 = math.tanh %81 : vector<8x128xf32>
    %cst_34 = arith.constant 1.000000e+00 : f32
    %83 = vector.broadcast %cst_34 : f32 to vector<8x128xf32>
    %84 = arith.subf %83, %77 : vector<8x128xf32>
    %85 = arith.mulf %84, %82 : vector<8x128xf32>
    %86 = arith.mulf %77, %20 : vector<8x128xf32>
    %87 = arith.addf %85, %86 : vector<8x128xf32>
    %c1 = arith.constant 1 : index
    %c0_35 = arith.constant 0 : index
    %c0_36 = arith.constant 0 : index
    %88 = vector.load %arg13[%c1, %c0_35, %c0_36] : memref<8x8x384xbf16, #tpu.memory_space<vmem>>, vector<1x8x384xbf16>
    %89 = vector.shape_cast %88 : vector<1x8x384xbf16> to vector<8x384xbf16>
    %90 = arith.extf %89 : vector<8x384xbf16> to vector<8x384xf32>
    %91 = arith.truncf %53 : vector<8x128xf32> to vector<8x128xbf16>
    %c0_37 = arith.constant 0 : index
    %c0_38 = arith.constant 0 : index
    %92 = vector.load %arg2[%c0_37, %c0_38] : memref<128x384xbf16, #tpu.memory_space<vmem>>, vector<128x384xbf16>
    %cst_39 = arith.constant dense<0.000000e+00> : vector<8x384xf32>
    %93 = tpu.matmul %91, %92, %cst_39 {dimension_numbers = #tpu.dot_dimension_numbers<[1], [0], [0], [1], [0, 0, 1, 1], [], []>} : vector<8x128xbf16>, vector<128x384xbf16>, vector<8x384xf32> -> vector<8x384xf32>
    %94 = arith.addf %93, %15 : vector<8x384xf32>
    %95 = vector.extract_strided_slice %90 {offsets = [0, 0], sizes = [8, 128], strides = [1, 1]} : vector<8x384xf32> to vector<8x128xf32>
    %96 = vector.extract_strided_slice %94 {offsets = [0, 0], sizes = [8, 128], strides = [1, 1]} : vector<8x384xf32> to vector<8x128xf32>
    %97 = arith.addf %95, %96 : vector<8x128xf32>
    %98 = arith.negf %97 : vector<8x128xf32>
    %99 = math.exp %98 : vector<8x128xf32>
    %cst_40 = arith.constant 1.000000e+00 : f32
    %100 = vector.broadcast %cst_40 : f32 to vector<8x128xf32>
    %101 = arith.addf %100, %99 : vector<8x128xf32>
    %102 = arith.divf %100, %101 : vector<8x128xf32>
    %103 = vector.extract_strided_slice %90 {offsets = [0, 128], sizes = [8, 128], strides = [1, 1]} : vector<8x384xf32> to vector<8x128xf32>
    %104 = vector.extract_strided_slice %94 {offsets = [0, 128], sizes = [8, 128], strides = [1, 1]} : vector<8x384xf32> to vector<8x128xf32>
    %105 = arith.addf %103, %104 : vector<8x128xf32>
    %106 = arith.negf %105 : vector<8x128xf32>
    %107 = math.exp %106 : vector<8x128xf32>
    %cst_41 = arith.constant 1.000000e+00 : f32
    %108 = vector.broadcast %cst_41 : f32 to vector<8x128xf32>
    %109 = arith.addf %108, %107 : vector<8x128xf32>
    %110 = arith.divf %108, %109 : vector<8x128xf32>
    %111 = vector.extract_strided_slice %90 {offsets = [0, 256], sizes = [8, 128], strides = [1, 1]} : vector<8x384xf32> to vector<8x128xf32>
    %112 = vector.extract_strided_slice %94 {offsets = [0, 256], sizes = [8, 128], strides = [1, 1]} : vector<8x384xf32> to vector<8x128xf32>
    %113 = arith.mulf %102, %112 : vector<8x128xf32>
    %114 = arith.addf %111, %113 : vector<8x128xf32>
    %115 = math.tanh %114 : vector<8x128xf32>
    %cst_42 = arith.constant 1.000000e+00 : f32
    %116 = vector.broadcast %cst_42 : f32 to vector<8x128xf32>
    %117 = arith.subf %116, %110 : vector<8x128xf32>
    %118 = arith.mulf %117, %115 : vector<8x128xf32>
    %119 = arith.mulf %110, %53 : vector<8x128xf32>
    %120 = arith.addf %118, %119 : vector<8x128xf32>
    %121 = arith.truncf %120 : vector<8x128xf32> to vector<8x128xbf16>
    %c0_43 = arith.constant 0 : index
    %c0_44 = arith.constant 0 : index
    %122 = vector.load %arg5[%c0_43, %c0_44] : memref<128x384xbf16, #tpu.memory_space<vmem>>, vector<128x384xbf16>
    %cst_45 = arith.constant dense<0.000000e+00> : vector<8x384xf32>
    %123 = tpu.matmul %121, %122, %cst_45 {dimension_numbers = #tpu.dot_dimension_numbers<[1], [0], [0], [1], [0, 0, 1, 1], [], []>} : vector<8x128xbf16>, vector<128x384xbf16>, vector<8x384xf32> -> vector<8x384xf32>
    %124 = arith.addf %123, %12 : vector<8x384xf32>
    %125 = arith.truncf %87 : vector<8x128xf32> to vector<8x128xbf16>
    %c0_46 = arith.constant 0 : index
    %c0_47 = arith.constant 0 : index
    %126 = vector.load %arg6[%c0_46, %c0_47] : memref<128x384xbf16, #tpu.memory_space<vmem>>, vector<128x384xbf16>
    %cst_48 = arith.constant dense<0.000000e+00> : vector<8x384xf32>
    %127 = tpu.matmul %125, %126, %cst_48 {dimension_numbers = #tpu.dot_dimension_numbers<[1], [0], [0], [1], [0, 0, 1, 1], [], []>} : vector<8x128xbf16>, vector<128x384xbf16>, vector<8x384xf32> -> vector<8x384xf32>
    %128 = arith.addf %127, %18 : vector<8x384xf32>
    %129 = vector.extract_strided_slice %124 {offsets = [0, 0], sizes = [8, 128], strides = [1, 1]} : vector<8x384xf32> to vector<8x128xf32>
    %130 = vector.extract_strided_slice %128 {offsets = [0, 0], sizes = [8, 128], strides = [1, 1]} : vector<8x384xf32> to vector<8x128xf32>
    %131 = arith.addf %129, %130 : vector<8x128xf32>
    %132 = arith.negf %131 : vector<8x128xf32>
    %133 = math.exp %132 : vector<8x128xf32>
    %cst_49 = arith.constant 1.000000e+00 : f32
    %134 = vector.broadcast %cst_49 : f32 to vector<8x128xf32>
    %135 = arith.addf %134, %133 : vector<8x128xf32>
    %136 = arith.divf %134, %135 : vector<8x128xf32>
    %137 = vector.extract_strided_slice %124 {offsets = [0, 128], sizes = [8, 128], strides = [1, 1]} : vector<8x384xf32> to vector<8x128xf32>
    %138 = vector.extract_strided_slice %128 {offsets = [0, 128], sizes = [8, 128], strides = [1, 1]} : vector<8x384xf32> to vector<8x128xf32>
    %139 = arith.addf %137, %138 : vector<8x128xf32>
    %140 = arith.negf %139 : vector<8x128xf32>
    %141 = math.exp %140 : vector<8x128xf32>
    %cst_50 = arith.constant 1.000000e+00 : f32
    %142 = vector.broadcast %cst_50 : f32 to vector<8x128xf32>
    %143 = arith.addf %142, %141 : vector<8x128xf32>
    %144 = arith.divf %142, %143 : vector<8x128xf32>
    %145 = vector.extract_strided_slice %124 {offsets = [0, 256], sizes = [8, 128], strides = [1, 1]} : vector<8x384xf32> to vector<8x128xf32>
    %146 = vector.extract_strided_slice %128 {offsets = [0, 256], sizes = [8, 128], strides = [1, 1]} : vector<8x384xf32> to vector<8x128xf32>
    %147 = arith.mulf %136, %146 : vector<8x128xf32>
    %148 = arith.addf %145, %147 : vector<8x128xf32>
    %149 = math.tanh %148 : vector<8x128xf32>
    %cst_51 = arith.constant 1.000000e+00 : f32
    %150 = vector.broadcast %cst_51 : f32 to vector<8x128xf32>
    %151 = arith.subf %150, %144 : vector<8x128xf32>
    %152 = arith.mulf %151, %149 : vector<8x128xf32>
    %153 = arith.mulf %144, %87 : vector<8x128xf32>
    %154 = arith.addf %152, %153 : vector<8x128xf32>
    %c2 = arith.constant 2 : index
    %c0_52 = arith.constant 0 : index
    %c0_53 = arith.constant 0 : index
    %155 = vector.load %arg13[%c2, %c0_52, %c0_53] : memref<8x8x384xbf16, #tpu.memory_space<vmem>>, vector<1x8x384xbf16>
    %156 = vector.shape_cast %155 : vector<1x8x384xbf16> to vector<8x384xbf16>
    %157 = arith.extf %156 : vector<8x384xbf16> to vector<8x384xf32>
    %158 = arith.truncf %120 : vector<8x128xf32> to vector<8x128xbf16>
    %c0_54 = arith.constant 0 : index
    %c0_55 = arith.constant 0 : index
    %159 = vector.load %arg2[%c0_54, %c0_55] : memref<128x384xbf16, #tpu.memory_space<vmem>>, vector<128x384xbf16>
    %cst_56 = arith.constant dense<0.000000e+00> : vector<8x384xf32>
    %160 = tpu.matmul %158, %159, %cst_56 {dimension_numbers = #tpu.dot_dimension_numbers<[1], [0], [0], [1], [0, 0, 1, 1], [], []>} : vector<8x128xbf16>, vector<128x384xbf16>, vector<8x384xf32> -> vector<8x384xf32>
    %161 = arith.addf %160, %15 : vector<8x384xf32>
    %162 = vector.extract_strided_slice %157 {offsets = [0, 0], sizes = [8, 128], strides = [1, 1]} : vector<8x384xf32> to vector<8x128xf32>
    %163 = vector.extract_strided_slice %161 {offsets = [0, 0], sizes = [8, 128], strides = [1, 1]} : vector<8x384xf32> to vector<8x128xf32>
    %164 = arith.addf %162, %163 : vector<8x128xf32>
    %165 = arith.negf %164 : vector<8x128xf32>
    %166 = math.exp %165 : vector<8x128xf32>
    %cst_57 = arith.constant 1.000000e+00 : f32
    %167 = vector.broadcast %cst_57 : f32 to vector<8x128xf32>
    %168 = arith.addf %167, %166 : vector<8x128xf32>
    %169 = arith.divf %167, %168 : vector<8x128xf32>
    %170 = vector.extract_strided_slice %157 {offsets = [0, 128], sizes = [8, 128], strides = [1, 1]} : vector<8x384xf32> to vector<8x128xf32>
    %171 = vector.extract_strided_slice %161 {offsets = [0, 128], sizes = [8, 128], strides = [1, 1]} : vector<8x384xf32> to vector<8x128xf32>
    %172 = arith.addf %170, %171 : vector<8x128xf32>
    %173 = arith.negf %172 : vector<8x128xf32>
    %174 = math.exp %173 : vector<8x128xf32>
    %cst_58 = arith.constant 1.000000e+00 : f32
    %175 = vector.broadcast %cst_58 : f32 to vector<8x128xf32>
    %176 = arith.addf %175, %174 : vector<8x128xf32>
    %177 = arith.divf %175, %176 : vector<8x128xf32>
    %178 = vector.extract_strided_slice %157 {offsets = [0, 256], sizes = [8, 128], strides = [1, 1]} : vector<8x384xf32> to vector<8x128xf32>
    %179 = vector.extract_strided_slice %161 {offsets = [0, 256], sizes = [8, 128], strides = [1, 1]} : vector<8x384xf32> to vector<8x128xf32>
    %180 = arith.mulf %169, %179 : vector<8x128xf32>
    %181 = arith.addf %178, %180 : vector<8x128xf32>
    %182 = math.tanh %181 : vector<8x128xf32>
    %cst_59 = arith.constant 1.000000e+00 : f32
    %183 = vector.broadcast %cst_59 : f32 to vector<8x128xf32>
    %184 = arith.subf %183, %177 : vector<8x128xf32>
    %185 = arith.mulf %184, %182 : vector<8x128xf32>
    %186 = arith.mulf %177, %120 : vector<8x128xf32>
    %187 = arith.addf %185, %186 : vector<8x128xf32>
    %188 = arith.truncf %187 : vector<8x128xf32> to vector<8x128xbf16>
    %c0_60 = arith.constant 0 : index
    %c0_61 = arith.constant 0 : index
    %189 = vector.load %arg5[%c0_60, %c0_61] : memref<128x384xbf16, #tpu.memory_space<vmem>>, vector<128x384xbf16>
    %cst_62 = arith.constant dense<0.000000e+00> : vector<8x384xf32>
    %190 = tpu.matmul %188, %189, %cst_62 {dimension_numbers = #tpu.dot_dimension_numbers<[1], [0], [0], [1], [0, 0, 1, 1], [], []>} : vector<8x128xbf16>, vector<128x384xbf16>, vector<8x384xf32> -> vector<8x384xf32>
    %191 = arith.addf %190, %12 : vector<8x384xf32>
    %192 = arith.truncf %154 : vector<8x128xf32> to vector<8x128xbf16>
    %c0_63 = arith.constant 0 : index
    %c0_64 = arith.constant 0 : index
    %193 = vector.load %arg6[%c0_63, %c0_64] : memref<128x384xbf16, #tpu.memory_space<vmem>>, vector<128x384xbf16>
    %cst_65 = arith.constant dense<0.000000e+00> : vector<8x384xf32>
    %194 = tpu.matmul %192, %193, %cst_65 {dimension_numbers = #tpu.dot_dimension_numbers<[1], [0], [0], [1], [0, 0, 1, 1], [], []>} : vector<8x128xbf16>, vector<128x384xbf16>, vector<8x384xf32> -> vector<8x384xf32>
    %195 = arith.addf %194, %18 : vector<8x384xf32>
    %196 = vector.extract_strided_slice %191 {offsets = [0, 0], sizes = [8, 128], strides = [1, 1]} : vector<8x384xf32> to vector<8x128xf32>
    %197 = vector.extract_strided_slice %195 {offsets = [0, 0], sizes = [8, 128], strides = [1, 1]} : vector<8x384xf32> to vector<8x128xf32>
    %198 = arith.addf %196, %197 : vector<8x128xf32>
    %199 = arith.negf %198 : vector<8x128xf32>
    %200 = math.exp %199 : vector<8x128xf32>
    %cst_66 = arith.constant 1.000000e+00 : f32
    %201 = vector.broadcast %cst_66 : f32 to vector<8x128xf32>
    %202 = arith.addf %201, %200 : vector<8x128xf32>
    %203 = arith.divf %201, %202 : vector<8x128xf32>
    %204 = vector.extract_strided_slice %191 {offsets = [0, 128], sizes = [8, 128], strides = [1, 1]} : vector<8x384xf32> to vector<8x128xf32>
    %205 = vector.extract_strided_slice %195 {offsets = [0, 128], sizes = [8, 128], strides = [1, 1]} : vector<8x384xf32> to vector<8x128xf32>
    %206 = arith.addf %204, %205 : vector<8x128xf32>
    %207 = arith.negf %206 : vector<8x128xf32>
    %208 = math.exp %207 : vector<8x128xf32>
    %cst_67 = arith.constant 1.000000e+00 : f32
    %209 = vector.broadcast %cst_67 : f32 to vector<8x128xf32>
    %210 = arith.addf %209, %208 : vector<8x128xf32>
    %211 = arith.divf %209, %210 : vector<8x128xf32>
    %212 = vector.extract_strided_slice %191 {offsets = [0, 256], sizes = [8, 128], strides = [1, 1]} : vector<8x384xf32> to vector<8x128xf32>
    %213 = vector.extract_strided_slice %195 {offsets = [0, 256], sizes = [8, 128], strides = [1, 1]} : vector<8x384xf32> to vector<8x128xf32>
    %214 = arith.mulf %203, %213 : vector<8x128xf32>
    %215 = arith.addf %212, %214 : vector<8x128xf32>
    %216 = math.tanh %215 : vector<8x128xf32>
    %cst_68 = arith.constant 1.000000e+00 : f32
    %217 = vector.broadcast %cst_68 : f32 to vector<8x128xf32>
    %218 = arith.subf %217, %211 : vector<8x128xf32>
    %219 = arith.mulf %218, %216 : vector<8x128xf32>
    %220 = arith.mulf %211, %154 : vector<8x128xf32>
    %221 = arith.addf %219, %220 : vector<8x128xf32>
    %c3 = arith.constant 3 : index
    %c0_69 = arith.constant 0 : index
    %c0_70 = arith.constant 0 : index
    %222 = vector.load %arg13[%c3, %c0_69, %c0_70] : memref<8x8x384xbf16, #tpu.memory_space<vmem>>, vector<1x8x384xbf16>
    %223 = vector.shape_cast %222 : vector<1x8x384xbf16> to vector<8x384xbf16>
    %224 = arith.extf %223 : vector<8x384xbf16> to vector<8x384xf32>
    %225 = arith.truncf %187 : vector<8x128xf32> to vector<8x128xbf16>
    %c0_71 = arith.constant 0 : index
    %c0_72 = arith.constant 0 : index
    %226 = vector.load %arg2[%c0_71, %c0_72] : memref<128x384xbf16, #tpu.memory_space<vmem>>, vector<128x384xbf16>
    %cst_73 = arith.constant dense<0.000000e+00> : vector<8x384xf32>
    %227 = tpu.matmul %225, %226, %cst_73 {dimension_numbers = #tpu.dot_dimension_numbers<[1], [0], [0], [1], [0, 0, 1, 1], [], []>} : vector<8x128xbf16>, vector<128x384xbf16>, vector<8x384xf32> -> vector<8x384xf32>
    %228 = arith.addf %227, %15 : vector<8x384xf32>
    %229 = vector.extract_strided_slice %224 {offsets = [0, 0], sizes = [8, 128], strides = [1, 1]} : vector<8x384xf32> to vector<8x128xf32>
    %230 = vector.extract_strided_slice %228 {offsets = [0, 0], sizes = [8, 128], strides = [1, 1]} : vector<8x384xf32> to vector<8x128xf32>
    %231 = arith.addf %229, %230 : vector<8x128xf32>
    %232 = arith.negf %231 : vector<8x128xf32>
    %233 = math.exp %232 : vector<8x128xf32>
    %cst_74 = arith.constant 1.000000e+00 : f32
    %234 = vector.broadcast %cst_74 : f32 to vector<8x128xf32>
    %235 = arith.addf %234, %233 : vector<8x128xf32>
    %236 = arith.divf %234, %235 : vector<8x128xf32>
    %237 = vector.extract_strided_slice %224 {offsets = [0, 128], sizes = [8, 128], strides = [1, 1]} : vector<8x384xf32> to vector<8x128xf32>
    %238 = vector.extract_strided_slice %228 {offsets = [0, 128], sizes = [8, 128], strides = [1, 1]} : vector<8x384xf32> to vector<8x128xf32>
    %239 = arith.addf %237, %238 : vector<8x128xf32>
    %240 = arith.negf %239 : vector<8x128xf32>
    %241 = math.exp %240 : vector<8x128xf32>
    %cst_75 = arith.constant 1.000000e+00 : f32
    %242 = vector.broadcast %cst_75 : f32 to vector<8x128xf32>
    %243 = arith.addf %242, %241 : vector<8x128xf32>
    %244 = arith.divf %242, %243 : vector<8x128xf32>
    %245 = vector.extract_strided_slice %224 {offsets = [0, 256], sizes = [8, 128], strides = [1, 1]} : vector<8x384xf32> to vector<8x128xf32>
    %246 = vector.extract_strided_slice %228 {offsets = [0, 256], sizes = [8, 128], strides = [1, 1]} : vector<8x384xf32> to vector<8x128xf32>
    %247 = arith.mulf %236, %246 : vector<8x128xf32>
    %248 = arith.addf %245, %247 : vector<8x128xf32>
    %249 = math.tanh %248 : vector<8x128xf32>
    %cst_76 = arith.constant 1.000000e+00 : f32
    %250 = vector.broadcast %cst_76 : f32 to vector<8x128xf32>
    %251 = arith.subf %250, %244 : vector<8x128xf32>
    %252 = arith.mulf %251, %249 : vector<8x128xf32>
    %253 = arith.mulf %244, %187 : vector<8x128xf32>
    %254 = arith.addf %252, %253 : vector<8x128xf32>
    %255 = arith.truncf %254 : vector<8x128xf32> to vector<8x128xbf16>
    %c0_77 = arith.constant 0 : index
    %c0_78 = arith.constant 0 : index
    %256 = vector.load %arg5[%c0_77, %c0_78] : memref<128x384xbf16, #tpu.memory_space<vmem>>, vector<128x384xbf16>
    %cst_79 = arith.constant dense<0.000000e+00> : vector<8x384xf32>
    %257 = tpu.matmul %255, %256, %cst_79 {dimension_numbers = #tpu.dot_dimension_numbers<[1], [0], [0], [1], [0, 0, 1, 1], [], []>} : vector<8x128xbf16>, vector<128x384xbf16>, vector<8x384xf32> -> vector<8x384xf32>
    %258 = arith.addf %257, %12 : vector<8x384xf32>
    %259 = arith.truncf %221 : vector<8x128xf32> to vector<8x128xbf16>
    %c0_80 = arith.constant 0 : index
    %c0_81 = arith.constant 0 : index
    %260 = vector.load %arg6[%c0_80, %c0_81] : memref<128x384xbf16, #tpu.memory_space<vmem>>, vector<128x384xbf16>
    %cst_82 = arith.constant dense<0.000000e+00> : vector<8x384xf32>
    %261 = tpu.matmul %259, %260, %cst_82 {dimension_numbers = #tpu.dot_dimension_numbers<[1], [0], [0], [1], [0, 0, 1, 1], [], []>} : vector<8x128xbf16>, vector<128x384xbf16>, vector<8x384xf32> -> vector<8x384xf32>
    %262 = arith.addf %261, %18 : vector<8x384xf32>
    %263 = vector.extract_strided_slice %258 {offsets = [0, 0], sizes = [8, 128], strides = [1, 1]} : vector<8x384xf32> to vector<8x128xf32>
    %264 = vector.extract_strided_slice %262 {offsets = [0, 0], sizes = [8, 128], strides = [1, 1]} : vector<8x384xf32> to vector<8x128xf32>
    %265 = arith.addf %263, %264 : vector<8x128xf32>
    %266 = arith.negf %265 : vector<8x128xf32>
    %267 = math.exp %266 : vector<8x128xf32>
    %cst_83 = arith.constant 1.000000e+00 : f32
    %268 = vector.broadcast %cst_83 : f32 to vector<8x128xf32>
    %269 = arith.addf %268, %267 : vector<8x128xf32>
    %270 = arith.divf %268, %269 : vector<8x128xf32>
    %271 = vector.extract_strided_slice %258 {offsets = [0, 128], sizes = [8, 128], strides = [1, 1]} : vector<8x384xf32> to vector<8x128xf32>
    %272 = vector.extract_strided_slice %262 {offsets = [0, 128], sizes = [8, 128], strides = [1, 1]} : vector<8x384xf32> to vector<8x128xf32>
    %273 = arith.addf %271, %272 : vector<8x128xf32>
    %274 = arith.negf %273 : vector<8x128xf32>
    %275 = math.exp %274 : vector<8x128xf32>
    %cst_84 = arith.constant 1.000000e+00 : f32
    %276 = vector.broadcast %cst_84 : f32 to vector<8x128xf32>
    %277 = arith.addf %276, %275 : vector<8x128xf32>
    %278 = arith.divf %276, %277 : vector<8x128xf32>
    %279 = vector.extract_strided_slice %258 {offsets = [0, 256], sizes = [8, 128], strides = [1, 1]} : vector<8x384xf32> to vector<8x128xf32>
    %280 = vector.extract_strided_slice %262 {offsets = [0, 256], sizes = [8, 128], strides = [1, 1]} : vector<8x384xf32> to vector<8x128xf32>
    %281 = arith.mulf %270, %280 : vector<8x128xf32>
    %282 = arith.addf %279, %281 : vector<8x128xf32>
    %283 = math.tanh %282 : vector<8x128xf32>
    %cst_85 = arith.constant 1.000000e+00 : f32
    %284 = vector.broadcast %cst_85 : f32 to vector<8x128xf32>
    %285 = arith.subf %284, %278 : vector<8x128xf32>
    %286 = arith.mulf %285, %283 : vector<8x128xf32>
    %287 = arith.mulf %278, %221 : vector<8x128xf32>
    %288 = arith.addf %286, %287 : vector<8x128xf32>
    %c4 = arith.constant 4 : index
    %c0_86 = arith.constant 0 : index
    %c0_87 = arith.constant 0 : index
    %289 = vector.load %arg13[%c4, %c0_86, %c0_87] : memref<8x8x384xbf16, #tpu.memory_space<vmem>>, vector<1x8x384xbf16>
    %290 = vector.shape_cast %289 : vector<1x8x384xbf16> to vector<8x384xbf16>
    %291 = arith.extf %290 : vector<8x384xbf16> to vector<8x384xf32>
    %292 = arith.truncf %254 : vector<8x128xf32> to vector<8x128xbf16>
    %c0_88 = arith.constant 0 : index
    %c0_89 = arith.constant 0 : index
    %293 = vector.load %arg2[%c0_88, %c0_89] : memref<128x384xbf16, #tpu.memory_space<vmem>>, vector<128x384xbf16>
    %cst_90 = arith.constant dense<0.000000e+00> : vector<8x384xf32>
    %294 = tpu.matmul %292, %293, %cst_90 {dimension_numbers = #tpu.dot_dimension_numbers<[1], [0], [0], [1], [0, 0, 1, 1], [], []>} : vector<8x128xbf16>, vector<128x384xbf16>, vector<8x384xf32> -> vector<8x384xf32>
    %295 = arith.addf %294, %15 : vector<8x384xf32>
    %296 = vector.extract_strided_slice %291 {offsets = [0, 0], sizes = [8, 128], strides = [1, 1]} : vector<8x384xf32> to vector<8x128xf32>
    %297 = vector.extract_strided_slice %295 {offsets = [0, 0], sizes = [8, 128], strides = [1, 1]} : vector<8x384xf32> to vector<8x128xf32>
    %298 = arith.addf %296, %297 : vector<8x128xf32>
    %299 = arith.negf %298 : vector<8x128xf32>
    %300 = math.exp %299 : vector<8x128xf32>
    %cst_91 = arith.constant 1.000000e+00 : f32
    %301 = vector.broadcast %cst_91 : f32 to vector<8x128xf32>
    %302 = arith.addf %301, %300 : vector<8x128xf32>
    %303 = arith.divf %301, %302 : vector<8x128xf32>
    %304 = vector.extract_strided_slice %291 {offsets = [0, 128], sizes = [8, 128], strides = [1, 1]} : vector<8x384xf32> to vector<8x128xf32>
    %305 = vector.extract_strided_slice %295 {offsets = [0, 128], sizes = [8, 128], strides = [1, 1]} : vector<8x384xf32> to vector<8x128xf32>
    %306 = arith.addf %304, %305 : vector<8x128xf32>
    %307 = arith.negf %306 : vector<8x128xf32>
    %308 = math.exp %307 : vector<8x128xf32>
    %cst_92 = arith.constant 1.000000e+00 : f32
    %309 = vector.broadcast %cst_92 : f32 to vector<8x128xf32>
    %310 = arith.addf %309, %308 : vector<8x128xf32>
    %311 = arith.divf %309, %310 : vector<8x128xf32>
    %312 = vector.extract_strided_slice %291 {offsets = [0, 256], sizes = [8, 128], strides = [1, 1]} : vector<8x384xf32> to vector<8x128xf32>
    %313 = vector.extract_strided_slice %295 {offsets = [0, 256], sizes = [8, 128], strides = [1, 1]} : vector<8x384xf32> to vector<8x128xf32>
    %314 = arith.mulf %303, %313 : vector<8x128xf32>
    %315 = arith.addf %312, %314 : vector<8x128xf32>
    %316 = math.tanh %315 : vector<8x128xf32>
    %cst_93 = arith.constant 1.000000e+00 : f32
    %317 = vector.broadcast %cst_93 : f32 to vector<8x128xf32>
    %318 = arith.subf %317, %311 : vector<8x128xf32>
    %319 = arith.mulf %318, %316 : vector<8x128xf32>
    %320 = arith.mulf %311, %254 : vector<8x128xf32>
    %321 = arith.addf %319, %320 : vector<8x128xf32>
    %322 = arith.truncf %321 : vector<8x128xf32> to vector<8x128xbf16>
    %c0_94 = arith.constant 0 : index
    %c0_95 = arith.constant 0 : index
    %323 = vector.load %arg5[%c0_94, %c0_95] : memref<128x384xbf16, #tpu.memory_space<vmem>>, vector<128x384xbf16>
    %cst_96 = arith.constant dense<0.000000e+00> : vector<8x384xf32>
    %324 = tpu.matmul %322, %323, %cst_96 {dimension_numbers = #tpu.dot_dimension_numbers<[1], [0], [0], [1], [0, 0, 1, 1], [], []>} : vector<8x128xbf16>, vector<128x384xbf16>, vector<8x384xf32> -> vector<8x384xf32>
    %325 = arith.addf %324, %12 : vector<8x384xf32>
    %326 = arith.truncf %288 : vector<8x128xf32> to vector<8x128xbf16>
    %c0_97 = arith.constant 0 : index
    %c0_98 = arith.constant 0 : index
    %327 = vector.load %arg6[%c0_97, %c0_98] : memref<128x384xbf16, #tpu.memory_space<vmem>>, vector<128x384xbf16>
    %cst_99 = arith.constant dense<0.000000e+00> : vector<8x384xf32>
    %328 = tpu.matmul %326, %327, %cst_99 {dimension_numbers = #tpu.dot_dimension_numbers<[1], [0], [0], [1], [0, 0, 1, 1], [], []>} : vector<8x128xbf16>, vector<128x384xbf16>, vector<8x384xf32> -> vector<8x384xf32>
    %329 = arith.addf %328, %18 : vector<8x384xf32>
    %330 = vector.extract_strided_slice %325 {offsets = [0, 0], sizes = [8, 128], strides = [1, 1]} : vector<8x384xf32> to vector<8x128xf32>
    %331 = vector.extract_strided_slice %329 {offsets = [0, 0], sizes = [8, 128], strides = [1, 1]} : vector<8x384xf32> to vector<8x128xf32>
    %332 = arith.addf %330, %331 : vector<8x128xf32>
    %333 = arith.negf %332 : vector<8x128xf32>
    %334 = math.exp %333 : vector<8x128xf32>
    %cst_100 = arith.constant 1.000000e+00 : f32
    %335 = vector.broadcast %cst_100 : f32 to vector<8x128xf32>
    %336 = arith.addf %335, %334 : vector<8x128xf32>
    %337 = arith.divf %335, %336 : vector<8x128xf32>
    %338 = vector.extract_strided_slice %325 {offsets = [0, 128], sizes = [8, 128], strides = [1, 1]} : vector<8x384xf32> to vector<8x128xf32>
    %339 = vector.extract_strided_slice %329 {offsets = [0, 128], sizes = [8, 128], strides = [1, 1]} : vector<8x384xf32> to vector<8x128xf32>
    %340 = arith.addf %338, %339 : vector<8x128xf32>
    %341 = arith.negf %340 : vector<8x128xf32>
    %342 = math.exp %341 : vector<8x128xf32>
    %cst_101 = arith.constant 1.000000e+00 : f32
    %343 = vector.broadcast %cst_101 : f32 to vector<8x128xf32>
    %344 = arith.addf %343, %342 : vector<8x128xf32>
    %345 = arith.divf %343, %344 : vector<8x128xf32>
    %346 = vector.extract_strided_slice %325 {offsets = [0, 256], sizes = [8, 128], strides = [1, 1]} : vector<8x384xf32> to vector<8x128xf32>
    %347 = vector.extract_strided_slice %329 {offsets = [0, 256], sizes = [8, 128], strides = [1, 1]} : vector<8x384xf32> to vector<8x128xf32>
    %348 = arith.mulf %337, %347 : vector<8x128xf32>
    %349 = arith.addf %346, %348 : vector<8x128xf32>
    %350 = math.tanh %349 : vector<8x128xf32>
    %cst_102 = arith.constant 1.000000e+00 : f32
    %351 = vector.broadcast %cst_102 : f32 to vector<8x128xf32>
    %352 = arith.subf %351, %345 : vector<8x128xf32>
    %353 = arith.mulf %352, %350 : vector<8x128xf32>
    %354 = arith.mulf %345, %288 : vector<8x128xf32>
    %355 = arith.addf %353, %354 : vector<8x128xf32>
    %c5 = arith.constant 5 : index
    %c0_103 = arith.constant 0 : index
    %c0_104 = arith.constant 0 : index
    %356 = vector.load %arg13[%c5, %c0_103, %c0_104] : memref<8x8x384xbf16, #tpu.memory_space<vmem>>, vector<1x8x384xbf16>
    %357 = vector.shape_cast %356 : vector<1x8x384xbf16> to vector<8x384xbf16>
    %358 = arith.extf %357 : vector<8x384xbf16> to vector<8x384xf32>
    %359 = arith.truncf %321 : vector<8x128xf32> to vector<8x128xbf16>
    %c0_105 = arith.constant 0 : index
    %c0_106 = arith.constant 0 : index
    %360 = vector.load %arg2[%c0_105, %c0_106] : memref<128x384xbf16, #tpu.memory_space<vmem>>, vector<128x384xbf16>
    %cst_107 = arith.constant dense<0.000000e+00> : vector<8x384xf32>
    %361 = tpu.matmul %359, %360, %cst_107 {dimension_numbers = #tpu.dot_dimension_numbers<[1], [0], [0], [1], [0, 0, 1, 1], [], []>} : vector<8x128xbf16>, vector<128x384xbf16>, vector<8x384xf32> -> vector<8x384xf32>
    %362 = arith.addf %361, %15 : vector<8x384xf32>
    %363 = vector.extract_strided_slice %358 {offsets = [0, 0], sizes = [8, 128], strides = [1, 1]} : vector<8x384xf32> to vector<8x128xf32>
    %364 = vector.extract_strided_slice %362 {offsets = [0, 0], sizes = [8, 128], strides = [1, 1]} : vector<8x384xf32> to vector<8x128xf32>
    %365 = arith.addf %363, %364 : vector<8x128xf32>
    %366 = arith.negf %365 : vector<8x128xf32>
    %367 = math.exp %366 : vector<8x128xf32>
    %cst_108 = arith.constant 1.000000e+00 : f32
    %368 = vector.broadcast %cst_108 : f32 to vector<8x128xf32>
    %369 = arith.addf %368, %367 : vector<8x128xf32>
    %370 = arith.divf %368, %369 : vector<8x128xf32>
    %371 = vector.extract_strided_slice %358 {offsets = [0, 128], sizes = [8, 128], strides = [1, 1]} : vector<8x384xf32> to vector<8x128xf32>
    %372 = vector.extract_strided_slice %362 {offsets = [0, 128], sizes = [8, 128], strides = [1, 1]} : vector<8x384xf32> to vector<8x128xf32>
    %373 = arith.addf %371, %372 : vector<8x128xf32>
    %374 = arith.negf %373 : vector<8x128xf32>
    %375 = math.exp %374 : vector<8x128xf32>
    %cst_109 = arith.constant 1.000000e+00 : f32
    %376 = vector.broadcast %cst_109 : f32 to vector<8x128xf32>
    %377 = arith.addf %376, %375 : vector<8x128xf32>
    %378 = arith.divf %376, %377 : vector<8x128xf32>
    %379 = vector.extract_strided_slice %358 {offsets = [0, 256], sizes = [8, 128], strides = [1, 1]} : vector<8x384xf32> to vector<8x128xf32>
    %380 = vector.extract_strided_slice %362 {offsets = [0, 256], sizes = [8, 128], strides = [1, 1]} : vector<8x384xf32> to vector<8x128xf32>
    %381 = arith.mulf %370, %380 : vector<8x128xf32>
    %382 = arith.addf %379, %381 : vector<8x128xf32>
    %383 = math.tanh %382 : vector<8x128xf32>
    %cst_110 = arith.constant 1.000000e+00 : f32
    %384 = vector.broadcast %cst_110 : f32 to vector<8x128xf32>
    %385 = arith.subf %384, %378 : vector<8x128xf32>
    %386 = arith.mulf %385, %383 : vector<8x128xf32>
    %387 = arith.mulf %378, %321 : vector<8x128xf32>
    %388 = arith.addf %386, %387 : vector<8x128xf32>
    %389 = arith.truncf %388 : vector<8x128xf32> to vector<8x128xbf16>
    %c0_111 = arith.constant 0 : index
    %c0_112 = arith.constant 0 : index
    %390 = vector.load %arg5[%c0_111, %c0_112] : memref<128x384xbf16, #tpu.memory_space<vmem>>, vector<128x384xbf16>
    %cst_113 = arith.constant dense<0.000000e+00> : vector<8x384xf32>
    %391 = tpu.matmul %389, %390, %cst_113 {dimension_numbers = #tpu.dot_dimension_numbers<[1], [0], [0], [1], [0, 0, 1, 1], [], []>} : vector<8x128xbf16>, vector<128x384xbf16>, vector<8x384xf32> -> vector<8x384xf32>
    %392 = arith.addf %391, %12 : vector<8x384xf32>
    %393 = arith.truncf %355 : vector<8x128xf32> to vector<8x128xbf16>
    %c0_114 = arith.constant 0 : index
    %c0_115 = arith.constant 0 : index
    %394 = vector.load %arg6[%c0_114, %c0_115] : memref<128x384xbf16, #tpu.memory_space<vmem>>, vector<128x384xbf16>
    %cst_116 = arith.constant dense<0.000000e+00> : vector<8x384xf32>
    %395 = tpu.matmul %393, %394, %cst_116 {dimension_numbers = #tpu.dot_dimension_numbers<[1], [0], [0], [1], [0, 0, 1, 1], [], []>} : vector<8x128xbf16>, vector<128x384xbf16>, vector<8x384xf32> -> vector<8x384xf32>
    %396 = arith.addf %395, %18 : vector<8x384xf32>
    %397 = vector.extract_strided_slice %392 {offsets = [0, 0], sizes = [8, 128], strides = [1, 1]} : vector<8x384xf32> to vector<8x128xf32>
    %398 = vector.extract_strided_slice %396 {offsets = [0, 0], sizes = [8, 128], strides = [1, 1]} : vector<8x384xf32> to vector<8x128xf32>
    %399 = arith.addf %397, %398 : vector<8x128xf32>
    %400 = arith.negf %399 : vector<8x128xf32>
    %401 = math.exp %400 : vector<8x128xf32>
    %cst_117 = arith.constant 1.000000e+00 : f32
    %402 = vector.broadcast %cst_117 : f32 to vector<8x128xf32>
    %403 = arith.addf %402, %401 : vector<8x128xf32>
    %404 = arith.divf %402, %403 : vector<8x128xf32>
    %405 = vector.extract_strided_slice %392 {offsets = [0, 128], sizes = [8, 128], strides = [1, 1]} : vector<8x384xf32> to vector<8x128xf32>
    %406 = vector.extract_strided_slice %396 {offsets = [0, 128], sizes = [8, 128], strides = [1, 1]} : vector<8x384xf32> to vector<8x128xf32>
    %407 = arith.addf %405, %406 : vector<8x128xf32>
    %408 = arith.negf %407 : vector<8x128xf32>
    %409 = math.exp %408 : vector<8x128xf32>
    %cst_118 = arith.constant 1.000000e+00 : f32
    %410 = vector.broadcast %cst_118 : f32 to vector<8x128xf32>
    %411 = arith.addf %410, %409 : vector<8x128xf32>
    %412 = arith.divf %410, %411 : vector<8x128xf32>
    %413 = vector.extract_strided_slice %392 {offsets = [0, 256], sizes = [8, 128], strides = [1, 1]} : vector<8x384xf32> to vector<8x128xf32>
    %414 = vector.extract_strided_slice %396 {offsets = [0, 256], sizes = [8, 128], strides = [1, 1]} : vector<8x384xf32> to vector<8x128xf32>
    %415 = arith.mulf %404, %414 : vector<8x128xf32>
    %416 = arith.addf %413, %415 : vector<8x128xf32>
    %417 = math.tanh %416 : vector<8x128xf32>
    %cst_119 = arith.constant 1.000000e+00 : f32
    %418 = vector.broadcast %cst_119 : f32 to vector<8x128xf32>
    %419 = arith.subf %418, %412 : vector<8x128xf32>
    %420 = arith.mulf %419, %417 : vector<8x128xf32>
    %421 = arith.mulf %412, %355 : vector<8x128xf32>
    %422 = arith.addf %420, %421 : vector<8x128xf32>
    %c6 = arith.constant 6 : index
    %c0_120 = arith.constant 0 : index
    %c0_121 = arith.constant 0 : index
    %423 = vector.load %arg13[%c6, %c0_120, %c0_121] : memref<8x8x384xbf16, #tpu.memory_space<vmem>>, vector<1x8x384xbf16>
    %424 = vector.shape_cast %423 : vector<1x8x384xbf16> to vector<8x384xbf16>
    %425 = arith.extf %424 : vector<8x384xbf16> to vector<8x384xf32>
    %426 = arith.truncf %388 : vector<8x128xf32> to vector<8x128xbf16>
    %c0_122 = arith.constant 0 : index
    %c0_123 = arith.constant 0 : index
    %427 = vector.load %arg2[%c0_122, %c0_123] : memref<128x384xbf16, #tpu.memory_space<vmem>>, vector<128x384xbf16>
    %cst_124 = arith.constant dense<0.000000e+00> : vector<8x384xf32>
    %428 = tpu.matmul %426, %427, %cst_124 {dimension_numbers = #tpu.dot_dimension_numbers<[1], [0], [0], [1], [0, 0, 1, 1], [], []>} : vector<8x128xbf16>, vector<128x384xbf16>, vector<8x384xf32> -> vector<8x384xf32>
    %429 = arith.addf %428, %15 : vector<8x384xf32>
    %430 = vector.extract_strided_slice %425 {offsets = [0, 0], sizes = [8, 128], strides = [1, 1]} : vector<8x384xf32> to vector<8x128xf32>
    %431 = vector.extract_strided_slice %429 {offsets = [0, 0], sizes = [8, 128], strides = [1, 1]} : vector<8x384xf32> to vector<8x128xf32>
    %432 = arith.addf %430, %431 : vector<8x128xf32>
    %433 = arith.negf %432 : vector<8x128xf32>
    %434 = math.exp %433 : vector<8x128xf32>
    %cst_125 = arith.constant 1.000000e+00 : f32
    %435 = vector.broadcast %cst_125 : f32 to vector<8x128xf32>
    %436 = arith.addf %435, %434 : vector<8x128xf32>
    %437 = arith.divf %435, %436 : vector<8x128xf32>
    %438 = vector.extract_strided_slice %425 {offsets = [0, 128], sizes = [8, 128], strides = [1, 1]} : vector<8x384xf32> to vector<8x128xf32>
    %439 = vector.extract_strided_slice %429 {offsets = [0, 128], sizes = [8, 128], strides = [1, 1]} : vector<8x384xf32> to vector<8x128xf32>
    %440 = arith.addf %438, %439 : vector<8x128xf32>
    %441 = arith.negf %440 : vector<8x128xf32>
    %442 = math.exp %441 : vector<8x128xf32>
    %cst_126 = arith.constant 1.000000e+00 : f32
    %443 = vector.broadcast %cst_126 : f32 to vector<8x128xf32>
    %444 = arith.addf %443, %442 : vector<8x128xf32>
    %445 = arith.divf %443, %444 : vector<8x128xf32>
    %446 = vector.extract_strided_slice %425 {offsets = [0, 256], sizes = [8, 128], strides = [1, 1]} : vector<8x384xf32> to vector<8x128xf32>
    %447 = vector.extract_strided_slice %429 {offsets = [0, 256], sizes = [8, 128], strides = [1, 1]} : vector<8x384xf32> to vector<8x128xf32>
    %448 = arith.mulf %437, %447 : vector<8x128xf32>
    %449 = arith.addf %446, %448 : vector<8x128xf32>
    %450 = math.tanh %449 : vector<8x128xf32>
    %cst_127 = arith.constant 1.000000e+00 : f32
    %451 = vector.broadcast %cst_127 : f32 to vector<8x128xf32>
    %452 = arith.subf %451, %445 : vector<8x128xf32>
    %453 = arith.mulf %452, %450 : vector<8x128xf32>
    %454 = arith.mulf %445, %388 : vector<8x128xf32>
    %455 = arith.addf %453, %454 : vector<8x128xf32>
    %456 = arith.truncf %455 : vector<8x128xf32> to vector<8x128xbf16>
    %c0_128 = arith.constant 0 : index
    %c0_129 = arith.constant 0 : index
    %457 = vector.load %arg5[%c0_128, %c0_129] : memref<128x384xbf16, #tpu.memory_space<vmem>>, vector<128x384xbf16>
    %cst_130 = arith.constant dense<0.000000e+00> : vector<8x384xf32>
    %458 = tpu.matmul %456, %457, %cst_130 {dimension_numbers = #tpu.dot_dimension_numbers<[1], [0], [0], [1], [0, 0, 1, 1], [], []>} : vector<8x128xbf16>, vector<128x384xbf16>, vector<8x384xf32> -> vector<8x384xf32>
    %459 = arith.addf %458, %12 : vector<8x384xf32>
    %460 = arith.truncf %422 : vector<8x128xf32> to vector<8x128xbf16>
    %c0_131 = arith.constant 0 : index
    %c0_132 = arith.constant 0 : index
    %461 = vector.load %arg6[%c0_131, %c0_132] : memref<128x384xbf16, #tpu.memory_space<vmem>>, vector<128x384xbf16>
    %cst_133 = arith.constant dense<0.000000e+00> : vector<8x384xf32>
    %462 = tpu.matmul %460, %461, %cst_133 {dimension_numbers = #tpu.dot_dimension_numbers<[1], [0], [0], [1], [0, 0, 1, 1], [], []>} : vector<8x128xbf16>, vector<128x384xbf16>, vector<8x384xf32> -> vector<8x384xf32>
    %463 = arith.addf %462, %18 : vector<8x384xf32>
    %464 = vector.extract_strided_slice %459 {offsets = [0, 0], sizes = [8, 128], strides = [1, 1]} : vector<8x384xf32> to vector<8x128xf32>
    %465 = vector.extract_strided_slice %463 {offsets = [0, 0], sizes = [8, 128], strides = [1, 1]} : vector<8x384xf32> to vector<8x128xf32>
    %466 = arith.addf %464, %465 : vector<8x128xf32>
    %467 = arith.negf %466 : vector<8x128xf32>
    %468 = math.exp %467 : vector<8x128xf32>
    %cst_134 = arith.constant 1.000000e+00 : f32
    %469 = vector.broadcast %cst_134 : f32 to vector<8x128xf32>
    %470 = arith.addf %469, %468 : vector<8x128xf32>
    %471 = arith.divf %469, %470 : vector<8x128xf32>
    %472 = vector.extract_strided_slice %459 {offsets = [0, 128], sizes = [8, 128], strides = [1, 1]} : vector<8x384xf32> to vector<8x128xf32>
    %473 = vector.extract_strided_slice %463 {offsets = [0, 128], sizes = [8, 128], strides = [1, 1]} : vector<8x384xf32> to vector<8x128xf32>
    %474 = arith.addf %472, %473 : vector<8x128xf32>
    %475 = arith.negf %474 : vector<8x128xf32>
    %476 = math.exp %475 : vector<8x128xf32>
    %cst_135 = arith.constant 1.000000e+00 : f32
    %477 = vector.broadcast %cst_135 : f32 to vector<8x128xf32>
    %478 = arith.addf %477, %476 : vector<8x128xf32>
    %479 = arith.divf %477, %478 : vector<8x128xf32>
    %480 = vector.extract_strided_slice %459 {offsets = [0, 256], sizes = [8, 128], strides = [1, 1]} : vector<8x384xf32> to vector<8x128xf32>
    %481 = vector.extract_strided_slice %463 {offsets = [0, 256], sizes = [8, 128], strides = [1, 1]} : vector<8x384xf32> to vector<8x128xf32>
    %482 = arith.mulf %471, %481 : vector<8x128xf32>
    %483 = arith.addf %480, %482 : vector<8x128xf32>
    %484 = math.tanh %483 : vector<8x128xf32>
    %cst_136 = arith.constant 1.000000e+00 : f32
    %485 = vector.broadcast %cst_136 : f32 to vector<8x128xf32>
    %486 = arith.subf %485, %479 : vector<8x128xf32>
    %487 = arith.mulf %486, %484 : vector<8x128xf32>
    %488 = arith.mulf %479, %422 : vector<8x128xf32>
    %489 = arith.addf %487, %488 : vector<8x128xf32>
    %c7 = arith.constant 7 : index
    %c0_137 = arith.constant 0 : index
    %c0_138 = arith.constant 0 : index
    %490 = vector.load %arg13[%c7, %c0_137, %c0_138] : memref<8x8x384xbf16, #tpu.memory_space<vmem>>, vector<1x8x384xbf16>
    %491 = vector.shape_cast %490 : vector<1x8x384xbf16> to vector<8x384xbf16>
    %492 = arith.extf %491 : vector<8x384xbf16> to vector<8x384xf32>
    %493 = arith.truncf %455 : vector<8x128xf32> to vector<8x128xbf16>
    %c0_139 = arith.constant 0 : index
    %c0_140 = arith.constant 0 : index
    %494 = vector.load %arg2[%c0_139, %c0_140] : memref<128x384xbf16, #tpu.memory_space<vmem>>, vector<128x384xbf16>
    %cst_141 = arith.constant dense<0.000000e+00> : vector<8x384xf32>
    %495 = tpu.matmul %493, %494, %cst_141 {dimension_numbers = #tpu.dot_dimension_numbers<[1], [0], [0], [1], [0, 0, 1, 1], [], []>} : vector<8x128xbf16>, vector<128x384xbf16>, vector<8x384xf32> -> vector<8x384xf32>
    %496 = arith.addf %495, %15 : vector<8x384xf32>
    %497 = vector.extract_strided_slice %492 {offsets = [0, 0], sizes = [8, 128], strides = [1, 1]} : vector<8x384xf32> to vector<8x128xf32>
    %498 = vector.extract_strided_slice %496 {offsets = [0, 0], sizes = [8, 128], strides = [1, 1]} : vector<8x384xf32> to vector<8x128xf32>
    %499 = arith.addf %497, %498 : vector<8x128xf32>
    %500 = arith.negf %499 : vector<8x128xf32>
    %501 = math.exp %500 : vector<8x128xf32>
    %cst_142 = arith.constant 1.000000e+00 : f32
    %502 = vector.broadcast %cst_142 : f32 to vector<8x128xf32>
    %503 = arith.addf %502, %501 : vector<8x128xf32>
    %504 = arith.divf %502, %503 : vector<8x128xf32>
    %505 = vector.extract_strided_slice %492 {offsets = [0, 128], sizes = [8, 128], strides = [1, 1]} : vector<8x384xf32> to vector<8x128xf32>
    %506 = vector.extract_strided_slice %496 {offsets = [0, 128], sizes = [8, 128], strides = [1, 1]} : vector<8x384xf32> to vector<8x128xf32>
    %507 = arith.addf %505, %506 : vector<8x128xf32>
    %508 = arith.negf %507 : vector<8x128xf32>
    %509 = math.exp %508 : vector<8x128xf32>
    %cst_143 = arith.constant 1.000000e+00 : f32
    %510 = vector.broadcast %cst_143 : f32 to vector<8x128xf32>
    %511 = arith.addf %510, %509 : vector<8x128xf32>
    %512 = arith.divf %510, %511 : vector<8x128xf32>
    %513 = vector.extract_strided_slice %492 {offsets = [0, 256], sizes = [8, 128], strides = [1, 1]} : vector<8x384xf32> to vector<8x128xf32>
    %514 = vector.extract_strided_slice %496 {offsets = [0, 256], sizes = [8, 128], strides = [1, 1]} : vector<8x384xf32> to vector<8x128xf32>
    %515 = arith.mulf %504, %514 : vector<8x128xf32>
    %516 = arith.addf %513, %515 : vector<8x128xf32>
    %517 = math.tanh %516 : vector<8x128xf32>
    %cst_144 = arith.constant 1.000000e+00 : f32
    %518 = vector.broadcast %cst_144 : f32 to vector<8x128xf32>
    %519 = arith.subf %518, %512 : vector<8x128xf32>
    %520 = arith.mulf %519, %517 : vector<8x128xf32>
    %521 = arith.mulf %512, %455 : vector<8x128xf32>
    %522 = arith.addf %520, %521 : vector<8x128xf32>
    %523 = arith.truncf %522 : vector<8x128xf32> to vector<8x128xbf16>
    %c0_145 = arith.constant 0 : index
    %c0_146 = arith.constant 0 : index
    %524 = vector.load %arg5[%c0_145, %c0_146] : memref<128x384xbf16, #tpu.memory_space<vmem>>, vector<128x384xbf16>
    %cst_147 = arith.constant dense<0.000000e+00> : vector<8x384xf32>
    %525 = tpu.matmul %523, %524, %cst_147 {dimension_numbers = #tpu.dot_dimension_numbers<[1], [0], [0], [1], [0, 0, 1, 1], [], []>} : vector<8x128xbf16>, vector<128x384xbf16>, vector<8x384xf32> -> vector<8x384xf32>
    %526 = arith.addf %525, %12 : vector<8x384xf32>
    %527 = arith.truncf %489 : vector<8x128xf32> to vector<8x128xbf16>
    %c0_148 = arith.constant 0 : index
    %c0_149 = arith.constant 0 : index
    %528 = vector.load %arg6[%c0_148, %c0_149] : memref<128x384xbf16, #tpu.memory_space<vmem>>, vector<128x384xbf16>
    %cst_150 = arith.constant dense<0.000000e+00> : vector<8x384xf32>
    %529 = tpu.matmul %527, %528, %cst_150 {dimension_numbers = #tpu.dot_dimension_numbers<[1], [0], [0], [1], [0, 0, 1, 1], [], []>} : vector<8x128xbf16>, vector<128x384xbf16>, vector<8x384xf32> -> vector<8x384xf32>
    %530 = arith.addf %529, %18 : vector<8x384xf32>
    %531 = vector.extract_strided_slice %526 {offsets = [0, 0], sizes = [8, 128], strides = [1, 1]} : vector<8x384xf32> to vector<8x128xf32>
    %532 = vector.extract_strided_slice %530 {offsets = [0, 0], sizes = [8, 128], strides = [1, 1]} : vector<8x384xf32> to vector<8x128xf32>
    %533 = arith.addf %531, %532 : vector<8x128xf32>
    %534 = arith.negf %533 : vector<8x128xf32>
    %535 = math.exp %534 : vector<8x128xf32>
    %cst_151 = arith.constant 1.000000e+00 : f32
    %536 = vector.broadcast %cst_151 : f32 to vector<8x128xf32>
    %537 = arith.addf %536, %535 : vector<8x128xf32>
    %538 = arith.divf %536, %537 : vector<8x128xf32>
    %539 = vector.extract_strided_slice %526 {offsets = [0, 128], sizes = [8, 128], strides = [1, 1]} : vector<8x384xf32> to vector<8x128xf32>
    %540 = vector.extract_strided_slice %530 {offsets = [0, 128], sizes = [8, 128], strides = [1, 1]} : vector<8x384xf32> to vector<8x128xf32>
    %541 = arith.addf %539, %540 : vector<8x128xf32>
    %542 = arith.negf %541 : vector<8x128xf32>
    %543 = math.exp %542 : vector<8x128xf32>
    %cst_152 = arith.constant 1.000000e+00 : f32
    %544 = vector.broadcast %cst_152 : f32 to vector<8x128xf32>
    %545 = arith.addf %544, %543 : vector<8x128xf32>
    %546 = arith.divf %544, %545 : vector<8x128xf32>
    %547 = vector.extract_strided_slice %526 {offsets = [0, 256], sizes = [8, 128], strides = [1, 1]} : vector<8x384xf32> to vector<8x128xf32>
    %548 = vector.extract_strided_slice %530 {offsets = [0, 256], sizes = [8, 128], strides = [1, 1]} : vector<8x384xf32> to vector<8x128xf32>
    %549 = arith.mulf %538, %548 : vector<8x128xf32>
    %550 = arith.addf %547, %549 : vector<8x128xf32>
    %551 = math.tanh %550 : vector<8x128xf32>
    %cst_153 = arith.constant 1.000000e+00 : f32
    %552 = vector.broadcast %cst_153 : f32 to vector<8x128xf32>
    %553 = arith.subf %552, %546 : vector<8x128xf32>
    %554 = arith.mulf %553, %551 : vector<8x128xf32>
    %555 = arith.mulf %546, %489 : vector<8x128xf32>
    %556 = arith.addf %554, %555 : vector<8x128xf32>
    %557 = arith.truncf %556 : vector<8x128xf32> to vector<8x128xbf16>
    %c0_154 = arith.constant 0 : index
    %c0_155 = arith.constant 0 : index
    %558 = vector.load %arg9[%c0_154, %c0_155] : memref<128x128xbf16, #tpu.memory_space<vmem>>, vector<128x128xbf16>
    %cst_156 = arith.constant dense<0.000000e+00> : vector<8x128xf32>
    %559 = tpu.matmul %557, %558, %cst_156 {dimension_numbers = #tpu.dot_dimension_numbers<[1], [0], [0], [1], [0, 0, 1, 1], [], []>} : vector<8x128xbf16>, vector<128x128xbf16>, vector<8x128xf32> -> vector<8x128xf32>
    %c0_157 = arith.constant 0 : index
    %c0_158 = arith.constant 0 : index
    %560 = vector.load %arg10[%c0_157, %c0_158] : memref<1x128xf32, #tpu.memory_space<vmem>>, vector<1x128xf32>
    %561 = vector.broadcast %560 : vector<1x128xf32> to vector<8x128xf32>
    %562 = arith.addf %559, %561 : vector<8x128xf32>
    %c0_159 = arith.constant 0 : index
    %c0_160 = arith.constant 0 : index
    %563 = vector.load %arg11[%c0_159, %c0_160] : memref<8x128xf32, #tpu.memory_space<vmem>>, vector<8x128xf32>
    tpu.vector_store %arg11[%c0_159, %c0_160], %562 {strides = array<i32>} : memref<8x128xf32, #tpu.memory_space<vmem>>, vector<8x128xf32>,
    return
  }
}

</mosaic_0001>

<bundles_post_ra>
// kernel: gru_model_forward.1
= control target key start
LH: loop header
LB: loop body
LE: loop exit
PB: predicated region body
PF: predicated region fallthrough
CT: control target
= control target key end

     0   :  { %v7320_v1 = vmov 0   ;;  %v7322_v35 = vmov 0.0   ;;  %vm4943_vm0 = vmmov 0   ;;  %s7308_s1 = inlined_call_operand.vmem [shape: bf16[128,384], index: 1, kind: input, shape index: {}]   ;;  %s7309_s0 = inlined_call_operand.vmem [shape: bf16[8,8,128], index: 0, kind: input, shape index: {}]   ;;  %s7310_s2 = inlined_call_operand.vmem [shape: bf16[128,384], index: 2, kind: input, shape index: {}]   ;;  %s7311_s5 = inlined_call_operand.vmem [shape: bf16[128,384], index: 5, kind: input, shape index: {}]   ;;  %s7312_s6 = inlined_call_operand.vmem [shape: bf16[128,384], index: 6, kind: input, shape index: {}]   ;;  %s7313_s3 = inlined_call_operand.vmem [shape: f32[1,384], index: 3, kind: input, shape index: {}]   ;;  %s7314_s4 = inlined_call_operand.vmem [shape: f32[1,384], index: 4, kind: input, shape index: {}]   ;;  %s7315_s8 = inlined_call_operand.vmem [shape: f32[1,384], index: 8, kind: input, shape index: {}]   ;;  %s7316_s7 = inlined_call_operand.vmem [shape: f32[1,384], index: 7, kind: input, shape index: {}]   ;;  %s7317_s9 = inlined_call_operand.vmem [shape: bf16[128,128], index: 9, kind: input, shape index: {}]   ;;  %s7318_s10 = inlined_call_operand.vmem [shape: f32[1,128], index: 10, kind: input, shape index: {}]   ;;  %s7319_s11 = inlined_call_operand.vmem [shape: f32[8,128], index: 11, kind: output, shape index: {}]  }
   0x1   :  { %v4497_v0 = vld [vmem:[%s7308_s1 + $0x4] ss:$12 sps:$4 sm:$0xff]   ;;  %280 = vmatprep.mubr.bf16.mxu0 %v7320_v1  ;;  %v4499_v2 = vld [vmem:[%s7308_s1] ss:$12 sps:$4 sm:$0xff]   ;;  %v4500_v3 = vld [vmem:[%s7308_s1 + $0x1c] ss:$12 sps:$4 sm:$0xff]  }
   0x2   :  { %248 = vmatprep.subr.bf16.mxu0 %v4497_v0  ;;  %v4502_v4 = vld [vmem:[%s7308_s1 + $0x18] ss:$12 sps:$4 sm:$0xff]   ;;  %v4503_v5 = vld [vmem:[%s7308_s1 + $0x34] ss:$12 sps:$4 sm:$0xff]   ;;  %v4505_v6 = vld [vmem:[%s7308_s1 + $0x30] ss:$12 sps:$4 sm:$0xff]  }
   0x3   :  { %249 = vmatpush1.bf16.msra.mxu0 %v4499_v2  ;;  %v4506_v7 = vld [vmem:[%s7308_s1 + $0x4c] ss:$12 sps:$4 sm:$0xff]   ;;  %v4518_v8 = vld [vmem:[%s7308_s1 + $0x8] ss:$12 sps:$4 sm:$0xff]   ;;  %v4509_v10 = vld [vmem:[%s7308_s1 + $0x64] ss:$12 sps:$4 sm:$0xff]  }
   0x4   :  { %250 = vmatprep.subr.bf16.mxu0 %v4500_v3  ;;  %v4508_v9 = vld [vmem:[%s7308_s1 + $0x48] ss:$12 sps:$4 sm:$0xff]   ;;  %3906 = vmatprep.subr.bf16.mxu1 %v4518_v8  ;;  %v4522_v11 = vld [vmem:[%s7308_s1 + $0x20] ss:$12 sps:$4 sm:$0xff]   ;;  %v4527_v14 = vld [vmem:[%s7308_s1 + $0x38] ss:$12 sps:$4 sm:$0xff]  }
   0x5   :  { %3907 = vmatpush3.bf16.msra.mxu1 %v4518_v8  ;;  %v4523_v12 = vld [vmem:[%s7309_s0] sm:$0xff]   ;;  %v4512_v15 = vld [vmem:[%s7308_s1 + $0x7c] ss:$12 sps:$4 sm:$0xff]   ;;  %v4519_v21 = vld [vmem:[%s7308_s1 + $0xac] ss:$12 sps:$4 sm:$0xff]  }
   0x6   :  { %v4511_v13 = vld [vmem:[%s7308_s1 + $0x60] ss:$12 sps:$4 sm:$0xff]   ;;  %3908 = vmatprep.subr.bf16.mxu1 %v4522_v11  ;;  %3922 = vmatprep.mubr.bf16.mxu1 %v4523_v12  ;;  %v4531_v16 = vld [vmem:[%s7308_s1 + $0x50] ss:$12 sps:$4 sm:$0xff]   ;;  %v4514_v17 = vld [vmem:[%s7308_s1 + $0x78] ss:$12 sps:$4 sm:$0xff]  }
   0x7   :  { %251 = vmatpush1.bf16.msra.mxu0 %v4502_v4  ;;  %v4515_v18 = vld [vmem:[%s7308_s1 + $0x94] ss:$12 sps:$4 sm:$0xff]   ;;  %v4517_v20 = vld [vmem:[%s7308_s1 + $0x90] ss:$12 sps:$4 sm:$0xff]   ;;  %v4545_v25 = vld [vmem:[%s7308_s1 + $0x98] ss:$12 sps:$4 sm:$0xff]  }
   0x8   :  { %252 = vmatprep.subr.bf16.mxu0 %v4503_v5  ;;  %v4536_v19 = vld [vmem:[%s7308_s1 + $0x68] ss:$12 sps:$4 sm:$0xff]   ;;  %v4540_v22 = vld [vmem:[%s7308_s1 + $0x80] ss:$12 sps:$4 sm:$0xff]   ;;  %v5077_v24 = vld [vmem:[%s7310_s2 + $0x4] ss:$12 sps:$4 sm:$0xff]  }
   0x9   :  { %3909 = vmatpush3.bf16.msra.mxu1 %v4522_v11  ;;  %v4521_v23 = vld [vmem:[%s7308_s1 + $0xa8] ss:$12 sps:$4 sm:$0xff]   ;;  %v5085_v26 = vld [vmem:[%s7310_s2] ss:$12 sps:$4 sm:$0xff]   ;;  %v4549_v28 = vld [vmem:[%s7308_s1 + $0xb0] ss:$12 sps:$4 sm:$0xff]  }
   0xa   :  { %3910 = vmatprep.subr.bf16.mxu1 %v4527_v14  ;;  %v5091_v27 = vld [vmem:[%s7310_s2 + $0x1c] ss:$12 sps:$4 sm:$0xff]   ;;  %v5100_v29 = vld [vmem:[%s7310_s2 + $0x18] ss:$12 sps:$4 sm:$0xff]   ;;  %v5107_v30 = vld [vmem:[%s7310_s2 + $0x34] ss:$12 sps:$4 sm:$0xff]  }
   0xb   :  { %253 = vmatpush1.bf16.msra.mxu0 %v4505_v6  ;;  %v4532_v31 = vld [vmem:[%s7309_s0 + $0x8] sm:$0xff]   ;;  %v5116_v32 = vld [vmem:[%s7310_s2 + $0x30] ss:$12 sps:$4 sm:$0xff]   ;;  %v5169_v42 = vld [vmem:[%s7310_s2 + $0x38] ss:$12 sps:$4 sm:$0xff]  }
   0xc   :  { %254 = vmatprep.subr.bf16.mxu0 %v4506_v7  ;;  %v5122_v33 = vld [vmem:[%s7310_s2 + $0x4c] ss:$12 sps:$4 sm:$0xff]   ;;  %v5127_v34 = vld [vmem:[%s7310_s2 + $0x8] ss:$12 sps:$4 sm:$0xff]   ;;  %v5144_v38 = vld [vmem:[%s7310_s2 + $0x64] ss:$12 sps:$4 sm:$0xff]  }
   0xd   :  { %3911 = vmatpush3.bf16.msra.mxu1 %v4527_v14  ;;  %v5134_v36 = vld [vmem:[%s7310_s2 + $0x48] ss:$12 sps:$4 sm:$0xff]   ;;  %v5150_v39 = vld [vmem:[%s7310_s2 + $0x20] ss:$12 sps:$4 sm:$0xff]   ;;  %v4550_v43 = vld [vmem:[%s7309_s0 + $0x18] sm:$0xff]  }
   0xe   :  { %3912 = vmatprep.subr.bf16.mxu1 %v4531_v16  ;;  %v4541_v37 = vld [vmem:[%s7309_s0 + $0x10] sm:$0xff]   ;;  %v5157_v40 = vld [vmem:[%s7310_s2 + $0x60] ss:$12 sps:$4 sm:$0xff]   ;;  %v5163_v41 = vld [vmem:[%s7310_s2 + $0x7c] ss:$12 sps:$4 sm:$0xff]  }
   0xf   :  { %255 = vmatpush1.bf16.msra.mxu0 %v4508_v9  ;;  %v5179_v44 = vld [vmem:[%s7310_s2 + $0x78] ss:$12 sps:$4 sm:$0xff]   ;;  %v5186_v45 = vld [vmem:[%s7310_s2 + $0x94] ss:$12 sps:$4 sm:$0xff]   ;;  %v5192_v46 = vld [vmem:[%s7310_s2 + $0x50] ss:$12 sps:$4 sm:$0xff]  }
  0x10   :  { %256 = vmatprep.subr.bf16.mxu0 %v4509_v10  ;;  %v5201_v47 = vld [vmem:[%s7310_s2 + $0x90] ss:$12 sps:$4 sm:$0xff]   ;;  %v5207_v48 = vld [vmem:[%s7310_s2 + $0xac] ss:$12 sps:$4 sm:$0xff]   ;;  %v5213_v49 = vld [vmem:[%s7310_s2 + $0x68] ss:$12 sps:$4 sm:$0xff]  }
  0x11   :  { %3913 = vmatpush3.bf16.msra.mxu1 %v4531_v16  ;;  %v5220_v50 = vld [vmem:[%s7310_s2 + $0xa8] ss:$12 sps:$4 sm:$0xff]   ;;  %v5228_v51 = vld [vmem:[%s7310_s2 + $0x80] ss:$12 sps:$4 sm:$0xff]   ;;  %v5236_v52 = vld [vmem:[%s7310_s2 + $0x98] ss:$12 sps:$4 sm:$0xff]   ;;  %v81_v16 = vlaneseq }
  0x12   :  { %3914 = vmatprep.subr.bf16.mxu1 %v4536_v19  ;;  %v5245_v53 = vld [vmem:[%s7310_s2 + $0xb0] ss:$12 sps:$4 sm:$0xff]   ;;  %v5261_v55 = vld [vmem:[%s7311_s5] ss:$12 sps:$4 sm:$0xff]   ;;  %v5267_v56 = vld [vmem:[%s7311_s5 + $0x8] ss:$12 sps:$4 sm:$0xff]  }
  0x13   :  { %257 = vmatpush1.bf16.msra.mxu0 %v4511_v13  ;;  %v5256_v54 = vld [vmem:[%s7311_s5 + $0x4] ss:$12 sps:$4 sm:$0xff]   ;;  %v5274_v57 = vld [vmem:[%s7311_s5 + $0x1c] ss:$12 sps:$4 sm:$0xff]   ;;  %v5284_v59 = vld [vmem:[%s7311_s5 + $0x20] ss:$12 sps:$4 sm:$0xff]  }
  0x14   :  { %258 = vmatprep.subr.bf16.mxu0 %v4512_v15  ;;  %v5279_v58 = vld [vmem:[%s7311_s5 + $0x18] ss:$12 sps:$4 sm:$0xff]   ;;  %v5293_v60 = vld [vmem:[%s7311_s5 + $0x34] ss:$12 sps:$4 sm:$0xff]   ;;  %v5299_v61 = vld [vmem:[%s7311_s5 + $0x30] ss:$12 sps:$4 sm:$0xff]  }
  0x15   :  { %3915 = vmatpush3.bf16.msra.mxu1 %v4536_v19  ;;  %v5304_v62 = vld [vmem:[%s7311_s5 + $0x38] ss:$12 sps:$4 sm:$0xff]   ;;  %v5318_v0 = vld [vmem:[%s7311_s5 + $0x48] ss:$12 sps:$4 sm:$0xff]   ;;  %v5323_v2 = vld [vmem:[%s7311_s5 + $0x50] ss:$12 sps:$4 sm:$0xff]  }
  0x16   :  { %3916 = vmatprep.subr.bf16.mxu1 %v4540_v22  ;;  %v5312_v63 = vld [vmem:[%s7311_s5 + $0x4c] ss:$12 sps:$4 sm:$0xff]   ;;  %v5331_v3 = vld [vmem:[%s7311_s5 + $0x64] ss:$12 sps:$4 sm:$0xff]   ;;  %v5342_v5 = vld [vmem:[%s7311_s5 + $0x68] ss:$12 sps:$4 sm:$0xff]  }
  0x17   :  { %259 = vmatpush1.bf16.msra.mxu0 %v4514_v17  ;;  %v5337_v4 = vld [vmem:[%s7311_s5 + $0x60] ss:$12 sps:$4 sm:$0xff]   ;;  %7513 = vst [vmem:[#allocation5_spill] sm:$0xff] %v5342_v5  ;;  %v5348_v6 = vld [vmem:[%s7311_s5 + $0x7c] ss:$12 sps:$4 sm:$0xff]   ;;  %v82_v17 = vshrl.u32 %v81_v16, 7 }
  0x18   :  { %260 = vmatprep.subr.bf16.mxu0 %v4515_v18  ;;  %7512 = vst [vmem:[#allocation4_spill] sm:$0xff] %v5337_v4  ;;  %7514 = vst [vmem:[#allocation6_spill] sm:$0xff] %v5348_v6  ;;  %v5354_v7 = vld [vmem:[%s7311_s5 + $0x78] ss:$12 sps:$4 sm:$0xff]   ;;  %v5361_v8 = vld [vmem:[%s7311_s5 + $0x80] ss:$12 sps:$4 sm:$0xff]  }
  0x19   :  { %3917 = vmatpush3.bf16.msra.mxu1 %v4540_v22  ;;  %7515 = vst [vmem:[#allocation7_spill] sm:$0xff] %v5354_v7  ;;  %7516 = vst [vmem:[#allocation8_spill] sm:$0xff] %v5361_v8  ;;  %v5366_v9 = vld [vmem:[%s7311_s5 + $0x94] ss:$12 sps:$4 sm:$0xff]   ;;  %v5372_v10 = vld [vmem:[%s7311_s5 + $0x90] ss:$12 sps:$4 sm:$0xff]  }
  0x1a   :  { %3918 = vmatprep.subr.bf16.mxu1 %v4545_v25  ;;  %7517 = vst [vmem:[#allocation9_spill] sm:$0xff] %v5366_v9  ;;  %7518 = vst [vmem:[#allocation10_spill] sm:$0xff] %v5372_v10  ;;  %v5377_v11 = vld [vmem:[%s7311_s5 + $0x98] ss:$12 sps:$4 sm:$0xff]   ;;  %v5391_v13 = vld [vmem:[%s7311_s5 + $0xa8] ss:$12 sps:$4 sm:$0xff]  }
  0x1b   :  { %261 = vmatpush1.bf16.msra.mxu0 %v4517_v20  ;;  %7519 = vst [vmem:[#allocation11_spill] sm:$0xff] %v5377_v11  ;;  %7521 = vst [vmem:[#allocation13_spill] sm:$0xff] %v5391_v13  ;;  %v5396_v14 = vld [vmem:[%s7311_s5 + $0xb0] ss:$12 sps:$4 sm:$0xff]   ;;  %v5411_v18 = vsub.s32 0, %v82_v17  ;;  %v5416_v20 = vsub.s32 1, %v82_v17 }
  0x1c   :  { %262 = vmatprep.subr.bf16.mxu0 %v4519_v21  ;;  %7522 = vst [vmem:[#allocation14_spill] sm:$0xff] %v5396_v14  ;;  %v5401_v15 = vld [vmem:[%s7312_s6 + $0x4] ss:$12 sps:$4 sm:$0xff]   ;;  %v79_v19 = vld [vmem:[%s7313_s3] sm:$0x7] }
  0x1d   :  { %3919 = vmatpush3.bf16.msra.mxu1 %v4545_v25  ;;  %7523 = vst [vmem:[#allocation15_spill] sm:$0xff] %v5401_v15  ;;  %v5419_v21 = vrot.slane %v79_v19, %v5411_v18  ;;  %v5422_v22 = vrot.slane %v79_v19, %v5416_v20 }
  0x1e   :  { %3920 = vmatprep.subr.bf16.mxu1 %v4549_v28 }
  0x1f   :  { %263 = vmatpush1.bf16.msra.mxu0 %v4521_v23 }
  0x20   :  { %722 = vmatprep.subr.bf16.mxu0 %v5077_v24 }
  0x21   :  { %3921 = vmatpush3.bf16.msra.mxu1 %v4549_v28 }
  0x22   :  { %281 = vmatmul.mubr.bf16.vlgmr.msra.gmra.mrb[0].mxu0 %v4523_v12  ;;  %3930 = vmatprep.subr.bf16.mxu1 %v7322_v35  ;;  %v5382_v12 = vld [vmem:[%s7311_s5 + $0xac] ss:$12 sps:$4 sm:$0xff]  }
  0x23   :  { %723 = vmatpush1.bf16.msra.mxu0 %v5085_v26  ;;  %290 = vmatprep.mubr.bf16.mxu0 %v7320_v1  ;;  %7520 = vst [vmem:[#allocation12_spill] sm:$0xff] %v5382_v12 }
  0x24   :  { %724 = vmatprep.subr.bf16.mxu0 %v5091_v27  ;;  %3923 = vmatmul.mubr.bf16.vlgmr.msra.gmra.mrb[0].mxu1 %v4532_v31 }
  0x25   :  { %3931 = vmatpush3.bf16.msra.mxu1 %v5127_v34  ;;  %3926 = vmatprep.mubr.bf16.mxu1 %v4541_v37 }
  0x26   :  { %3932 = vmatprep.subr.bf16.mxu1 %v7322_v35 }
  0x27   :  { %725 = vmatpush1.bf16.msra.mxu0 %v5100_v29 }
  0x28   :  { %726 = vmatprep.subr.bf16.mxu0 %v5107_v30 }
  0x29   :  { %3933 = vmatpush3.bf16.msra.mxu1 %v5150_v39 }
  0x2a   :  { %291 = vmatmul.mubr.bf16.gmra.mrb[4].mxu0 %v4532_v31  ;;  %3934 = vmatprep.subr.bf16.mxu1 %v7322_v35 }
  0x2b   :  { %727 = vmatpush1.bf16.msra.mxu0 %v5116_v32  ;;  %300 = vmatprep.mubr.bf16.mxu0 %v7320_v1 }
  0x2c   :  { %728 = vmatprep.subr.bf16.mxu0 %v5122_v33  ;;  %3927 = vmatmul.mubr.bf16.gmra.mrb[4].mxu1 %v4550_v43 }
  0x2d   :  { %3935 = vmatpush3.bf16.msra.mxu1 %v5169_v42  ;;  %3946 = vmatprep.mubr.msk.bf16.mxu1 %vm4943_vm0, %v7322_v35 }
  0x2e   :  { %3936 = vmatprep.subr.bf16.mxu1 %v7322_v35 }
  0x2f   :  { %729 = vmatpush1.bf16.msra.mxu0 %v5134_v36 }
  0x30   :  { %730 = vmatprep.subr.bf16.mxu0 %v5144_v38 }
  0x31   :  { %3937 = vmatpush3.bf16.msra.mxu1 %v5192_v46 }
  0x32   :  { %301 = vmatmul.mubr.bf16.gmra.mrb[8].mxu0 %v4541_v37  ;;  %3938 = vmatprep.subr.bf16.mxu1 %v7322_v35 }
  0x33   :  { %731 = vmatpush1.bf16.msra.mxu0 %v5157_v40  ;;  %310 = vmatprep.mubr.bf16.mxu0 %v7320_v1 }
  0x34   :  { %732 = vmatprep.subr.bf16.mxu0 %v5163_v41 }
  0x35   :  { %3939 = vmatpush3.bf16.msra.mxu1 %v5213_v49 }
  0x36   :  { %3940 = vmatprep.subr.bf16.mxu1 %v7322_v35 }
  0x37   :  { %733 = vmatpush1.bf16.msra.mxu0 %v5179_v44 }
  0x38   :  { %734 = vmatprep.subr.bf16.mxu0 %v5186_v45 }
  0x39   :  { %3941 = vmatpush3.bf16.msra.mxu1 %v5228_v51 }
  0x3a   :  { %311 = vmatmul.mubr.bf16.gmra.mrb[12].mxu0 %v4550_v43  ;;  %3942 = vmatprep.subr.bf16.mxu1 %v7322_v35 }
  0x3b   :  { %735 = vmatpush1.bf16.msra.mxu0 %v5201_v47  ;;  %754 = vmatprep.mubr.bf16.mxu0 %v7320_v1 }
  0x3c   :  { %736 = vmatprep.subr.bf16.mxu0 %v5207_v48 }
  0x3d   :  { %3943 = vmatpush3.bf16.msra.mxu1 %v5236_v52 }
  0x3e   :  { %3944 = vmatprep.subr.bf16.mxu1 %v7322_v35 }
  0x3f   :  { %737 = vmatpush1.bf16.msra.mxu0 %v5220_v50 }
  0x40   :  { %985 = vmatprep.subr.bf16.mxu0 %v5256_v54 }
  0x41   :  { %3945 = vmatpush3.bf16.msra.mxu1 %v5245_v53 }
  0x42   :  { %755 = vmatmul.mubr.bf16.vlgmr.msra.gmra.mrb[16].mxu0 %v7320_v1  ;;  %3950 = vmatprep.subr.bf16.mxu1 %v7322_v35 }
  0x43   :  { %1017 = vmatprep.mubr.bf16.mxu0 %v7320_v1  ;;  %986 = vmatpush1.bf16.msra.mxu0 %v5261_v55 }
  0x44   :  { %3947 = vmatmul.mubr.bf16.vlgmr.msra.gmra.mrb[8].mxu1 %v7320_v1  ;;  %987 = vmatprep.subr.bf16.mxu0 %v5274_v57  ;;  %v5427_v1 = vsub.s32 2, %v82_v17 }
  0x45   :  { %3966 = vmatprep.mubr.msk.bf16.mxu1 %vm4943_vm0, %v7322_v35  ;;  %3951 = vmatpush3.bf16.msra.mxu1 %v5267_v56 }
  0x46   :  { %3952 = vmatprep.subr.bf16.mxu1 %v7322_v35 }
  0x47   :  { %988 = vmatpush1.bf16.msra.mxu0 %v5279_v58 }
  0x48   :  { %989 = vmatprep.subr.bf16.mxu0 %v5293_v60 }
  0x49   :  { %3953 = vmatpush3.bf16.msra.mxu1 %v5284_v59 }
  0x4a   :  { %3954 = vmatprep.subr.bf16.mxu1 %v7322_v35 }
  0x4b   :  { %990 = vmatpush1.bf16.msra.mxu0 %v5299_v61 }
  0x4c   :  { %991 = vmatprep.subr.bf16.mxu0 %v5312_v63 }
  0x4d   :  { %3955 = vmatpush3.bf16.msra.mxu1 %v5304_v62 }
  0x4e   :  { %3956 = vmatprep.subr.bf16.mxu1 %v7322_v35 }
  0x4f   :  { %992 = vmatpush1.bf16.msra.mxu0 %v5318_v0 }
  0x50   :  { %993 = vmatprep.subr.bf16.mxu0 %v5331_v3 }
  0x51   :  { %3957 = vmatpush3.bf16.msra.mxu1 %v5323_v2 }
  0x52   :  { %3958 = vmatprep.subr.bf16.mxu1 %v7322_v35 }
  0x53   :  { %994 = vmatpush1.bf16.msra.mxu0 %v5337_v4 }
  0x54   :  { %995 = vmatprep.subr.bf16.mxu0 %v5348_v6 }
  0x55   :  { %3959 = vmatpush3.bf16.msra.mxu1 %v5342_v5 }
  0x56   :  { %3960 = vmatprep.subr.bf16.mxu1 %v7322_v35 }
  0x57   :  { %996 = vmatpush1.bf16.msra.mxu0 %v5354_v7 }
  0x58   :  { %997 = vmatprep.subr.bf16.mxu0 %v5366_v9 }
  0x59   :  { %3961 = vmatpush3.bf16.msra.mxu1 %v5361_v8 }
  0x5a   :  { %3962 = vmatprep.subr.bf16.mxu1 %v7322_v35 }
  0x5b   :  { %998 = vmatpush1.bf16.msra.mxu0 %v5372_v10 }
  0x5c   :  { %999 = vmatprep.subr.bf16.mxu0 %v5382_v12 }
  0x5d   :  { %3963 = vmatpush3.bf16.msra.mxu1 %v5377_v11 }
  0x5e   :  { %3964 = vmatprep.subr.bf16.mxu1 %v7322_v35 }
  0x5f   :  { %1000 = vmatpush1.bf16.msra.mxu0 %v5391_v13  ;;  %v92_v13 = vrot.slane %v79_v19, %v5427_v1 }
  0x60   :  { %1226 = vmatprep.subr.bf16.mxu0 %v5401_v15 }
  0x61   :  { %3965 = vmatpush3.bf16.msra.mxu1 %v5396_v14 }
  0x62   :  { %3970 = vmatprep.subr.bf16.mxu1 %v7322_v35 }
  0xf5   :  { %v282_v23 = vpop.f32.mrb[0].mxu0 }
  0xf6   :  { %v283_v25 = vadd.f32 %v282_v23, %v5419_v21  ;;  %v284_v28 = vpop.f32.mrb[1].mxu0 }
  0xf7   :  { %v285_v31 = vadd.f32 %v284_v28, %v5422_v22  ;;  %v286_v37 = vpop.f32.mrb[2].mxu0  ;;  %v3924_v9 = vpop.f32.mrb[0].mxu1 }
  0xf8   :  { %v287_v43 = vadd.f32 %v286_v37, %v5419_v21  ;;  %v288_v16 = vpop.f32.mrb[3].mxu0  ;;  %v364_v8 = vadd.f32 %v3924_v9, %v92_v13 }
  0xf9   :  { %v5429_v35 = vpack.c.bf16 %v285_v31, %v283_v25  ;;  %v289_v15 = vadd.f32 %v288_v16, %v5422_v22  ;;  %v355_v25 = vpop.f32.mrb[1].mxu1 }
  0xfb   :  { %v5432_v14 = vpack.c.bf16 %v289_v15, %v287_v43  ;;  %v356_v15 = vadd.f32 %v355_v25, %v92_v13  ;;  %v3925_v43 = vpop.f32.mrb[2].mxu1 }
  0xfc   :  { %v367_v19 = vadd.f32 %v3925_v43, %v92_v13  ;;  %v358_v7 = vpop.f32.mrb[3].mxu1 }
  0xfd   :  { %7524 = vst [vmem:[#allocation16_spill] sm:$0xff] %v5432_v14  ;;  %v292_v12 = vpop.f32.mrb[4].mxu0  ;;  %v3658_v14 = vpack.c.bf16 %v364_v8, %v364_v8  ;;  %v3654_v6 = vpack.c.bf16 %v356_v15, %v356_v15  ;;  %v359_v5 = vadd.f32 %v358_v7, %v92_v13 }
  0xfe   :  { %v293_v23 = vadd.f32 %v292_v12, %v5419_v21  ;;  %v294_v11 = vpop.f32.mrb[5].mxu0 }
  0xff   :  { %v295_v28 = vadd.f32 %v294_v11, %v5422_v22  ;;  %v296_v10 = vpop.f32.mrb[6].mxu0  ;;  %495 = vst [vmem:[#allocation3 + $0x20] sm:$0xf] %v3658_v14  ;;  %v3660_v11 = vpack.c.bf16 %v367_v19, %v367_v19  ;;  %491 = vst [vmem:[#allocation3 + $0x8] sm:$0xf] %v3654_v6  ;;  %v3928_v8 = vpop.f32.mrb[4].mxu1 }
 0x100   :  { %v297_v37 = vadd.f32 %v296_v10, %v5419_v21  ;;  %v298_v17 = vpop.f32.mrb[7].mxu0  ;;  %v3656_v10 = vpack.c.bf16 %v359_v5, %v359_v5  ;;  %v371_v7 = vpop.f32.mrb[5].mxu1 }
 0x101   :  { %v3657_v31 = vpack.c.bf16 %v295_v28, %v293_v23  ;;  %v299_v16 = vadd.f32 %v298_v17, %v5422_v22  ;;  %497 = vst [vmem:[#allocation3 + $0x2c] sm:$0xf] %v3660_v11  ;;  %v372_v15 = vadd.f32 %v371_v7, %v92_v13  ;;  %v3929_v6 = vpop.f32.mrb[6].mxu1 }
 0x102   :  { %493 = vst [vmem:[#allocation3 + $0x14] sm:$0xf] %v3656_v10  ;;  %v383_v43 = vadd.f32 %v3929_v6, %v92_v13 }
 0x103   :  { %494 = vst [vmem:[#allocation3 + $0x18] sm:$0xff] %v3657_v31  ;;  %v3659_v12 = vpack.c.bf16 %v299_v16, %v297_v37  ;;  %v380_v31 = vadd.f32 %v3928_v8, %v92_v13 }
 0x104   :  { %v3668_v10 = vpack.c.bf16 %v383_v43, %v383_v43  ;;  %v559_v43 = vunpack.c.l.bf16 %v5429_v35 }
 0x105   :  { %496 = vst [vmem:[#allocation3 + $0x24] sm:$0xff] %v3659_v12  ;;  %v302_v4 = vpop.f32.mrb[8].mxu0  ;;  %v3666_v5 = vpack.c.bf16 %v380_v31, %v380_v31  ;;  %v3662_v12 = vpack.c.bf16 %v372_v15, %v372_v15  ;;  %v523_v31 = vld [vmem:[%s7314_s4] sm:$0x7] }
 0x106   :  { %v303_v9 = vadd.f32 %v302_v4, %v5419_v21  ;;  %v304_v23 = vpop.f32.mrb[9].mxu0  ;;  %v374_v4 = vpop.f32.mrb[7].mxu1  ;;  %505 = vst [vmem:[#allocation3 + $0x5c] sm:$0xf] %v3668_v10  ;;  %v5454_v6 = vrot.slane %v523_v31, %v5416_v20 }
 0x107   :  { %v305_v28 = vadd.f32 %v304_v23, %v5422_v22  ;;  %v306_v17 = vpop.f32.mrb[10].mxu0  ;;  %v375_v11 = vadd.f32 %v374_v4, %v92_v13  ;;  %503 = vst [vmem:[#allocation3 + $0x50] sm:$0xf] %v3666_v5  ;;  %499 = vst [vmem:[#allocation3 + $0x38] sm:$0xf] %v3662_v12 }
 0x108   :  { %v307_v25 = vadd.f32 %v306_v17, %v5419_v21  ;;  %v308_v37 = vpop.f32.mrb[11].mxu0 }
 0x109   :  { %v3661_v14 = vpack.c.bf16 %v305_v28, %v303_v9  ;;  %v309_v16 = vadd.f32 %v308_v37, %v5422_v22  ;;  %v3664_v17 = vpack.c.bf16 %v375_v11, %v375_v11 }
 0x10b   :  { %498 = vst [vmem:[#allocation3 + $0x30] sm:$0xff] %v3661_v14  ;;  %v3663_v19 = vpack.c.bf16 %v309_v16, %v307_v25  ;;  %501 = vst [vmem:[#allocation3 + $0x44] sm:$0xf] %v3664_v17  ;;  %v5451_v16 = vrot.slane %v523_v31, %v5411_v18 }
 0x10d   :  { %500 = vst [vmem:[#allocation3 + $0x3c] sm:$0xff] %v3663_v19  ;;  %v312_v23 = vpop.f32.mrb[12].mxu0 }
 0x10e   :  { %v313_v8 = vadd.f32 %v312_v23, %v5419_v21  ;;  %v314_v9 = vpop.f32.mrb[13].mxu0 }
 0x10f   :  { %v315_v28 = vadd.f32 %v314_v9, %v5422_v22  ;;  %v316_v37 = vpop.f32.mrb[14].mxu0 }
 0x110   :  { %v317_v13 = vadd.f32 %v316_v37, %v5419_v21  ;;  %v318_v25 = vpop.f32.mrb[15].mxu0  ;;  %v560_v21 = vunpack.c.h.bf16 %v5429_v35 }
 0x111   :  { %v3665_v7 = vpack.c.bf16 %v315_v28, %v313_v8  ;;  %v319_v14 = vadd.f32 %v318_v25, %v5422_v22 }
 0x113   :  { %502 = vst [vmem:[#allocation3 + $0x48] sm:$0xff] %v3665_v7  ;;  %v3667_v15 = vpack.c.bf16 %v319_v14, %v317_v13  ;;  %v5461_v14 = vrot.slane %v523_v31, %v5427_v1  ;;  %v5469_v31 = vld [vmem:[%s7312_s6] ss:$12 sps:$4 sm:$0xff]  }
 0x115   :  { %504 = vst [vmem:[#allocation3 + $0x54] sm:$0xff] %v3667_v15  ;;  %v756_v5 = vpop.f32.mrb[16].mxu0 }
 0x116   :  { %v757_v4 = vadd.f32 %v756_v5, %v5451_v16  ;;  %v758_v19 = vpop.f32.mrb[17].mxu0 }
 0x117   :  { %v759_v12 = vadd.f32 %v758_v19, %v5454_v6  ;;  %v760_v22 = vpop.f32.mrb[18].mxu0  ;;  %v797_v9 = vpop.f32.mrb[8].mxu1 }
 0x118   :  { %v803_v11 = vadd.f32 %v757_v4, %v559_v43  ;;  %v761_v10 = vpop.f32.mrb[19].mxu0  ;;  %v3948_v28 = vpop.f32.mrb[9].mxu1  ;;  %v798_v5 = vadd.f32 %v797_v9, %v5461_v14  ;;  %v558_v43 = vld [vmem:[#allocation3 + $0x8] sm:$0xf] }
 0x119   :  { %v810_v23 = vadd.f32 %v759_v12, %v560_v21  ;;  %v800_v37 = vpop.f32.mrb[10].mxu1  ;;  %v561_v19 = vunpack.c.l.bf16 %v558_v43  ;;  %v5474_v9 = vld [vmem:[%s7312_s6 + $0x8] ss:$12 sps:$4 sm:$0xff]   ;;  %v5519_v43 = vld [vmem:[%s7312_s6 + $0x38] ss:$12 sps:$4 sm:$0xff]  }
 0x11a   :  { %v3564_v17 = vmul.f32 -1.442695, %v803_v11  ;;  %v3949_v13 = vpop.f32.mrb[11].mxu1  ;;  %v5483_v37 = vld [vmem:[%s7312_s6 + $0x1c] ss:$12 sps:$4 sm:$0xff]  }
 0x11b   :  { %v3565_v8 = vmul.f32 -1.442695, %v810_v23  ;;  %v5492_v13 = vld [vmem:[%s7312_s6 + $0x18] ss:$12 sps:$4 sm:$0xff]  }
 0x11c   :  { %4637 = vpow2.f32 %v3564_v17 }
 0x11d   :  { %4639 = vpow2.f32 %v3565_v8 }
 0x126   :  { %v4638_v25 = vpop.eup %4637 }
 0x127   :  { %v807_v7 = vadd.f32 1.0, %v4638_v25  ;;  %v4640_v35 = vpop.eup %4639  ;;  %v5497_v25 = vld [vmem:[%s7312_s6 + $0x20] ss:$12 sps:$4 sm:$0xff]  }
 0x128   :  { %v814_v15 = vadd.f32 1.0, %v4640_v35  ;;  %v5504_v35 = vld [vmem:[%s7312_s6 + $0x34] ss:$12 sps:$4 sm:$0xff]  }
 0x129   :  { %4641 = vrcp.f32 %v807_v7  ;;  %v7525_v7 = vmov 0.0  }
 0x12a   :  { %4643 = vrcp.f32 %v814_v15  ;;  %v7526_v15 = vmov 0  }
 0x133   :  { %v4642_v4 = vpop.eup %4641 }
 0x134   :  { %v817_v21 = vmul.f32 %v4642_v4, %v798_v5  ;;  %v4644_v22 = vpop.eup %4643  ;;  %v5514_v5 = vld [vmem:[%s7312_s6 + $0x30] ss:$12 sps:$4 sm:$0xff]   ;;  %v5526_v4 = vld [vmem:[%s7312_s6 + $0x4c] ss:$12 sps:$4 sm:$0xff]  }
 0x135   :  { %v820_v11 = vsub.f32 1.0, %v4644_v22  ;;  %v822_v17 = vmul.f32 0.0, %v4644_v22  ;;  %v5552_v22 = vld [vmem:[%s7312_s6 + $0x60] ss:$12 sps:$4 sm:$0xff]  }
 0x136   :  { %v818_v12 = vadd.f32 %v817_v21, %v561_v19  ;;  %v5533_v19 = vld [vmem:[%s7312_s6 + $0x48] ss:$12 sps:$4 sm:$0xff]   ;;  %v5538_v21 = vld [vmem:[%s7312_s6 + $0x50] ss:$12 sps:$4 sm:$0xff]   ;;  %7527 = vst [vmem:[#allocation17_spill] sm:$0xff] %v5552_v22 }
 0x138   :  { %4645 = vtanh.f32 %v818_v12  ;;  %v5545_v12 = vld [vmem:[%s7312_s6 + $0x64] ss:$12 sps:$4 sm:$0xff]  }
 0x142   :  { %v4646_v10 = vpop.eup %4645 }
 0x143   :  { %v821_v23 = vmul.f32 %v4646_v10, %v820_v11  ;;  %v5557_v11 = vld [vmem:[%s7312_s6 + $0x68] ss:$12 sps:$4 sm:$0xff]  }
 0x144   :  { %7528 = vst [vmem:[#allocation18_spill] sm:$0xff] %v5557_v11  ;;  %v5564_v10 = vld [vmem:[%s7312_s6 + $0x7c] ss:$12 sps:$4 sm:$0xff]  }
 0x145   :  { %v5464_v8 = vadd.f32 %v822_v17, %v821_v23  ;;  %7529 = vst [vmem:[#allocation19_spill] sm:$0xff] %v5564_v10  ;;  %v5571_v23 = vld [vmem:[%s7312_s6 + $0x78] ss:$12 sps:$4 sm:$0xff]   ;;  %v5576_v17 = vld [vmem:[%s7312_s6 + $0x80] ss:$12 sps:$4 sm:$0xff]  }
 0x146   :  { %7530 = vst [vmem:[#allocation20_spill] sm:$0xff] %v5571_v23  ;;  %7531 = vst [vmem:[#allocation21_spill] sm:$0xff] %v5576_v17 }
 0x147   :  { %v5478_v28 = vpack.c.bf16 %v5464_v8, %v5464_v8 }
 0x149   :  { %1018 = vmatmul.mubr.bf16.vlgmr.msra.gmra.mrb[20].mxu0 %v5478_v28  ;;  %3967 = vmatmul.mubr.bf16.vlgmr.msra.gmra.mrb[12].mxu1 %v5478_v28 }
 0x14a   :  { %1227 = vmatpush1.bf16.msra.mxu0 %v5469_v31  ;;  %3971 = vmatpush3.bf16.msra.mxu1 %v5474_v9 }
 0x14b   :  { %1228 = vmatprep.subr.bf16.mxu0 %v5483_v37  ;;  %3972 = vmatprep.subr.bf16.mxu1 %v7525_v7 }
 0x14c   :  { %1258 = vmatprep.mubr.bf16.mxu0 %v7526_v15  ;;  %3986 = vmatprep.mubr.msk.bf16.mxu1 %vm4943_vm0, %v7525_v7 }
 0x14e   :  { %1229 = vmatpush1.bf16.msra.mxu0 %v5492_v13  ;;  %3973 = vmatpush3.bf16.msra.mxu1 %v5497_v25 }
 0x14f   :  { %1230 = vmatprep.subr.bf16.mxu0 %v5504_v35  ;;  %3974 = vmatprep.subr.bf16.mxu1 %v7525_v7 }
 0x152   :  { %1231 = vmatpush1.bf16.msra.mxu0 %v5514_v5  ;;  %3975 = vmatpush3.bf16.msra.mxu1 %v5519_v43 }
 0x153   :  { %1232 = vmatprep.subr.bf16.mxu0 %v5526_v4  ;;  %3976 = vmatprep.subr.bf16.mxu1 %v7525_v7 }
 0x156   :  { %1233 = vmatpush1.bf16.msra.mxu0 %v5533_v19  ;;  %3977 = vmatpush3.bf16.msra.mxu1 %v5538_v21 }
 0x157   :  { %1234 = vmatprep.subr.bf16.mxu0 %v5545_v12  ;;  %3978 = vmatprep.subr.bf16.mxu1 %v7525_v7 }
 0x15a   :  { %1235 = vmatpush1.bf16.msra.mxu0 %v5552_v22  ;;  %3979 = vmatpush3.bf16.msra.mxu1 %v5557_v11  ;;  %v5583_v22 = vld [vmem:[%s7312_s6 + $0x94] ss:$12 sps:$4 sm:$0xff]   ;;  %v5590_v11 = vld [vmem:[%s7312_s6 + $0x90] ss:$12 sps:$4 sm:$0xff]  }
 0x15b   :  { %1236 = vmatprep.subr.bf16.mxu0 %v5564_v10  ;;  %3980 = vmatprep.subr.bf16.mxu1 %v7525_v7  ;;  %7532 = vst [vmem:[#allocation22_spill] sm:$0xff] %v5583_v22  ;;  %v5595_v10 = vld [vmem:[%s7312_s6 + $0x98] ss:$12 sps:$4 sm:$0xff]  }
 0x15e   :  { %1237 = vmatpush1.bf16.msra.mxu0 %v5571_v23  ;;  %3981 = vmatpush3.bf16.msra.mxu1 %v5576_v17  ;;  %v5602_v23 = vld [vmem:[%s7312_s6 + $0xac] ss:$12 sps:$4 sm:$0xff]   ;;  %v5609_v17 = vld [vmem:[%s7312_s6 + $0xa8] ss:$12 sps:$4 sm:$0xff]  }
 0x15f   :  { %1238 = vmatprep.subr.bf16.mxu0 %v5583_v22  ;;  %3982 = vmatprep.subr.bf16.mxu1 %v7525_v7  ;;  %v5614_v22 = vld [vmem:[%s7312_s6 + $0xb0] ss:$12 sps:$4 sm:$0xff]  }
 0x162   :  { %1239 = vmatpush1.bf16.msra.mxu0 %v5590_v11  ;;  %3983 = vmatpush3.bf16.msra.mxu1 %v5595_v10 }
 0x163   :  { %1240 = vmatprep.subr.bf16.mxu0 %v5602_v23  ;;  %3984 = vmatprep.subr.bf16.mxu1 %v7525_v7 }
 0x166   :  { %1241 = vmatpush1.bf16.msra.mxu0 %v5609_v17  ;;  %3985 = vmatpush3.bf16.msra.mxu1 %v5614_v22 }
 0x167   :  { %1334 = vmatprep.subr.bf16.mxu0 %v5077_v24  ;;  %3990 = vmatprep.subr.bf16.mxu1 %v7525_v7  ;;  %v7533_v24 = vld [vmem:[#allocation4_spill] sm:$0xff] }
 0x169   :  { %1259 = vmatmul.mubr.bf16.vlgmr.msra.gmra.mrb[20].mxu0 %v7526_v15  ;;  %3987 = vmatmul.mubr.bf16.vlgmr.msra.gmra.mrb[16].mxu1 %v7526_v15 }
 0x16a   :  { %1335 = vmatpush1.bf16.msra.mxu0 %v5085_v26  ;;  %3991 = vmatpush3.bf16.msra.mxu1 %v5127_v34  ;;  %v7534_v26 = vld [vmem:[#allocation5_spill] sm:$0xff]  ;;  %v7540_v34 = vld [vmem:[#allocation11_spill] sm:$0xff] }
 0x16b   :  { %1336 = vmatprep.subr.bf16.mxu0 %v5091_v27  ;;  %3992 = vmatprep.subr.bf16.mxu1 %v7525_v7  ;;  %v7535_v27 = vld [vmem:[#allocation6_spill] sm:$0xff] }
 0x16c   :  { %1366 = vmatprep.mubr.bf16.mxu0 %v7526_v15  ;;  %4006 = vmatprep.mubr.msk.bf16.mxu1 %vm4943_vm0, %v7525_v7 }
 0x16e   :  { %1337 = vmatpush1.bf16.msra.mxu0 %v5100_v29  ;;  %3993 = vmatpush3.bf16.msra.mxu1 %v5150_v39  ;;  %v7536_v29 = vld [vmem:[#allocation7_spill] sm:$0xff]  ;;  %v7543_v39 = vld [vmem:[#allocation14_spill] sm:$0xff] }
 0x16f   :  { %1338 = vmatprep.subr.bf16.mxu0 %v5107_v30  ;;  %3994 = vmatprep.subr.bf16.mxu1 %v7525_v7  ;;  %v7537_v30 = vld [vmem:[#allocation8_spill] sm:$0xff] }
 0x172   :  { %1339 = vmatpush1.bf16.msra.mxu0 %v5116_v32  ;;  %3995 = vmatpush3.bf16.msra.mxu1 %v5169_v42  ;;  %v7538_v32 = vld [vmem:[#allocation9_spill] sm:$0xff] }
 0x173   :  { %1340 = vmatprep.subr.bf16.mxu0 %v5122_v33  ;;  %3996 = vmatprep.subr.bf16.mxu1 %v7525_v7  ;;  %v7539_v33 = vld [vmem:[#allocation10_spill] sm:$0xff] }
 0x176   :  { %1341 = vmatpush1.bf16.msra.mxu0 %v5134_v36  ;;  %3997 = vmatpush3.bf16.msra.mxu1 %v5192_v46  ;;  %v7541_v36 = vld [vmem:[#allocation12_spill] sm:$0xff] }
 0x177   :  { %1342 = vmatprep.subr.bf16.mxu0 %v5144_v38  ;;  %3998 = vmatprep.subr.bf16.mxu1 %v7525_v7  ;;  %v7542_v38 = vld [vmem:[#allocation13_spill] sm:$0xff]  ;;  %v540_v46 = vld [vmem:[%s7315_s8] sm:$0x7] }
 0x17a   :  { %1343 = vmatpush1.bf16.msra.mxu0 %v5157_v40  ;;  %3999 = vmatpush3.bf16.msra.mxu1 %v5213_v49  ;;  %v7544_v40 = vld [vmem:[#allocation15_spill] sm:$0xff]  ;;  %v545_v49 = vrot.slane %v540_v46, %v5411_v18 }
 0x17b   :  { %1344 = vmatprep.subr.bf16.mxu0 %v5163_v41  ;;  %4000 = vmatprep.subr.bf16.mxu1 %v7525_v7 }
 0x17e   :  { %1345 = vmatpush1.bf16.msra.mxu0 %v5179_v44  ;;  %4001 = vmatpush3.bf16.msra.mxu1 %v5228_v51  ;;  %v549_v51 = vrot.slane %v540_v46, %v5416_v20 }
 0x17f   :  { %1346 = vmatprep.subr.bf16.mxu0 %v5186_v45  ;;  %4002 = vmatprep.subr.bf16.mxu1 %v7525_v7 }
 0x182   :  { %1347 = vmatpush1.bf16.msra.mxu0 %v5201_v47  ;;  %4003 = vmatpush3.bf16.msra.mxu1 %v5236_v52  ;;  %v506_v47 = vld [vmem:[%s7316_s7] sm:$0x7] }
 0x183   :  { %1348 = vmatprep.subr.bf16.mxu0 %v5207_v48  ;;  %4004 = vmatprep.subr.bf16.mxu1 %v7525_v7  ;;  %v511_v48 = vrot.slane %v506_v47, %v5411_v18 }
 0x185   :  { %v5706_v52 = vadd.f32 %v545_v49, %v511_v48  ;;  %v5716_v48 = vrot.slane %v506_v47, %v5427_v1 }
 0x186   :  { %1349 = vmatpush1.bf16.msra.mxu0 %v5220_v50  ;;  %4005 = vmatpush3.bf16.msra.mxu1 %v5245_v53  ;;  %v515_v50 = vrot.slane %v506_v47, %v5416_v20 }
 0x187   :  { %1437 = vmatprep.subr.bf16.mxu0 %v5256_v54  ;;  %4010 = vmatprep.subr.bf16.mxu1 %v7525_v7  ;;  %7545 = vst [vmem:[#allocation4_spill] sm:$0xff] %v5706_v52  ;;  %7548 = vst [vmem:[#allocation7_spill] sm:$0xff] %v5716_v48 }
 0x188   :  { %v5708_v54 = vadd.f32 %v549_v51, %v515_v50 }
 0x189   :  { %1367 = vmatmul.mubr.bf16.vlgmr.msra.gmra.mrb[24].mxu0 %v5478_v28  ;;  %4007 = vmatmul.mubr.bf16.vlgmr.msra.gmra.mrb[20].mxu1 %v5478_v28 }
 0x18a   :  { %1438 = vmatpush1.bf16.msra.mxu0 %v5261_v55  ;;  %4011 = vmatpush3.bf16.msra.mxu1 %v5267_v56  ;;  %7546 = vst [vmem:[#allocation5_spill] sm:$0xff] %v5708_v54 }
 0x18b   :  { %1439 = vmatprep.subr.bf16.mxu0 %v5274_v57  ;;  %4012 = vmatprep.subr.bf16.mxu1 %v7525_v7 }
 0x18c   :  { %1469 = vmatprep.mubr.bf16.mxu0 %v7526_v15  ;;  %4026 = vmatprep.mubr.msk.bf16.mxu1 %vm4943_vm0, %v7525_v7 }
 0x18e   :  { %1440 = vmatpush1.bf16.msra.mxu0 %v5279_v58  ;;  %4013 = vmatpush3.bf16.msra.mxu1 %v5284_v59 }
 0x18f   :  { %1441 = vmatprep.subr.bf16.mxu0 %v5293_v60  ;;  %4014 = vmatprep.subr.bf16.mxu1 %v7525_v7 }
 0x192   :  { %1442 = vmatpush1.bf16.msra.mxu0 %v5299_v61  ;;  %4015 = vmatpush3.bf16.msra.mxu1 %v5304_v62 }
 0x193   :  { %1443 = vmatprep.subr.bf16.mxu0 %v5312_v63  ;;  %4016 = vmatprep.subr.bf16.mxu1 %v7525_v7 }
 0x196   :  { %1444 = vmatpush1.bf16.msra.mxu0 %v5318_v0  ;;  %4017 = vmatpush3.bf16.msra.mxu1 %v5323_v2 }
 0x197   :  { %1445 = vmatprep.subr.bf16.mxu0 %v5331_v3  ;;  %4018 = vmatprep.subr.bf16.mxu1 %v7525_v7 }
 0x19a   :  { %1446 = vmatpush1.bf16.msra.mxu0 %v7533_v24  ;;  %4019 = vmatpush3.bf16.msra.mxu1 %v7534_v26 }
 0x19b   :  { %1447 = vmatprep.subr.bf16.mxu0 %v7535_v27  ;;  %4020 = vmatprep.subr.bf16.mxu1 %v7525_v7 }
 0x19e   :  { %1448 = vmatpush1.bf16.msra.mxu0 %v7536_v29  ;;  %4021 = vmatpush3.bf16.msra.mxu1 %v7537_v30 }
 0x19f   :  { %1449 = vmatprep.subr.bf16.mxu0 %v7538_v32  ;;  %4022 = vmatprep.subr.bf16.mxu1 %v7525_v7 }
 0x1a2   :  { %1450 = vmatpush1.bf16.msra.mxu0 %v7539_v33  ;;  %4023 = vmatpush3.bf16.msra.mxu1 %v7540_v34 }
 0x1a3   :  { %1451 = vmatprep.subr.bf16.mxu0 %v7541_v36  ;;  %4024 = vmatprep.subr.bf16.mxu1 %v7525_v7 }
 0x1a6   :  { %1452 = vmatpush1.bf16.msra.mxu0 %v7542_v38  ;;  %4025 = vmatpush3.bf16.msra.mxu1 %v7543_v39 }
 0x1a7   :  { %1519 = vmatprep.subr.bf16.mxu0 %v7544_v40  ;;  %4030 = vmatprep.subr.bf16.mxu1 %v7525_v7 }
 0x21c   :  { %v1060_v41 = vpop.f32.mrb[12].mxu1 }
 0x21d   :  { %v3968_v42 = vpop.f32.mrb[13].mxu1 }
 0x21e   :  { %v1063_v44 = vpop.f32.mrb[14].mxu1 }
 0x21f   :  { %v3969_v45 = vpop.f32.mrb[15].mxu1  ;;  %v5713_v44 = vrot.slane %v540_v46, %v5427_v1 }
 0x221   :  { %7547 = vst [vmem:[#allocation6_spill] sm:$0xff] %v5713_v44 }
 0x23c   :  { %v1260_v53 = vpop.f32.mrb[20].mxu0  ;;  %v1301_v55 = vpop.f32.mrb[16].mxu1 }
 0x23d   :  { %v4431_v56 = vadd.f32 %v5706_v52, %v1260_v53  ;;  %v1262_v57 = vpop.f32.mrb[21].mxu0  ;;  %v3988_v58 = vpop.f32.mrb[17].mxu1  ;;  %v1302_v50 = vadd.f32 %v1301_v55, %v5713_v44  ;;  %v1061_v53 = vadd.f32 %v1060_v41, %v5716_v48 }
 0x23e   :  { %v1264_v59 = vpop.f32.mrb[22].mxu0  ;;  %v1304_v60 = vpop.f32.mrb[18].mxu1  ;;  %v4433_v18 = vadd.f32 %v5708_v54, %v1262_v57 }
 0x23f   :  { %v3614_v61 = vmul.f32 -1.442695, %v4431_v56  ;;  %v1265_v62 = vpop.f32.mrb[23].mxu0  ;;  %v3989_v63 = vpop.f32.mrb[19].mxu1  ;;  %v7549_v60 = vld [vmem:[#allocation16_spill] sm:$0xff] }
 0x240   :  { %v3615_v28 = vmul.f32 -1.442695, %v4433_v18  ;;  %v1332_v1 = vunpack.c.h.bf16 %v7549_v60 }
 0x241   :  { %4647 = vpow2.f32 %v3614_v61  ;;  %v1331_v61 = vunpack.c.l.bf16 %v7549_v60 }
 0x242   :  { %4649 = vpow2.f32 %v3615_v28 }
 0x24b   :  { %v4648_v20 = vpop.eup %4647 }
 0x24c   :  { %v1311_v42 = vadd.f32 1.0, %v4648_v20  ;;  %v4650_v45 = vpop.eup %4649 }
 0x24d   :  { %v1318_v49 = vadd.f32 1.0, %v4650_v45 }
 0x24e   :  { %4651 = vrcp.f32 %v1311_v42 }
 0x24f   :  { %4653 = vrcp.f32 %v1318_v49 }
 0x258   :  { %v4652_v51 = vpop.eup %4651 }
 0x259   :  { %v1321_v56 = vmul.f32 %v4652_v51, %v1302_v50  ;;  %v4654_v49 = vpop.eup %4653 }
 0x25a   :  { %v1324_v51 = vsub.f32 1.0, %v4654_v49 }
 0x25b   :  { %v1322_v57 = vadd.f32 %v1321_v56, %v1061_v53 }
 0x25c   :  { %v1368_v58 = vpop.f32.mrb[24].mxu0  ;;  %v1409_v59 = vpop.f32.mrb[20].mxu1 }
 0x25d   :  { %4655 = vtanh.f32 %v1322_v57  ;;  %v1369_v46 = vadd.f32 %v1368_v58, %v5451_v16  ;;  %v1370_v62 = vpop.f32.mrb[25].mxu0  ;;  %v4008_v63 = vpop.f32.mrb[21].mxu1  ;;  %v1326_v57 = vmul.f32 0.0, %v4654_v49 }
 0x25e   :  { %v1371_v47 = vadd.f32 %v1370_v62, %v5454_v6  ;;  %v1372_v55 = vpop.f32.mrb[26].mxu0  ;;  %v1412_v18 = vpop.f32.mrb[22].mxu1 }
 0x25f   :  { %v1415_v28 = vadd.f32 %v1369_v46, %v1331_v61  ;;  %v1373_v41 = vpop.f32.mrb[27].mxu0  ;;  %v4009_v20 = vpop.f32.mrb[23].mxu1  ;;  %v5726_v61 = vld [vmem:[#allocation3 + $0x14] ss:$12 sps:$4 sm:$0xff]   ;;  %v1410_v46 = vadd.f32 %v1409_v59, %v5461_v14 }
 0x260   :  { %v1422_v42 = vadd.f32 %v1371_v47, %v1332_v1  ;;  %v1333_v47 = vunpack.c.l.bf16 %v5726_v61  ;;  %v7551_v59 = vld [vmem:[#allocation18_spill] sm:$0xff] }
 0x261   :  { %v3616_v45 = vmul.f32 -1.442695, %v1415_v28 }
 0x262   :  { %v3617_v50 = vmul.f32 -1.442695, %v1422_v42 }
 0x263   :  { %4657 = vpow2.f32 %v3616_v45 }
 0x264   :  { %4659 = vpow2.f32 %v3617_v50 }
 0x267   :  { %v4656_v53 = vpop.eup %4655 }
 0x268   :  { %v1325_v56 = vmul.f32 %v4656_v53, %v1324_v51  ;;  %v7552_v53 = vld [vmem:[#allocation19_spill] sm:$0xff] }
 0x26a   :  { %v5724_v58 = vadd.f32 %v1326_v57, %v1325_v56  ;;  %v7553_v56 = vld [vmem:[#allocation20_spill] sm:$0xff]  ;;  %v7554_v57 = vld [vmem:[#allocation21_spill] sm:$0xff] }
 0x26d   :  { %v4658_v60 = vpop.eup %4657 }
 0x26e   :  { %v1419_v63 = vadd.f32 1.0, %v4658_v60  ;;  %v4660_v62 = vpop.eup %4659  ;;  %v7555_v60 = vld [vmem:[#allocation22_spill] sm:$0xff] }
 0x26f   :  { %v1426_v55 = vadd.f32 1.0, %v4660_v62  ;;  %v5777_v62 = vld [vmem:[%s7310_s2 + $0x4] ss:$12 sps:$4 sm:$0xff]  }
 0x270   :  { %4661 = vrcp.f32 %v1419_v63  ;;  %v1518_v63 = vpack.c.bf16 %v5724_v58, %v5724_v58 }
 0x271   :  { %4663 = vrcp.f32 %v1426_v55  ;;  %v5784_v55 = vld [vmem:[%s7310_s2] ss:$12 sps:$4 sm:$0xff]  }
 0x27a   :  { %v4662_v1 = vpop.eup %4661 }
 0x27b   :  { %v1429_v18 = vmul.f32 %v4662_v1, %v1410_v46  ;;  %v4664_v41 = vpop.eup %4663  ;;  %v5790_v46 = vld [vmem:[%s7310_s2 + $0x8] ss:$12 sps:$4 sm:$0xff]  }
 0x27c   :  { %v1432_v20 = vsub.f32 1.0, %v4664_v41  ;;  %v1434_v49 = vmul.f32 %v4664_v41, %v5464_v8  ;;  %v7550_v8 = vld [vmem:[#allocation17_spill] sm:$0xff]  ;;  %v5825_v41 = vld [vmem:[%s7310_s2 + $0x30] ss:$12 sps:$4 sm:$0xff]  }
 0x27d   :  { %v1430_v28 = vadd.f32 %v1429_v18, %v1333_v47  ;;  %v5796_v1 = vld [vmem:[%s7310_s2 + $0x1c] ss:$12 sps:$4 sm:$0xff]   ;;  %v5806_v47 = vld [vmem:[%s7310_s2 + $0x18] ss:$12 sps:$4 sm:$0xff]   ;;  %v5812_v18 = vld [vmem:[%s7310_s2 + $0x20] ss:$12 sps:$4 sm:$0xff]  }
 0x27f   :  { %4665 = vtanh.f32 %v1430_v28  ;;  %v5818_v28 = vld [vmem:[%s7310_s2 + $0x34] ss:$12 sps:$4 sm:$0xff]  }
 0x289   :  { %v4666_v42 = vpop.eup %4665 }
 0x28a   :  { %v1433_v45 = vmul.f32 %v4666_v42, %v1432_v20  ;;  %v5831_v20 = vld [vmem:[%s7310_s2 + $0x38] ss:$12 sps:$4 sm:$0xff]  }
 0x28b   :  { %v5837_v42 = vld [vmem:[%s7310_s2 + $0x4c] ss:$12 sps:$4 sm:$0xff]  }
 0x28c   :  { %v5731_v50 = vadd.f32 %v1434_v49, %v1433_v45  ;;  %v5844_v45 = vld [vmem:[%s7310_s2 + $0x48] ss:$12 sps:$4 sm:$0xff]   ;;  %v5850_v49 = vld [vmem:[%s7310_s2 + $0x50] ss:$12 sps:$4 sm:$0xff]  }
 0x28d   :  { %7556 = vst [vmem:[#allocation8_spill] sm:$0xff] %v5844_v45  ;;  %7557 = vst [vmem:[#allocation9_spill] sm:$0xff] %v5850_v49 }
 0x28e   :  { %v5735_v51 = vpack.c.bf16 %v5731_v50, %v5731_v50 }
 0x290   :  { %1470 = vmatmul.mubr.bf16.vlgmr.msra.gmra.mrb[28].mxu0 %v5735_v51  ;;  %4027 = vmatmul.mubr.bf16.vlgmr.msra.gmra.mrb[24].mxu1 %v5735_v51 }
 0x291   :  { %1520 = vmatpush1.bf16.msra.mxu0 %v5469_v31  ;;  %4031 = vmatpush3.bf16.msra.mxu1 %v5474_v9 }
 0x292   :  { %1521 = vmatprep.subr.bf16.mxu0 %v5483_v37  ;;  %4032 = vmatprep.subr.bf16.mxu1 %v7525_v7 }
 0x293   :  { %1551 = vmatprep.mubr.bf16.mxu0 %v7526_v15  ;;  %4046 = vmatprep.mubr.msk.bf16.mxu1 %vm4943_vm0, %v7525_v7 }
 0x295   :  { %1522 = vmatpush1.bf16.msra.mxu0 %v5492_v13  ;;  %4033 = vmatpush3.bf16.msra.mxu1 %v5497_v25 }
 0x296   :  { %1523 = vmatprep.subr.bf16.mxu0 %v5504_v35  ;;  %4034 = vmatprep.subr.bf16.mxu1 %v7525_v7 }
 0x299   :  { %1524 = vmatpush1.bf16.msra.mxu0 %v5514_v5  ;;  %4035 = vmatpush3.bf16.msra.mxu1 %v5519_v43 }
 0x29a   :  { %1525 = vmatprep.subr.bf16.mxu0 %v5526_v4  ;;  %4036 = vmatprep.subr.bf16.mxu1 %v7525_v7 }
 0x29d   :  { %1526 = vmatpush1.bf16.msra.mxu0 %v5533_v19  ;;  %4037 = vmatpush3.bf16.msra.mxu1 %v5538_v21 }
 0x29e   :  { %1527 = vmatprep.subr.bf16.mxu0 %v5545_v12  ;;  %4038 = vmatprep.subr.bf16.mxu1 %v7525_v7 }
 0x2a1   :  { %1528 = vmatpush1.bf16.msra.mxu0 %v7550_v8  ;;  %4039 = vmatpush3.bf16.msra.mxu1 %v7551_v59 }
 0x2a2   :  { %1529 = vmatprep.subr.bf16.mxu0 %v7552_v53  ;;  %4040 = vmatprep.subr.bf16.mxu1 %v7525_v7 }
 0x2a5   :  { %1530 = vmatpush1.bf16.msra.mxu0 %v7553_v56  ;;  %4041 = vmatpush3.bf16.msra.mxu1 %v7554_v57 }
 0x2a6   :  { %1531 = vmatprep.subr.bf16.mxu0 %v7555_v60  ;;  %4042 = vmatprep.subr.bf16.mxu1 %v7525_v7 }
 0x2a9   :  { %1532 = vmatpush1.bf16.msra.mxu0 %v5590_v11  ;;  %4043 = vmatpush3.bf16.msra.mxu1 %v5595_v10 }
 0x2aa   :  { %1533 = vmatprep.subr.bf16.mxu0 %v5602_v23  ;;  %4044 = vmatprep.subr.bf16.mxu1 %v7525_v7 }
 0x2ad   :  { %1534 = vmatpush1.bf16.msra.mxu0 %v5609_v17  ;;  %4045 = vmatpush3.bf16.msra.mxu1 %v5614_v22 }
 0x2ae   :  { %1627 = vmatprep.subr.bf16.mxu0 %v5777_v62  ;;  %4050 = vmatprep.subr.bf16.mxu1 %v7525_v7 }
 0x2b0   :  { %1552 = vmatmul.mubr.bf16.vlgmr.msra.gmra.mrb[28].mxu0 %v1518_v63  ;;  %4047 = vmatmul.mubr.bf16.vlgmr.msra.gmra.mrb[28].mxu1 %v1518_v63  ;;  %v5856_v63 = vld [vmem:[%s7310_s2 + $0x64] ss:$12 sps:$4 sm:$0xff]  }
 0x2b1   :  { %1628 = vmatpush1.bf16.msra.mxu0 %v5784_v55  ;;  %4051 = vmatpush3.bf16.msra.mxu1 %v5790_v46  ;;  %7558 = vst [vmem:[#allocation10_spill] sm:$0xff] %v5856_v63 }
 0x2b2   :  { %1629 = vmatprep.subr.bf16.mxu0 %v5796_v1  ;;  %4052 = vmatprep.subr.bf16.mxu1 %v7525_v7 }
 0x2b3   :  { %1659 = vmatprep.mubr.bf16.mxu0 %v7526_v15  ;;  %4066 = vmatprep.mubr.msk.bf16.mxu1 %vm4943_vm0, %v7525_v7 }
 0x2b5   :  { %1630 = vmatpush1.bf16.msra.mxu0 %v5806_v47  ;;  %4053 = vmatpush3.bf16.msra.mxu1 %v5812_v18 }
 0x2b6   :  { %1631 = vmatprep.subr.bf16.mxu0 %v5818_v28  ;;  %4054 = vmatprep.subr.bf16.mxu1 %v7525_v7 }
 0x2b9   :  { %1632 = vmatpush1.bf16.msra.mxu0 %v5825_v41  ;;  %4055 = vmatpush3.bf16.msra.mxu1 %v5831_v20 }
 0x2ba   :  { %1633 = vmatprep.subr.bf16.mxu0 %v5837_v42  ;;  %4056 = vmatprep.subr.bf16.mxu1 %v7525_v7 }
 0x2bd   :  { %1634 = vmatpush1.bf16.msra.mxu0 %v5844_v45  ;;  %4057 = vmatpush3.bf16.msra.mxu1 %v5850_v49  ;;  %v5863_v45 = vld [vmem:[%s7310_s2 + $0x60] ss:$12 sps:$4 sm:$0xff]   ;;  %v5869_v49 = vld [vmem:[%s7310_s2 + $0x68] ss:$12 sps:$4 sm:$0xff]  }
 0x2be   :  { %1635 = vmatprep.subr.bf16.mxu0 %v5856_v63  ;;  %4058 = vmatprep.subr.bf16.mxu1 %v7525_v7  ;;  %7559 = vst [vmem:[#allocation11_spill] sm:$0xff] %v5863_v45  ;;  %7560 = vst [vmem:[#allocation12_spill] sm:$0xff] %v5869_v49  ;;  %v5875_v63 = vld [vmem:[%s7310_s2 + $0x7c] ss:$12 sps:$4 sm:$0xff]  }
 0x2bf   :  { %7561 = vst [vmem:[#allocation13_spill] sm:$0xff] %v5875_v63 }
 0x2c1   :  { %1636 = vmatpush1.bf16.msra.mxu0 %v5863_v45  ;;  %4059 = vmatpush3.bf16.msra.mxu1 %v5869_v49  ;;  %v5882_v45 = vld [vmem:[%s7310_s2 + $0x78] ss:$12 sps:$4 sm:$0xff]   ;;  %v5888_v49 = vld [vmem:[%s7310_s2 + $0x80] ss:$12 sps:$4 sm:$0xff]  }
 0x2c2   :  { %1637 = vmatprep.subr.bf16.mxu0 %v5875_v63  ;;  %4060 = vmatprep.subr.bf16.mxu1 %v7525_v7  ;;  %7562 = vst [vmem:[#allocation14_spill] sm:$0xff] %v5882_v45  ;;  %7563 = vst [vmem:[#allocation15_spill] sm:$0xff] %v5888_v49  ;;  %v5894_v63 = vld [vmem:[%s7310_s2 + $0x94] ss:$12 sps:$4 sm:$0xff]  }
 0x2c3   :  { %7564 = vst [vmem:[#allocation16_spill] sm:$0xff] %v5894_v63 }
 0x2c5   :  { %1638 = vmatpush1.bf16.msra.mxu0 %v5882_v45  ;;  %4061 = vmatpush3.bf16.msra.mxu1 %v5888_v49  ;;  %v5901_v45 = vld [vmem:[%s7310_s2 + $0x90] ss:$12 sps:$4 sm:$0xff]   ;;  %v5907_v49 = vld [vmem:[%s7310_s2 + $0x98] ss:$12 sps:$4 sm:$0xff]  }
 0x2c6   :  { %1639 = vmatprep.subr.bf16.mxu0 %v5894_v63  ;;  %4062 = vmatprep.subr.bf16.mxu1 %v7525_v7  ;;  %7565 = vst [vmem:[#allocation17_spill] sm:$0xff] %v5901_v45  ;;  %7566 = vst [vmem:[#allocation18_spill] sm:$0xff] %v5907_v49  ;;  %v5913_v63 = vld [vmem:[%s7310_s2 + $0xac] ss:$12 sps:$4 sm:$0xff]  }
 0x2c7   :  { %7567 = vst [vmem:[#allocation19_spill] sm:$0xff] %v5913_v63 }
 0x2c9   :  { %1640 = vmatpush1.bf16.msra.mxu0 %v5901_v45  ;;  %4063 = vmatpush3.bf16.msra.mxu1 %v5907_v49  ;;  %v5920_v45 = vld [vmem:[%s7310_s2 + $0xa8] ss:$12 sps:$4 sm:$0xff]   ;;  %v5926_v49 = vld [vmem:[%s7310_s2 + $0xb0] ss:$12 sps:$4 sm:$0xff]  }
 0x2ca   :  { %1641 = vmatprep.subr.bf16.mxu0 %v5913_v63  ;;  %4064 = vmatprep.subr.bf16.mxu1 %v7525_v7  ;;  %7568 = vst [vmem:[#allocation20_spill] sm:$0xff] %v5920_v45  ;;  %7569 = vst [vmem:[#allocation21_spill] sm:$0xff] %v5926_v49  ;;  %v5932_v63 = vld [vmem:[%s7311_s5 + $0x4] ss:$12 sps:$4 sm:$0xff]  }
 0x2cb   :  { %7570 = vst [vmem:[#allocation22_spill] sm:$0xff] %v5932_v63 }
 0x2cd   :  { %1642 = vmatpush1.bf16.msra.mxu0 %v5920_v45  ;;  %4065 = vmatpush3.bf16.msra.mxu1 %v5926_v49  ;;  %v5941_v45 = vld [vmem:[%s7311_s5] ss:$12 sps:$4 sm:$0xff]   ;;  %v5947_v49 = vld [vmem:[%s7311_s5 + $0x8] ss:$12 sps:$4 sm:$0xff]  }
 0x2ce   :  { %1730 = vmatprep.subr.bf16.mxu0 %v5932_v63  ;;  %4070 = vmatprep.subr.bf16.mxu1 %v7525_v7  ;;  %7571 = vst [vmem:[#allocation23_spill] sm:$0xff] %v5947_v49  ;;  %v5953_v63 = vld [vmem:[%s7311_s5 + $0x1c] ss:$12 sps:$4 sm:$0xff]  }
 0x2cf   :  { %7572 = vst [vmem:[#allocation24_spill] sm:$0xff] %v5953_v63 }
 0x2d0   :  { %1660 = vmatmul.mubr.bf16.vlgmr.msra.gmra.mrb[32].mxu0 %v5735_v51  ;;  %4067 = vmatmul.mubr.bf16.vlgmr.msra.gmra.mrb[32].mxu1 %v5735_v51  ;;  %v5963_v51 = vld [vmem:[%s7311_s5 + $0x18] ss:$12 sps:$4 sm:$0xff]  }
 0x2d1   :  { %1731 = vmatpush1.bf16.msra.mxu0 %v5941_v45  ;;  %4071 = vmatpush3.bf16.msra.mxu1 %v5947_v49  ;;  %7573 = vst [vmem:[#allocation25_spill] sm:$0xff] %v5963_v51  ;;  %v5969_v49 = vld [vmem:[%s7311_s5 + $0x20] ss:$12 sps:$4 sm:$0xff]  }
 0x2d2   :  { %1732 = vmatprep.subr.bf16.mxu0 %v5953_v63  ;;  %4072 = vmatprep.subr.bf16.mxu1 %v7525_v7  ;;  %7574 = vst [vmem:[#allocation26_spill] sm:$0xff] %v5969_v49  ;;  %v5975_v63 = vld [vmem:[%s7311_s5 + $0x34] ss:$12 sps:$4 sm:$0xff]  }
 0x2d3   :  { %1762 = vmatprep.mubr.bf16.mxu0 %v7526_v15  ;;  %4086 = vmatprep.mubr.msk.bf16.mxu1 %vm4943_vm0, %v7525_v7  ;;  %7575 = vst [vmem:[#allocation27_spill] sm:$0xff] %v5975_v63 }
 0x2d5   :  { %1733 = vmatpush1.bf16.msra.mxu0 %v5963_v51  ;;  %4073 = vmatpush3.bf16.msra.mxu1 %v5969_v49  ;;  %v5982_v51 = vld [vmem:[%s7311_s5 + $0x30] ss:$12 sps:$4 sm:$0xff]   ;;  %v5988_v49 = vld [vmem:[%s7311_s5 + $0x38] ss:$12 sps:$4 sm:$0xff]  }
 0x2d6   :  { %1734 = vmatprep.subr.bf16.mxu0 %v5975_v63  ;;  %4074 = vmatprep.subr.bf16.mxu1 %v7525_v7  ;;  %7576 = vst [vmem:[#allocation28_spill] sm:$0xff] %v5982_v51  ;;  %7577 = vst [vmem:[#allocation29_spill] sm:$0xff] %v5988_v49  ;;  %v5994_v63 = vld [vmem:[%s7311_s5 + $0x4c] ss:$12 sps:$4 sm:$0xff]  }
 0x2d7   :  { %7578 = vst [vmem:[#allocation30_spill] sm:$0xff] %v5994_v63 }
 0x2d9   :  { %1735 = vmatpush1.bf16.msra.mxu0 %v5982_v51  ;;  %4075 = vmatpush3.bf16.msra.mxu1 %v5988_v49 }
 0x2da   :  { %1736 = vmatprep.subr.bf16.mxu0 %v5994_v63  ;;  %4076 = vmatprep.subr.bf16.mxu1 %v7525_v7 }
 0x2dd   :  { %1737 = vmatpush1.bf16.msra.mxu0 %v5318_v0  ;;  %4077 = vmatpush3.bf16.msra.mxu1 %v5323_v2 }
 0x2de   :  { %1738 = vmatprep.subr.bf16.mxu0 %v5331_v3  ;;  %4078 = vmatprep.subr.bf16.mxu1 %v7525_v7 }
 0x2e1   :  { %1739 = vmatpush1.bf16.msra.mxu0 %v7533_v24  ;;  %4079 = vmatpush3.bf16.msra.mxu1 %v7534_v26 }
 0x2e2   :  { %1740 = vmatprep.subr.bf16.mxu0 %v7535_v27  ;;  %4080 = vmatprep.subr.bf16.mxu1 %v7525_v7 }
 0x2e5   :  { %1741 = vmatpush1.bf16.msra.mxu0 %v7536_v29  ;;  %4081 = vmatpush3.bf16.msra.mxu1 %v7537_v30 }
 0x2e6   :  { %1742 = vmatprep.subr.bf16.mxu0 %v7538_v32  ;;  %4082 = vmatprep.subr.bf16.mxu1 %v7525_v7 }
 0x2e9   :  { %1743 = vmatpush1.bf16.msra.mxu0 %v7539_v33  ;;  %4083 = vmatpush3.bf16.msra.mxu1 %v7540_v34 }
 0x2ea   :  { %1744 = vmatprep.subr.bf16.mxu0 %v7541_v36  ;;  %4084 = vmatprep.subr.bf16.mxu1 %v7525_v7 }
 0x2ed   :  { %1745 = vmatpush1.bf16.msra.mxu0 %v7542_v38  ;;  %4085 = vmatpush3.bf16.msra.mxu1 %v7543_v39 }
 0x2ee   :  { %1812 = vmatprep.subr.bf16.mxu0 %v7544_v40  ;;  %4090 = vmatprep.subr.bf16.mxu1 %v7525_v7 }
 0x363   :  { %v1512_v0 = vpop.f32.mrb[24].mxu1 }
 0x364   :  { %v4028_v2 = vpop.f32.mrb[25].mxu1 }
 0x365   :  { %v1515_v3 = vpop.f32.mrb[26].mxu1 }
 0x366   :  { %v4029_v24 = vpop.f32.mrb[27].mxu1 }
 0x383   :  { %v1553_v26 = vpop.f32.mrb[28].mxu0  ;;  %v1594_v27 = vpop.f32.mrb[28].mxu1 }
 0x384   :  { %v4435_v29 = vadd.f32 %v5706_v52, %v1553_v26  ;;  %v1555_v30 = vpop.f32.mrb[29].mxu0  ;;  %v4048_v32 = vpop.f32.mrb[29].mxu1  ;;  %v1595_v51 = vadd.f32 %v1594_v27, %v5713_v44 }
 0x385   :  { %v1557_v33 = vpop.f32.mrb[30].mxu0  ;;  %v1597_v34 = vpop.f32.mrb[30].mxu1  ;;  %v4437_v39 = vadd.f32 %v5708_v54, %v1555_v30  ;;  %v1513_v32 = vadd.f32 %v1512_v0, %v5716_v48 }
 0x386   :  { %v3618_v36 = vmul.f32 -1.442695, %v4435_v29  ;;  %v1558_v38 = vpop.f32.mrb[31].mxu0  ;;  %v4049_v63 = vpop.f32.mrb[31].mxu1  ;;  %v1622_v29 = vld [vmem:[#allocation3 + $0x18] sm:$0xff] }
 0x387   :  { %v3619_v40 = vmul.f32 -1.442695, %v4437_v39  ;;  %v1624_v30 = vunpack.c.l.bf16 %v1622_v29  ;;  %v1625_v0 = vunpack.c.h.bf16 %v1622_v29 }
 0x388   :  { %4667 = vpow2.f32 %v3618_v36 }
 0x389   :  { %4669 = vpow2.f32 %v3619_v40 }
 0x392   :  { %v4668_v49 = vpop.eup %4667 }
 0x393   :  { %v1604_v2 = vadd.f32 1.0, %v4668_v49  ;;  %v4670_v3 = vpop.eup %4669 }
 0x394   :  { %v1611_v24 = vadd.f32 1.0, %v4670_v3 }
 0x395   :  { %4671 = vrcp.f32 %v1604_v2 }
 0x396   :  { %4673 = vrcp.f32 %v1611_v24 }
 0x39f   :  { %v4672_v26 = vpop.eup %4671 }
 0x3a0   :  { %v1614_v33 = vmul.f32 %v4672_v26, %v1595_v51  ;;  %v4674_v26 = vpop.eup %4673 }
 0x3a2   :  { %v1615_v34 = vadd.f32 %v1614_v33, %v1513_v32  ;;  %v1617_v33 = vsub.f32 1.0, %v4674_v26 }
 0x3a3   :  { %v1661_v63 = vpop.f32.mrb[32].mxu0  ;;  %v1702_v38 = vpop.f32.mrb[32].mxu1 }
 0x3a4   :  { %4675 = vtanh.f32 %v1615_v34  ;;  %v1662_v36 = vadd.f32 %v1661_v63, %v5451_v16  ;;  %v1663_v39 = vpop.f32.mrb[33].mxu0  ;;  %v4068_v49 = vpop.f32.mrb[33].mxu1  ;;  %v1619_v63 = vmul.f32 %v4674_v26, %v5724_v58 }
 0x3a5   :  { %v1664_v40 = vadd.f32 %v1663_v39, %v5454_v6  ;;  %v1665_v2 = vpop.f32.mrb[34].mxu0  ;;  %v1705_v3 = vpop.f32.mrb[34].mxu1 }
 0x3a6   :  { %v1708_v27 = vadd.f32 %v1662_v36, %v1624_v30  ;;  %v1666_v44 = vpop.f32.mrb[35].mxu0  ;;  %v4069_v54 = vpop.f32.mrb[35].mxu1  ;;  %v1626_v36 = vunpack.c.h.bf16 %v5726_v61  ;;  %v7595_v61 = vld [vmem:[#allocation24_spill] sm:$0xff] }
 0x3a7   :  { %v1715_v24 = vadd.f32 %v1664_v40, %v1625_v0  ;;  %v1703_v54 = vadd.f32 %v1702_v38, %v5461_v14  ;;  %v6136_v38 = vld [vmem:[%s7311_s5 + $0x50] ss:$12 sps:$4 sm:$0xff]  }
 0x3a8   :  { %v3620_v51 = vmul.f32 -1.442695, %v1708_v27 }
 0x3a9   :  { %v3621_v32 = vmul.f32 -1.442695, %v1715_v24 }
 0x3aa   :  { %4677 = vpow2.f32 %v3620_v51 }
 0x3ab   :  { %4679 = vpow2.f32 %v3621_v32  ;;  %v6142_v32 = vld [vmem:[%s7311_s5 + $0x64] ss:$12 sps:$4 sm:$0xff]  }
 0x3ae   :  { %v4676_v34 = vpop.eup %4675 }
 0x3af   :  { %v1618_v48 = vmul.f32 %v4676_v34, %v1617_v33  ;;  %v6149_v33 = vld [vmem:[%s7311_s5 + $0x60] ss:$12 sps:$4 sm:$0xff]   ;;  %v6155_v34 = vld [vmem:[%s7311_s5 + $0x68] ss:$12 sps:$4 sm:$0xff]  }
 0x3b1   :  { %v6025_v49 = vadd.f32 %v1619_v63, %v1618_v48  ;;  %v6161_v63 = vld [vmem:[%s7311_s5 + $0x7c] ss:$12 sps:$4 sm:$0xff]  }
 0x3b4   :  { %v4678_v39 = vpop.eup %4677 }
 0x3b5   :  { %v1712_v2 = vadd.f32 1.0, %v4678_v39  ;;  %v4680_v30 = vpop.eup %4679  ;;  %v6168_v39 = vld [vmem:[%s7311_s5 + $0x78] ss:$12 sps:$4 sm:$0xff]  }
 0x3b6   :  { %v1719_v44 = vadd.f32 1.0, %v4680_v30  ;;  %v6180_v30 = vld [vmem:[%s7311_s5 + $0x94] ss:$12 sps:$4 sm:$0xff]  }
 0x3b7   :  { %4681 = vrcp.f32 %v1712_v2  ;;  %v6174_v2 = vld [vmem:[%s7311_s5 + $0x80] ss:$12 sps:$4 sm:$0xff]  }
 0x3b8   :  { %4683 = vrcp.f32 %v1719_v44  ;;  %v6187_v44 = vld [vmem:[%s7311_s5 + $0x90] ss:$12 sps:$4 sm:$0xff]  }
 0x3c1   :  { %v4682_v29 = vpop.eup %4681 }
 0x3c2   :  { %v1722_v40 = vmul.f32 %v4682_v29, %v1703_v54  ;;  %v4684_v27 = vpop.eup %4683  ;;  %v6193_v54 = vld [vmem:[%s7311_s5 + $0x98] ss:$12 sps:$4 sm:$0xff]  }
 0x3c3   :  { %v1725_v0 = vsub.f32 1.0, %v4684_v27  ;;  %v1727_v48 = vmul.f32 %v4684_v27, %v5731_v50  ;;  %v7596_v50 = vld [vmem:[#allocation25_spill] sm:$0xff] }
 0x3c4   :  { %v1723_v3 = vadd.f32 %v1722_v40, %v1626_v36  ;;  %v6199_v29 = vld [vmem:[%s7311_s5 + $0xac] ss:$12 sps:$4 sm:$0xff]   ;;  %v6206_v36 = vld [vmem:[%s7311_s5 + $0xa8] ss:$12 sps:$4 sm:$0xff]   ;;  %v6212_v40 = vld [vmem:[%s7311_s5 + $0xb0] ss:$12 sps:$4 sm:$0xff]  }
 0x3c6   :  { %4685 = vtanh.f32 %v1723_v3  ;;  %v6218_v3 = vld [vmem:[%s7312_s6 + $0x4] ss:$12 sps:$4 sm:$0xff]  }
 0x3d0   :  { %v4686_v58 = vpop.eup %4685 }
 0x3d1   :  { %v1726_v51 = vmul.f32 %v4686_v58, %v1725_v0 }
 0x3d3   :  { %v6030_v24 = vadd.f32 %v1727_v48, %v1726_v51 }
 0x3d5   :  { %v6034_v26 = vpack.c.bf16 %v6030_v24, %v6030_v24 }
 0x3d7   :  { %1763 = vmatmul.mubr.bf16.vlgmr.msra.gmra.mrb[36].mxu0 %v6034_v26  ;;  %4087 = vmatmul.mubr.bf16.vlgmr.msra.gmra.mrb[36].mxu1 %v6034_v26 }
 0x3d8   :  { %1813 = vmatpush1.bf16.msra.mxu0 %v5469_v31  ;;  %4091 = vmatpush3.bf16.msra.mxu1 %v5474_v9  ;;  %v1811_v31 = vpack.c.bf16 %v6025_v49, %v6025_v49  ;;  %v7579_v9 = vld [vmem:[#allocation8_spill] sm:$0xff] }
 0x3d9   :  { %1814 = vmatprep.subr.bf16.mxu0 %v5483_v37  ;;  %4092 = vmatprep.subr.bf16.mxu1 %v7525_v7  ;;  %v7580_v37 = vld [vmem:[#allocation9_spill] sm:$0xff]  ;;  %7602 = vst [vmem:[#allocation8_spill] sm:$0xff] %v6142_v32 }
 0x3da   :  { %1844 = vmatprep.mubr.bf16.mxu0 %v7526_v15  ;;  %4106 = vmatprep.mubr.msk.bf16.mxu1 %vm4943_vm0, %v7525_v7  ;;  %7603 = vst [vmem:[#allocation9_spill] sm:$0xff] %v6149_v33 }
 0x3dc   :  { %1815 = vmatpush1.bf16.msra.mxu0 %v5492_v13  ;;  %4093 = vmatpush3.bf16.msra.mxu1 %v5497_v25  ;;  %v7581_v13 = vld [vmem:[#allocation10_spill] sm:$0xff]  ;;  %v7582_v25 = vld [vmem:[#allocation11_spill] sm:$0xff] }
 0x3dd   :  { %1816 = vmatprep.subr.bf16.mxu0 %v5504_v35  ;;  %4094 = vmatprep.subr.bf16.mxu1 %v7525_v7  ;;  %v7583_v35 = vld [vmem:[#allocation12_spill] sm:$0xff]  ;;  %7604 = vst [vmem:[#allocation10_spill] sm:$0xff] %v6155_v34  ;;  %7605 = vst [vmem:[#allocation11_spill] sm:$0xff] %v6161_v63 }
 0x3de   :  { %7606 = vst [vmem:[#allocation12_spill] sm:$0xff] %v6168_v39 }
 0x3e0   :  { %1817 = vmatpush1.bf16.msra.mxu0 %v5514_v5  ;;  %4095 = vmatpush3.bf16.msra.mxu1 %v5519_v43  ;;  %v7584_v5 = vld [vmem:[#allocation13_spill] sm:$0xff]  ;;  %v7585_v43 = vld [vmem:[#allocation14_spill] sm:$0xff] }
 0x3e1   :  { %1818 = vmatprep.subr.bf16.mxu0 %v5526_v4  ;;  %4096 = vmatprep.subr.bf16.mxu1 %v7525_v7  ;;  %v7586_v4 = vld [vmem:[#allocation15_spill] sm:$0xff]  ;;  %7607 = vst [vmem:[#allocation13_spill] sm:$0xff] %v6174_v2  ;;  %7608 = vst [vmem:[#allocation14_spill] sm:$0xff] %v6180_v30 }
 0x3e2   :  { %7609 = vst [vmem:[#allocation15_spill] sm:$0xff] %v6187_v44 }
 0x3e4   :  { %1819 = vmatpush1.bf16.msra.mxu0 %v5533_v19  ;;  %4097 = vmatpush3.bf16.msra.mxu1 %v5538_v21  ;;  %v7587_v19 = vld [vmem:[#allocation16_spill] sm:$0xff]  ;;  %v7588_v21 = vld [vmem:[#allocation17_spill] sm:$0xff] }
 0x3e5   :  { %1820 = vmatprep.subr.bf16.mxu0 %v5545_v12  ;;  %4098 = vmatprep.subr.bf16.mxu1 %v7525_v7  ;;  %v7589_v12 = vld [vmem:[#allocation18_spill] sm:$0xff]  ;;  %7610 = vst [vmem:[#allocation16_spill] sm:$0xff] %v6193_v54  ;;  %7611 = vst [vmem:[#allocation17_spill] sm:$0xff] %v6199_v29 }
 0x3e6   :  { %7612 = vst [vmem:[#allocation18_spill] sm:$0xff] %v6206_v36 }
 0x3e8   :  { %1821 = vmatpush1.bf16.msra.mxu0 %v7550_v8  ;;  %4099 = vmatpush3.bf16.msra.mxu1 %v7551_v59  ;;  %v7597_v8 = vld [vmem:[#allocation26_spill] sm:$0xff]  ;;  %v7598_v59 = vld [vmem:[#allocation27_spill] sm:$0xff] }
 0x3e9   :  { %1822 = vmatprep.subr.bf16.mxu0 %v7552_v53  ;;  %4100 = vmatprep.subr.bf16.mxu1 %v7525_v7  ;;  %v7599_v53 = vld [vmem:[#allocation28_spill] sm:$0xff] }
 0x3ec   :  { %1823 = vmatpush1.bf16.msra.mxu0 %v7553_v56  ;;  %4101 = vmatpush3.bf16.msra.mxu1 %v7554_v57  ;;  %v7600_v56 = vld [vmem:[#allocation29_spill] sm:$0xff]  ;;  %v7601_v57 = vld [vmem:[#allocation30_spill] sm:$0xff] }
 0x3ed   :  { %1824 = vmatprep.subr.bf16.mxu0 %v7555_v60  ;;  %4102 = vmatprep.subr.bf16.mxu1 %v7525_v7  ;;  %v6130_v60 = vld [vmem:[%s7311_s5 + $0x48] ss:$12 sps:$4 sm:$0xff]  }
 0x3f0   :  { %1825 = vmatpush1.bf16.msra.mxu0 %v5590_v11  ;;  %4103 = vmatpush3.bf16.msra.mxu1 %v5595_v10  ;;  %v7591_v11 = vld [vmem:[#allocation20_spill] sm:$0xff]  ;;  %v7592_v10 = vld [vmem:[#allocation21_spill] sm:$0xff] }
 0x3f1   :  { %1826 = vmatprep.subr.bf16.mxu0 %v5602_v23  ;;  %4104 = vmatprep.subr.bf16.mxu1 %v7525_v7  ;;  %v7593_v23 = vld [vmem:[#allocation22_spill] sm:$0xff]  ;;  %7614 = vst [vmem:[#allocation20_spill] sm:$0xff] %v6218_v3 }
 0x3f4   :  { %1827 = vmatpush1.bf16.msra.mxu0 %v5609_v17  ;;  %4105 = vmatpush3.bf16.msra.mxu1 %v5614_v22  ;;  %v7590_v22 = vld [vmem:[#allocation19_spill] sm:$0xff] }
 0x3f5   :  { %1920 = vmatprep.subr.bf16.mxu0 %v5777_v62  ;;  %4110 = vmatprep.subr.bf16.mxu1 %v7525_v7  ;;  %v7594_v17 = vld [vmem:[#allocation23_spill] sm:$0xff]  ;;  %7613 = vst [vmem:[#allocation19_spill] sm:$0xff] %v6212_v40 }
 0x3f7   :  { %1845 = vmatmul.mubr.bf16.vlgmr.msra.gmra.mrb[36].mxu0 %v1811_v31  ;;  %4107 = vmatmul.mubr.bf16.vlgmr.msra.gmra.mrb[40].mxu1 %v1811_v31 }
 0x3f8   :  { %1921 = vmatpush1.bf16.msra.mxu0 %v5784_v55  ;;  %4111 = vmatpush3.bf16.msra.mxu1 %v5790_v46 }
 0x3f9   :  { %1922 = vmatprep.subr.bf16.mxu0 %v5796_v1  ;;  %4112 = vmatprep.subr.bf16.mxu1 %v7525_v7 }
 0x3fa   :  { %1952 = vmatprep.mubr.bf16.mxu0 %v7526_v15  ;;  %4126 = vmatprep.mubr.msk.bf16.mxu1 %vm4943_vm0, %v7525_v7 }
 0x3fc   :  { %1923 = vmatpush1.bf16.msra.mxu0 %v5806_v47  ;;  %4113 = vmatpush3.bf16.msra.mxu1 %v5812_v18 }
 0x3fd   :  { %1924 = vmatprep.subr.bf16.mxu0 %v5818_v28  ;;  %4114 = vmatprep.subr.bf16.mxu1 %v7525_v7 }
 0x400   :  { %1925 = vmatpush1.bf16.msra.mxu0 %v5825_v41  ;;  %4115 = vmatpush3.bf16.msra.mxu1 %v5831_v20 }
 0x401   :  { %1926 = vmatprep.subr.bf16.mxu0 %v5837_v42  ;;  %4116 = vmatprep.subr.bf16.mxu1 %v7525_v7 }
 0x404   :  { %1927 = vmatpush1.bf16.msra.mxu0 %v7579_v9  ;;  %4117 = vmatpush3.bf16.msra.mxu1 %v7580_v37 }
 0x405   :  { %1928 = vmatprep.subr.bf16.mxu0 %v7581_v13  ;;  %4118 = vmatprep.subr.bf16.mxu1 %v7525_v7 }
 0x408   :  { %1929 = vmatpush1.bf16.msra.mxu0 %v7582_v25  ;;  %4119 = vmatpush3.bf16.msra.mxu1 %v7583_v35 }
 0x409   :  { %1930 = vmatprep.subr.bf16.mxu0 %v7584_v5  ;;  %4120 = vmatprep.subr.bf16.mxu1 %v7525_v7 }
 0x40c   :  { %1931 = vmatpush1.bf16.msra.mxu0 %v7585_v43  ;;  %4121 = vmatpush3.bf16.msra.mxu1 %v7586_v4 }
 0x40d   :  { %1932 = vmatprep.subr.bf16.mxu0 %v7587_v19  ;;  %4122 = vmatprep.subr.bf16.mxu1 %v7525_v7 }
 0x410   :  { %1933 = vmatpush1.bf16.msra.mxu0 %v7588_v21  ;;  %4123 = vmatpush3.bf16.msra.mxu1 %v7589_v12 }
 0x411   :  { %1934 = vmatprep.subr.bf16.mxu0 %v7590_v22  ;;  %4124 = vmatprep.subr.bf16.mxu1 %v7525_v7 }
 0x414   :  { %1935 = vmatpush1.bf16.msra.mxu0 %v7591_v11  ;;  %4125 = vmatpush3.bf16.msra.mxu1 %v7592_v10 }
 0x415   :  { %2023 = vmatprep.subr.bf16.mxu0 %v7593_v23  ;;  %4130 = vmatprep.subr.bf16.mxu1 %v7525_v7 }
 0x417   :  { %1953 = vmatmul.mubr.bf16.vlgmr.msra.gmra.mrb[40].mxu0 %v6034_v26  ;;  %4127 = vmatmul.mubr.bf16.vlgmr.msra.gmra.mrb[44].mxu1 %v6034_v26 }
 0x418   :  { %2024 = vmatpush1.bf16.msra.mxu0 %v5941_v45  ;;  %4131 = vmatpush3.bf16.msra.mxu1 %v7594_v17 }
 0x419   :  { %2025 = vmatprep.subr.bf16.mxu0 %v7595_v61  ;;  %4132 = vmatprep.subr.bf16.mxu1 %v7525_v7 }
 0x41a   :  { %2055 = vmatprep.mubr.bf16.mxu0 %v7526_v15  ;;  %4146 = vmatprep.mubr.msk.bf16.mxu1 %vm4943_vm0, %v7525_v7 }
 0x41c   :  { %2026 = vmatpush1.bf16.msra.mxu0 %v7596_v50  ;;  %4133 = vmatpush3.bf16.msra.mxu1 %v7597_v8 }
 0x41d   :  { %2027 = vmatprep.subr.bf16.mxu0 %v7598_v59  ;;  %4134 = vmatprep.subr.bf16.mxu1 %v7525_v7 }
 0x420   :  { %2028 = vmatpush1.bf16.msra.mxu0 %v7599_v53  ;;  %4135 = vmatpush3.bf16.msra.mxu1 %v7600_v56 }
 0x421   :  { %2029 = vmatprep.subr.bf16.mxu0 %v7601_v57  ;;  %4136 = vmatprep.subr.bf16.mxu1 %v7525_v7 }
 0x424   :  { %2030 = vmatpush1.bf16.msra.mxu0 %v6130_v60  ;;  %4137 = vmatpush3.bf16.msra.mxu1 %v6136_v38 }
 0x425   :  { %2031 = vmatprep.subr.bf16.mxu0 %v6142_v32  ;;  %4138 = vmatprep.subr.bf16.mxu1 %v7525_v7 }
 0x428   :  { %2032 = vmatpush1.bf16.msra.mxu0 %v6149_v33  ;;  %4139 = vmatpush3.bf16.msra.mxu1 %v6155_v34  ;;  %v7616_v33 = vld [vmem:[#allocation6_spill] sm:$0xff] }
 0x429   :  { %2033 = vmatprep.subr.bf16.mxu0 %v6161_v63  ;;  %4140 = vmatprep.subr.bf16.mxu1 %v7525_v7 }
 0x42c   :  { %2034 = vmatpush1.bf16.msra.mxu0 %v6168_v39  ;;  %4141 = vmatpush3.bf16.msra.mxu1 %v6174_v2  ;;  %v7615_v39 = vld [vmem:[#allocation5_spill] sm:$0xff] }
 0x42d   :  { %2035 = vmatprep.subr.bf16.mxu0 %v6180_v30  ;;  %4142 = vmatprep.subr.bf16.mxu1 %v7525_v7 }
 0x430   :  { %2036 = vmatpush1.bf16.msra.mxu0 %v6187_v44  ;;  %4143 = vmatpush3.bf16.msra.mxu1 %v6193_v54 }
 0x431   :  { %2037 = vmatprep.subr.bf16.mxu0 %v6199_v29  ;;  %4144 = vmatprep.subr.bf16.mxu1 %v7525_v7 }
 0x434   :  { %2038 = vmatpush1.bf16.msra.mxu0 %v6206_v36  ;;  %4145 = vmatpush3.bf16.msra.mxu1 %v6212_v40 }
 0x435   :  { %2105 = vmatprep.subr.bf16.mxu0 %v6218_v3  ;;  %4150 = vmatprep.subr.bf16.mxu1 %v7525_v7 }
 0x4aa   :  { %v1805_v27 = vpop.f32.mrb[36].mxu1 }
 0x4ab   :  { %v4088_v0 = vpop.f32.mrb[37].mxu1 }
 0x4ac   :  { %v1808_v58 = vpop.f32.mrb[38].mxu1 }
 0x4ad   :  { %v4089_v51 = vpop.f32.mrb[39].mxu1 }
 0x4ca   :  { %v1846_v48 = vpop.f32.mrb[36].mxu0  ;;  %v1887_v26 = vpop.f32.mrb[40].mxu1 }
 0x4cb   :  { %v4439_v31 = vadd.f32 %v5706_v52, %v1846_v48  ;;  %v1848_v36 = vpop.f32.mrb[37].mxu0  ;;  %v4108_v29 = vpop.f32.mrb[41].mxu1  ;;  %v1888_v32 = vadd.f32 %v1887_v26, %v7616_v33  ;;  %v7617_v52 = vld [vmem:[#allocation7_spill] sm:$0xff] }
 0x4cc   :  { %v1850_v40 = vpop.f32.mrb[38].mxu0  ;;  %v1890_v54 = vpop.f32.mrb[42].mxu1  ;;  %v4441_v63 = vadd.f32 %v7615_v39, %v1848_v36  ;;  %v1806_v29 = vadd.f32 %v1805_v27, %v7617_v52 }
 0x4cd   :  { %v3622_v44 = vmul.f32 -1.442695, %v4439_v31  ;;  %v1851_v30 = vpop.f32.mrb[39].mxu0  ;;  %v4109_v2 = vpop.f32.mrb[43].mxu1  ;;  %v1915_v54 = vld [vmem:[#allocation3 + $0x24] sm:$0xff] }
 0x4ce   :  { %v3623_v3 = vmul.f32 -1.442695, %v4441_v63  ;;  %v1918_v27 = vunpack.c.h.bf16 %v1915_v54 }
 0x4cf   :  { %4687 = vpow2.f32 %v3622_v44  ;;  %v1917_v44 = vunpack.c.l.bf16 %v1915_v54 }
 0x4d0   :  { %4689 = vpow2.f32 %v3623_v3 }
 0x4d9   :  { %v4688_v34 = vpop.eup %4687 }
 0x4da   :  { %v1897_v0 = vadd.f32 1.0, %v4688_v34  ;;  %v4690_v58 = vpop.eup %4689 }
 0x4db   :  { %v1904_v51 = vadd.f32 1.0, %v4690_v58 }
 0x4dc   :  { %4691 = vrcp.f32 %v1897_v0 }
 0x4dd   :  { %4693 = vrcp.f32 %v1904_v51 }
 0x4e6   :  { %v4692_v48 = vpop.eup %4691 }
 0x4e7   :  { %v1907_v40 = vmul.f32 %v4692_v48, %v1888_v32  ;;  %v4694_v48 = vpop.eup %4693 }
 0x4e9   :  { %v1908_v30 = vadd.f32 %v1907_v40, %v1806_v29  ;;  %v1910_v40 = vsub.f32 1.0, %v4694_v48 }
 0x4ea   :  { %v1954_v2 = vpop.f32.mrb[40].mxu0  ;;  %v1995_v31 = vpop.f32.mrb[44].mxu1 }
 0x4eb   :  { %4695 = vtanh.f32 %v1908_v30  ;;  %v1955_v63 = vadd.f32 %v1954_v2, %v5451_v16  ;;  %v1956_v36 = vpop.f32.mrb[41].mxu0  ;;  %v4128_v34 = vpop.f32.mrb[45].mxu1  ;;  %v1912_v2 = vmul.f32 %v4694_v48, %v6025_v49  ;;  %v1996_v54 = vadd.f32 %v1995_v31, %v5461_v14  ;;  %v6247_v31 = vld [vmem:[%s7312_s6] ss:$12 sps:$4 sm:$0xff]  }
 0x4ec   :  { %v1957_v3 = vadd.f32 %v1956_v36, %v5454_v6  ;;  %v1958_v0 = vpop.f32.mrb[42].mxu0  ;;  %v1998_v58 = vpop.f32.mrb[46].mxu1 }
 0x4ed   :  { %v2001_v26 = vadd.f32 %v1955_v63, %v1917_v44  ;;  %v1959_v33 = vpop.f32.mrb[43].mxu0  ;;  %v4129_v39 = vpop.f32.mrb[47].mxu1 }
 0x4ee   :  { %v2008_v51 = vadd.f32 %v1957_v3, %v1918_v27  ;;  %v6231_v39 = vld [vmem:[#allocation3 + $0x2c] ss:$12 sps:$4 sm:$0xff]  }
 0x4ef   :  { %v3624_v32 = vmul.f32 -1.442695, %v2001_v26  ;;  %v1919_v3 = vunpack.c.l.bf16 %v6231_v39 }
 0x4f0   :  { %v3625_v29 = vmul.f32 -1.442695, %v2008_v51 }
 0x4f1   :  { %4697 = vpow2.f32 %v3624_v32 }
 0x4f2   :  { %4699 = vpow2.f32 %v3625_v29 }
 0x4f5   :  { %v4696_v30 = vpop.eup %4695 }
 0x4f6   :  { %v1911_v52 = vmul.f32 %v4696_v30, %v1910_v40  ;;  %v6259_v40 = vld [vmem:[%s7312_s6 + $0x1c] ss:$12 sps:$4 sm:$0xff]   ;;  %v6269_v30 = vld [vmem:[%s7312_s6 + $0x18] ss:$12 sps:$4 sm:$0xff]  }
 0x4f8   :  { %v6229_v34 = vadd.f32 %v1912_v2, %v1911_v52  ;;  %v6275_v2 = vld [vmem:[%s7312_s6 + $0x20] ss:$12 sps:$4 sm:$0xff]  }
 0x4fb   :  { %v4698_v36 = vpop.eup %4697 }
 0x4fc   :  { %v2005_v0 = vadd.f32 1.0, %v4698_v36  ;;  %v4700_v44 = vpop.eup %4699  ;;  %v6281_v36 = vld [vmem:[%s7312_s6 + $0x34] ss:$12 sps:$4 sm:$0xff]  }
 0x4fd   :  { %v2012_v33 = vadd.f32 1.0, %v4700_v44  ;;  %v6294_v44 = vld [vmem:[%s7312_s6 + $0x38] ss:$12 sps:$4 sm:$0xff]  }
 0x4fe   :  { %4701 = vrcp.f32 %v2005_v0  ;;  %v6288_v0 = vld [vmem:[%s7312_s6 + $0x30] ss:$12 sps:$4 sm:$0xff]  }
 0x4ff   :  { %4703 = vrcp.f32 %v2012_v33  ;;  %v6300_v33 = vld [vmem:[%s7312_s6 + $0x4c] ss:$12 sps:$4 sm:$0xff]  }
 0x508   :  { %v4702_v63 = vpop.eup %4701 }
 0x509   :  { %v2015_v58 = vmul.f32 %v4702_v63, %v1996_v54  ;;  %v4704_v49 = vpop.eup %4703  ;;  %v6307_v54 = vld [vmem:[%s7312_s6 + $0x48] ss:$12 sps:$4 sm:$0xff]   ;;  %v6313_v63 = vld [vmem:[%s7312_s6 + $0x50] ss:$12 sps:$4 sm:$0xff]  }
 0x50a   :  { %v2018_v27 = vsub.f32 1.0, %v4704_v49  ;;  %v2020_v51 = vmul.f32 %v4704_v49, %v6030_v24  ;;  %v6253_v24 = vld [vmem:[%s7312_s6 + $0x8] ss:$12 sps:$4 sm:$0xff]  }
 0x50b   :  { %v2016_v26 = vadd.f32 %v2015_v58, %v1919_v3  ;;  %v6319_v3 = vld [vmem:[%s7312_s6 + $0x64] ss:$12 sps:$4 sm:$0xff]   ;;  %v6326_v58 = vld [vmem:[%s7312_s6 + $0x60] ss:$12 sps:$4 sm:$0xff]   ;;  %v6338_v49 = vld [vmem:[%s7312_s6 + $0x7c] ss:$12 sps:$4 sm:$0xff]  }
 0x50d   :  { %4705 = vtanh.f32 %v2016_v26  ;;  %v6332_v26 = vld [vmem:[%s7312_s6 + $0x68] ss:$12 sps:$4 sm:$0xff]  }
 0x517   :  { %v4706_v52 = vpop.eup %4705 }
 0x518   :  { %v2019_v32 = vmul.f32 %v4706_v52, %v2018_v27  ;;  %v6345_v27 = vld [vmem:[%s7312_s6 + $0x78] ss:$12 sps:$4 sm:$0xff]   ;;  %v6351_v52 = vld [vmem:[%s7312_s6 + $0x80] ss:$12 sps:$4 sm:$0xff]  }
 0x519   :  { %7618 = vst [vmem:[#allocation21_spill] sm:$0xff] %v6345_v27  ;;  %7619 = vst [vmem:[#allocation22_spill] sm:$0xff] %v6351_v52 }
 0x51a   :  { %v6236_v48 = vadd.f32 %v2020_v51, %v2019_v32  ;;  %v6357_v32 = vld [vmem:[%s7312_s6 + $0x94] ss:$12 sps:$4 sm:$0xff]   ;;  %v6364_v51 = vld [vmem:[%s7312_s6 + $0x90] ss:$12 sps:$4 sm:$0xff]  }
 0x51b   :  { %7620 = vst [vmem:[#allocation23_spill] sm:$0xff] %v6357_v32  ;;  %7621 = vst [vmem:[#allocation24_spill] sm:$0xff] %v6364_v51 }
 0x51c   :  { %v6240_v29 = vpack.c.bf16 %v6236_v48, %v6236_v48 }
 0x51e   :  { %2056 = vmatmul.mubr.bf16.vlgmr.msra.gmra.mrb[44].mxu0 %v6240_v29  ;;  %4147 = vmatmul.mubr.bf16.vlgmr.msra.gmra.mrb[48].mxu1 %v6240_v29 }
 0x51f   :  { %2106 = vmatpush1.bf16.msra.mxu0 %v6247_v31  ;;  %4151 = vmatpush3.bf16.msra.mxu1 %v6253_v24 }
 0x520   :  { %2107 = vmatprep.subr.bf16.mxu0 %v6259_v40  ;;  %4152 = vmatprep.subr.bf16.mxu1 %v7525_v7 }
 0x521   :  { %2137 = vmatprep.mubr.bf16.mxu0 %v7526_v15  ;;  %4166 = vmatprep.mubr.msk.bf16.mxu1 %vm4943_vm0, %v7525_v7 }
 0x523   :  { %2108 = vmatpush1.bf16.msra.mxu0 %v6269_v30  ;;  %4153 = vmatpush3.bf16.msra.mxu1 %v6275_v2 }
 0x524   :  { %2109 = vmatprep.subr.bf16.mxu0 %v6281_v36  ;;  %4154 = vmatprep.subr.bf16.mxu1 %v7525_v7 }
 0x527   :  { %2110 = vmatpush1.bf16.msra.mxu0 %v6288_v0  ;;  %4155 = vmatpush3.bf16.msra.mxu1 %v6294_v44 }
 0x528   :  { %2111 = vmatprep.subr.bf16.mxu0 %v6300_v33  ;;  %4156 = vmatprep.subr.bf16.mxu1 %v7525_v7 }
 0x52b   :  { %2112 = vmatpush1.bf16.msra.mxu0 %v6307_v54  ;;  %4157 = vmatpush3.bf16.msra.mxu1 %v6313_v63 }
 0x52c   :  { %2113 = vmatprep.subr.bf16.mxu0 %v6319_v3  ;;  %4158 = vmatprep.subr.bf16.mxu1 %v7525_v7 }
 0x52f   :  { %2114 = vmatpush1.bf16.msra.mxu0 %v6326_v58  ;;  %4159 = vmatpush3.bf16.msra.mxu1 %v6332_v26 }
 0x530   :  { %2115 = vmatprep.subr.bf16.mxu0 %v6338_v49  ;;  %4160 = vmatprep.subr.bf16.mxu1 %v7525_v7 }
 0x533   :  { %2116 = vmatpush1.bf16.msra.mxu0 %v6345_v27  ;;  %4161 = vmatpush3.bf16.msra.mxu1 %v6351_v52  ;;  %v6370_v52 = vld [vmem:[%s7312_s6 + $0x98] ss:$12 sps:$4 sm:$0xff]   ;;  %v2104_v27 = vpack.c.bf16 %v6229_v34, %v6229_v34 }
 0x534   :  { %2117 = vmatprep.subr.bf16.mxu0 %v6357_v32  ;;  %4162 = vmatprep.subr.bf16.mxu1 %v7525_v7  ;;  %7622 = vst [vmem:[#allocation25_spill] sm:$0xff] %v6370_v52  ;;  %v6376_v32 = vld [vmem:[%s7312_s6 + $0xac] ss:$12 sps:$4 sm:$0xff]  }
 0x537   :  { %2118 = vmatpush1.bf16.msra.mxu0 %v6364_v51  ;;  %4163 = vmatpush3.bf16.msra.mxu1 %v6370_v52  ;;  %v6383_v51 = vld [vmem:[%s7312_s6 + $0xa8] ss:$12 sps:$4 sm:$0xff]   ;;  %v6389_v52 = vld [vmem:[%s7312_s6 + $0xb0] ss:$12 sps:$4 sm:$0xff]  }
 0x538   :  { %2119 = vmatprep.subr.bf16.mxu0 %v6376_v32  ;;  %4164 = vmatprep.subr.bf16.mxu1 %v7525_v7 }
 0x53b   :  { %2120 = vmatpush1.bf16.msra.mxu0 %v6383_v51  ;;  %4165 = vmatpush3.bf16.msra.mxu1 %v6389_v52 }
 0x53c   :  { %2213 = vmatprep.subr.bf16.mxu0 %v5777_v62  ;;  %4170 = vmatprep.subr.bf16.mxu1 %v7525_v7  ;;  %v7623_v62 = vld [vmem:[#allocation8_spill] sm:$0xff] }
 0x53e   :  { %2138 = vmatmul.mubr.bf16.vlgmr.msra.gmra.mrb[44].mxu0 %v2104_v27  ;;  %4167 = vmatmul.mubr.bf16.vlgmr.msra.gmra.mrb[52].mxu1 %v2104_v27  ;;  %v7638_v27 = vld [vmem:[#allocation6_spill] sm:$0xff] }
 0x53f   :  { %2214 = vmatpush1.bf16.msra.mxu0 %v5784_v55  ;;  %4171 = vmatpush3.bf16.msra.mxu1 %v5790_v46  ;;  %v7624_v55 = vld [vmem:[#allocation9_spill] sm:$0xff]  ;;  %v7625_v46 = vld [vmem:[#allocation10_spill] sm:$0xff] }
 0x540   :  { %2215 = vmatprep.subr.bf16.mxu0 %v5796_v1  ;;  %4172 = vmatprep.subr.bf16.mxu1 %v7525_v7  ;;  %v7626_v1 = vld [vmem:[#allocation11_spill] sm:$0xff] }
 0x541   :  { %2245 = vmatprep.mubr.bf16.mxu0 %v7526_v15  ;;  %4186 = vmatprep.mubr.msk.bf16.mxu1 %vm4943_vm0, %v7525_v7 }
 0x543   :  { %2216 = vmatpush1.bf16.msra.mxu0 %v5806_v47  ;;  %4173 = vmatpush3.bf16.msra.mxu1 %v5812_v18  ;;  %v7627_v47 = vld [vmem:[#allocation12_spill] sm:$0xff]  ;;  %v7628_v18 = vld [vmem:[#allocation13_spill] sm:$0xff] }
 0x544   :  { %2217 = vmatprep.subr.bf16.mxu0 %v5818_v28  ;;  %4174 = vmatprep.subr.bf16.mxu1 %v7525_v7  ;;  %v7629_v28 = vld [vmem:[#allocation14_spill] sm:$0xff] }
 0x547   :  { %2218 = vmatpush1.bf16.msra.mxu0 %v5825_v41  ;;  %4175 = vmatpush3.bf16.msra.mxu1 %v5831_v20  ;;  %v7630_v41 = vld [vmem:[#allocation15_spill] sm:$0xff]  ;;  %v7631_v20 = vld [vmem:[#allocation16_spill] sm:$0xff] }
 0x548   :  { %2219 = vmatprep.subr.bf16.mxu0 %v5837_v42  ;;  %4176 = vmatprep.subr.bf16.mxu1 %v7525_v7  ;;  %v7632_v42 = vld [vmem:[#allocation17_spill] sm:$0xff] }
 0x54b   :  { %2220 = vmatpush1.bf16.msra.mxu0 %v7579_v9  ;;  %4177 = vmatpush3.bf16.msra.mxu1 %v7580_v37  ;;  %v7634_v9 = vld [vmem:[#allocation19_spill] sm:$0xff]  ;;  %v7635_v37 = vld [vmem:[#allocation20_spill] sm:$0xff] }
 0x54c   :  { %2221 = vmatprep.subr.bf16.mxu0 %v7581_v13  ;;  %4178 = vmatprep.subr.bf16.mxu1 %v7525_v7 }
 0x54f   :  { %2222 = vmatpush1.bf16.msra.mxu0 %v7582_v25  ;;  %4179 = vmatpush3.bf16.msra.mxu1 %v7583_v35 }
 0x550   :  { %2223 = vmatprep.subr.bf16.mxu0 %v7584_v5  ;;  %4180 = vmatprep.subr.bf16.mxu1 %v7525_v7 }
 0x553   :  { %2224 = vmatpush1.bf16.msra.mxu0 %v7585_v43  ;;  %4181 = vmatpush3.bf16.msra.mxu1 %v7586_v4 }
 0x554   :  { %2225 = vmatprep.subr.bf16.mxu0 %v7587_v19  ;;  %4182 = vmatprep.subr.bf16.mxu1 %v7525_v7  ;;  %v7636_v19 = vld [vmem:[#allocation4_spill] sm:$0xff] }
 0x557   :  { %2226 = vmatpush1.bf16.msra.mxu0 %v7588_v21  ;;  %4183 = vmatpush3.bf16.msra.mxu1 %v7589_v12 }
 0x558   :  { %2227 = vmatprep.subr.bf16.mxu0 %v7590_v22  ;;  %4184 = vmatprep.subr.bf16.mxu1 %v7525_v7 }
 0x55b   :  { %2228 = vmatpush1.bf16.msra.mxu0 %v7591_v11  ;;  %4185 = vmatpush3.bf16.msra.mxu1 %v7592_v10 }
 0x55c   :  { %2316 = vmatprep.subr.bf16.mxu0 %v7593_v23  ;;  %4190 = vmatprep.subr.bf16.mxu1 %v7525_v7 }
 0x55e   :  { %2246 = vmatmul.mubr.bf16.vlgmr.msra.gmra.mrb[48].mxu0 %v6240_v29  ;;  %4187 = vmatmul.mubr.bf16.vlgmr.msra.gmra.mrb[56].mxu1 %v6240_v29 }
 0x55f   :  { %2317 = vmatpush1.bf16.msra.mxu0 %v5941_v45  ;;  %4191 = vmatpush3.bf16.msra.mxu1 %v7594_v17  ;;  %v7633_v45 = vld [vmem:[#allocation18_spill] sm:$0xff] }
 0x560   :  { %2318 = vmatprep.subr.bf16.mxu0 %v7595_v61  ;;  %4192 = vmatprep.subr.bf16.mxu1 %v7525_v7 }
 0x561   :  { %2348 = vmatprep.mubr.bf16.mxu0 %v7526_v15  ;;  %4206 = vmatprep.mubr.msk.bf16.mxu1 %vm4943_vm0, %v7525_v7 }
 0x563   :  { %2319 = vmatpush1.bf16.msra.mxu0 %v7596_v50  ;;  %4193 = vmatpush3.bf16.msra.mxu1 %v7597_v8  ;;  %v7637_v50 = vld [vmem:[#allocation5_spill] sm:$0xff] }
 0x564   :  { %2320 = vmatprep.subr.bf16.mxu0 %v7598_v59  ;;  %4194 = vmatprep.subr.bf16.mxu1 %v7525_v7 }
 0x567   :  { %2321 = vmatpush1.bf16.msra.mxu0 %v7599_v53  ;;  %4195 = vmatpush3.bf16.msra.mxu1 %v7600_v56 }
 0x568   :  { %2322 = vmatprep.subr.bf16.mxu0 %v7601_v57  ;;  %4196 = vmatprep.subr.bf16.mxu1 %v7525_v7 }
 0x56b   :  { %2323 = vmatpush1.bf16.msra.mxu0 %v6130_v60  ;;  %4197 = vmatpush3.bf16.msra.mxu1 %v6136_v38 }
 0x56c   :  { %2324 = vmatprep.subr.bf16.mxu0 %v7623_v62  ;;  %4198 = vmatprep.subr.bf16.mxu1 %v7525_v7 }
 0x56f   :  { %2325 = vmatpush1.bf16.msra.mxu0 %v7624_v55  ;;  %4199 = vmatpush3.bf16.msra.mxu1 %v7625_v46 }
 0x570   :  { %2326 = vmatprep.subr.bf16.mxu0 %v7626_v1  ;;  %4200 = vmatprep.subr.bf16.mxu1 %v7525_v7 }
 0x573   :  { %2327 = vmatpush1.bf16.msra.mxu0 %v7627_v47  ;;  %4201 = vmatpush3.bf16.msra.mxu1 %v7628_v18 }
 0x574   :  { %2328 = vmatprep.subr.bf16.mxu0 %v7629_v28  ;;  %4202 = vmatprep.subr.bf16.mxu1 %v7525_v7 }
 0x577   :  { %2329 = vmatpush1.bf16.msra.mxu0 %v7630_v41  ;;  %4203 = vmatpush3.bf16.msra.mxu1 %v7631_v20 }
 0x578   :  { %2330 = vmatprep.subr.bf16.mxu0 %v7632_v42  ;;  %4204 = vmatprep.subr.bf16.mxu1 %v7525_v7 }
 0x57b   :  { %2331 = vmatpush1.bf16.msra.mxu0 %v7633_v45  ;;  %4205 = vmatpush3.bf16.msra.mxu1 %v7634_v9 }
 0x57c   :  { %2398 = vmatprep.subr.bf16.mxu0 %v7635_v37  ;;  %4210 = vmatprep.subr.bf16.mxu1 %v7525_v7 }
 0x5f1   :  { %v2098_v13 = vpop.f32.mrb[48].mxu1 }
 0x5f2   :  { %v4148_v25 = vpop.f32.mrb[49].mxu1 }
 0x5f3   :  { %v2101_v35 = vpop.f32.mrb[50].mxu1 }
 0x5f4   :  { %v4149_v5 = vpop.f32.mrb[51].mxu1 }
 0x5f5   :  { %v7639_v5 = vld [vmem:[#allocation7_spill] sm:$0xff] }
 0x611   :  { %v2139_v43 = vpop.f32.mrb[44].mxu0  ;;  %v2180_v4 = vpop.f32.mrb[52].mxu1 }
 0x612   :  { %v4443_v21 = vadd.f32 %v7636_v19, %v2139_v43  ;;  %v2141_v12 = vpop.f32.mrb[45].mxu0  ;;  %v4168_v22 = vpop.f32.mrb[53].mxu1  ;;  %v2181_v25 = vadd.f32 %v2180_v4, %v7638_v27  ;;  %v2099_v43 = vadd.f32 %v2098_v13, %v7639_v5 }
 0x613   :  { %v2143_v11 = vpop.f32.mrb[46].mxu0  ;;  %v2183_v10 = vpop.f32.mrb[54].mxu1  ;;  %v4445_v8 = vadd.f32 %v7637_v50, %v2141_v12 }
 0x614   :  { %v3626_v23 = vmul.f32 -1.442695, %v4443_v21  ;;  %v2144_v17 = vpop.f32.mrb[47].mxu0  ;;  %v4169_v61 = vpop.f32.mrb[55].mxu1  ;;  %v2208_v21 = vld [vmem:[#allocation3 + $0x30] sm:$0xff] }
 0x615   :  { %v3627_v59 = vmul.f32 -1.442695, %v4445_v8  ;;  %v2210_v12 = vunpack.c.l.bf16 %v2208_v21  ;;  %v2211_v13 = vunpack.c.h.bf16 %v2208_v21 }
 0x616   :  { %4707 = vpow2.f32 %v3626_v23 }
 0x617   :  { %4709 = vpow2.f32 %v3627_v59 }
 0x620   :  { %v4708_v53 = vpop.eup %4707 }
 0x621   :  { %v2190_v56 = vadd.f32 1.0, %v4708_v53  ;;  %v4710_v57 = vpop.eup %4709 }
 0x622   :  { %v2197_v29 = vadd.f32 1.0, %v4710_v57 }
 0x623   :  { %4711 = vrcp.f32 %v2190_v56 }
 0x624   :  { %4713 = vrcp.f32 %v2197_v29 }
 0x62d   :  { %v4712_v35 = vpop.eup %4711 }
 0x62e   :  { %v2200_v22 = vmul.f32 %v4712_v35, %v2181_v25  ;;  %v4714_v35 = vpop.eup %4713 }
 0x630   :  { %v2201_v11 = vadd.f32 %v2200_v22, %v2099_v43  ;;  %v2203_v22 = vsub.f32 1.0, %v4714_v35 }
 0x631   :  { %v2247_v10 = vpop.f32.mrb[48].mxu0  ;;  %v2288_v17 = vpop.f32.mrb[56].mxu1 }
 0x632   :  { %4715 = vtanh.f32 %v2201_v11  ;;  %v2248_v23 = vadd.f32 %v2247_v10, %v5451_v16  ;;  %v2249_v61 = vpop.f32.mrb[49].mxu0  ;;  %v4188_v8 = vpop.f32.mrb[57].mxu1  ;;  %v2205_v10 = vmul.f32 %v4714_v35, %v6229_v34 }
 0x633   :  { %v2250_v59 = vadd.f32 %v2249_v61, %v5454_v6  ;;  %v2251_v53 = vpop.f32.mrb[50].mxu0  ;;  %v2291_v56 = vpop.f32.mrb[58].mxu1 }
 0x634   :  { %v2294_v4 = vadd.f32 %v2248_v23, %v2210_v12  ;;  %v2252_v57 = vpop.f32.mrb[51].mxu0  ;;  %v4189_v27 = vpop.f32.mrb[59].mxu1 }
 0x635   :  { %v2301_v29 = vadd.f32 %v2250_v59, %v2211_v13  ;;  %v2289_v27 = vadd.f32 %v2288_v17, %v5461_v14  ;;  %v2212_v59 = vunpack.c.h.bf16 %v6231_v39  ;;  %v7640_v39 = vld [vmem:[#allocation21_spill] sm:$0xff]  ;;  %v7642_v17 = vld [vmem:[#allocation23_spill] sm:$0xff] }
 0x636   :  { %v3628_v25 = vmul.f32 -1.442695, %v2294_v4 }
 0x637   :  { %v3629_v43 = vmul.f32 -1.442695, %v2301_v29 }
 0x638   :  { %4717 = vpow2.f32 %v3628_v25 }
 0x639   :  { %4719 = vpow2.f32 %v3629_v43  ;;  %v7643_v43 = vld [vmem:[#allocation24_spill] sm:$0xff] }
 0x63c   :  { %v4716_v11 = vpop.eup %4715 }
 0x63d   :  { %v2204_v5 = vmul.f32 %v4716_v11, %v2203_v22  ;;  %v7644_v22 = vld [vmem:[#allocation25_spill] sm:$0xff] }
 0x63f   :  { %v6475_v8 = vadd.f32 %v2205_v10, %v2204_v5  ;;  %v6526_v10 = vld [vmem:[%s7310_s2 + $0x4] ss:$12 sps:$4 sm:$0xff]  }
 0x641   :  { %v2397_v11 = vpack.c.bf16 %v6475_v8, %v6475_v8 }
 0x642   :  { %v4718_v61 = vpop.eup %4717 }
 0x643   :  { %v2298_v53 = vadd.f32 1.0, %v4718_v61  ;;  %v4720_v12 = vpop.eup %4719  ;;  %v6533_v61 = vld [vmem:[%s7310_s2] ss:$12 sps:$4 sm:$0xff]  }
 0x644   :  { %v2305_v23 = vadd.f32 1.0, %v4720_v12  ;;  %v6545_v12 = vld [vmem:[%s7310_s2 + $0x1c] ss:$12 sps:$4 sm:$0xff]  }
 0x645   :  { %4721 = vrcp.f32 %v2298_v53  ;;  %v6539_v53 = vld [vmem:[%s7310_s2 + $0x8] ss:$12 sps:$4 sm:$0xff]  }
 0x646   :  { %4723 = vrcp.f32 %v2305_v23  ;;  %v6555_v23 = vld [vmem:[%s7310_s2 + $0x18] ss:$12 sps:$4 sm:$0xff]  }
 0x64f   :  { %v4722_v21 = vpop.eup %4721 }
 0x650   :  { %v2308_v56 = vmul.f32 %v4722_v21, %v2289_v27  ;;  %v4724_v57 = vpop.eup %4723  ;;  %v6561_v27 = vld [vmem:[%s7310_s2 + $0x20] ss:$12 sps:$4 sm:$0xff]  }
 0x651   :  { %v2311_v13 = vsub.f32 1.0, %v4724_v57  ;;  %v2313_v5 = vmul.f32 %v4724_v57, %v6236_v48  ;;  %v7641_v48 = vld [vmem:[#allocation22_spill] sm:$0xff] }
 0x652   :  { %v2309_v4 = vadd.f32 %v2308_v56, %v2212_v59  ;;  %v6567_v21 = vld [vmem:[%s7310_s2 + $0x34] ss:$12 sps:$4 sm:$0xff]   ;;  %v6574_v59 = vld [vmem:[%s7310_s2 + $0x30] ss:$12 sps:$4 sm:$0xff]   ;;  %v6580_v56 = vld [vmem:[%s7310_s2 + $0x38] ss:$12 sps:$4 sm:$0xff]  }
 0x653   :  { %v6593_v57 = vld [vmem:[%s7310_s2 + $0x48] ss:$12 sps:$4 sm:$0xff]  }
 0x654   :  { %4725 = vtanh.f32 %v2309_v4  ;;  %v6586_v4 = vld [vmem:[%s7310_s2 + $0x4c] ss:$12 sps:$4 sm:$0xff]  }
 0x65e   :  { %v4726_v34 = vpop.eup %4725 }
 0x65f   :  { %v2312_v25 = vmul.f32 %v4726_v34, %v2311_v13  ;;  %v6599_v13 = vld [vmem:[%s7310_s2 + $0x50] ss:$12 sps:$4 sm:$0xff]  }
 0x660   :  { %v6605_v34 = vld [vmem:[%s7310_s2 + $0x64] ss:$12 sps:$4 sm:$0xff]  }
 0x661   :  { %v6480_v29 = vadd.f32 %v2313_v5, %v2312_v25  ;;  %v6612_v25 = vld [vmem:[%s7310_s2 + $0x60] ss:$12 sps:$4 sm:$0xff]   ;;  %v6618_v5 = vld [vmem:[%s7310_s2 + $0x68] ss:$12 sps:$4 sm:$0xff]  }
 0x662   :  { %7645 = vst [vmem:[#allocation26_spill] sm:$0xff] %v6612_v25  ;;  %7646 = vst [vmem:[#allocation27_spill] sm:$0xff] %v6618_v5 }
 0x663   :  { %v6484_v35 = vpack.c.bf16 %v6480_v29, %v6480_v29 }
 0x665   :  { %2349 = vmatmul.mubr.bf16.vlgmr.msra.gmra.mrb[52].mxu0 %v6484_v35  ;;  %4207 = vmatmul.mubr.bf16.vlgmr.msra.gmra.mrb[60].mxu1 %v6484_v35 }
 0x666   :  { %2399 = vmatpush1.bf16.msra.mxu0 %v6247_v31  ;;  %4211 = vmatpush3.bf16.msra.mxu1 %v6253_v24 }
 0x667   :  { %2400 = vmatprep.subr.bf16.mxu0 %v6259_v40  ;;  %4212 = vmatprep.subr.bf16.mxu1 %v7525_v7 }
 0x668   :  { %2430 = vmatprep.mubr.bf16.mxu0 %v7526_v15  ;;  %4226 = vmatprep.mubr.msk.bf16.mxu1 %vm4943_vm0, %v7525_v7 }
 0x66a   :  { %2401 = vmatpush1.bf16.msra.mxu0 %v6269_v30  ;;  %4213 = vmatpush3.bf16.msra.mxu1 %v6275_v2 }
 0x66b   :  { %2402 = vmatprep.subr.bf16.mxu0 %v6281_v36  ;;  %4214 = vmatprep.subr.bf16.mxu1 %v7525_v7 }
 0x66e   :  { %2403 = vmatpush1.bf16.msra.mxu0 %v6288_v0  ;;  %4215 = vmatpush3.bf16.msra.mxu1 %v6294_v44 }
 0x66f   :  { %2404 = vmatprep.subr.bf16.mxu0 %v6300_v33  ;;  %4216 = vmatprep.subr.bf16.mxu1 %v7525_v7 }
 0x672   :  { %2405 = vmatpush1.bf16.msra.mxu0 %v6307_v54  ;;  %4217 = vmatpush3.bf16.msra.mxu1 %v6313_v63 }
 0x673   :  { %2406 = vmatprep.subr.bf16.mxu0 %v6319_v3  ;;  %4218 = vmatprep.subr.bf16.mxu1 %v7525_v7 }
 0x676   :  { %2407 = vmatpush1.bf16.msra.mxu0 %v6326_v58  ;;  %4219 = vmatpush3.bf16.msra.mxu1 %v6332_v26 }
 0x677   :  { %2408 = vmatprep.subr.bf16.mxu0 %v6338_v49  ;;  %4220 = vmatprep.subr.bf16.mxu1 %v7525_v7 }
 0x67a   :  { %2409 = vmatpush1.bf16.msra.mxu0 %v7640_v39  ;;  %4221 = vmatpush3.bf16.msra.mxu1 %v7641_v48 }
 0x67b   :  { %2410 = vmatprep.subr.bf16.mxu0 %v7642_v17  ;;  %4222 = vmatprep.subr.bf16.mxu1 %v7525_v7 }
 0x67e   :  { %2411 = vmatpush1.bf16.msra.mxu0 %v7643_v43  ;;  %4223 = vmatpush3.bf16.msra.mxu1 %v7644_v22 }
 0x67f   :  { %2412 = vmatprep.subr.bf16.mxu0 %v6376_v32  ;;  %4224 = vmatprep.subr.bf16.mxu1 %v7525_v7 }
 0x682   :  { %2413 = vmatpush1.bf16.msra.mxu0 %v6383_v51  ;;  %4225 = vmatpush3.bf16.msra.mxu1 %v6389_v52 }
 0x683   :  { %2506 = vmatprep.subr.bf16.mxu0 %v6526_v10  ;;  %4230 = vmatprep.subr.bf16.mxu1 %v7525_v7 }
 0x685   :  { %2431 = vmatmul.mubr.bf16.vlgmr.msra.gmra.mrb[52].mxu0 %v2397_v11  ;;  %4227 = vmatmul.mubr.bf16.vlgmr.msra.gmra.mrb[64].mxu1 %v2397_v11  ;;  %v6624_v11 = vld [vmem:[%s7310_s2 + $0x7c] ss:$12 sps:$4 sm:$0xff]  }
 0x686   :  { %2507 = vmatpush1.bf16.msra.mxu0 %v6533_v61  ;;  %4231 = vmatpush3.bf16.msra.mxu1 %v6539_v53  ;;  %7647 = vst [vmem:[#allocation28_spill] sm:$0xff] %v6624_v11 }
 0x687   :  { %2508 = vmatprep.subr.bf16.mxu0 %v6545_v12  ;;  %4232 = vmatprep.subr.bf16.mxu1 %v7525_v7 }
 0x688   :  { %2538 = vmatprep.mubr.bf16.mxu0 %v7526_v15  ;;  %4246 = vmatprep.mubr.msk.bf16.mxu1 %vm4943_vm0, %v7525_v7 }
 0x68a   :  { %2509 = vmatpush1.bf16.msra.mxu0 %v6555_v23  ;;  %4233 = vmatpush3.bf16.msra.mxu1 %v6561_v27 }
 0x68b   :  { %2510 = vmatprep.subr.bf16.mxu0 %v6567_v21  ;;  %4234 = vmatprep.subr.bf16.mxu1 %v7525_v7 }
 0x68e   :  { %2511 = vmatpush1.bf16.msra.mxu0 %v6574_v59  ;;  %4235 = vmatpush3.bf16.msra.mxu1 %v6580_v56 }
 0x68f   :  { %2512 = vmatprep.subr.bf16.mxu0 %v6586_v4  ;;  %4236 = vmatprep.subr.bf16.mxu1 %v7525_v7 }
 0x692   :  { %2513 = vmatpush1.bf16.msra.mxu0 %v6593_v57  ;;  %4237 = vmatpush3.bf16.msra.mxu1 %v6599_v13 }
 0x693   :  { %2514 = vmatprep.subr.bf16.mxu0 %v6605_v34  ;;  %4238 = vmatprep.subr.bf16.mxu1 %v7525_v7 }
 0x696   :  { %2515 = vmatpush1.bf16.msra.mxu0 %v6612_v25  ;;  %4239 = vmatpush3.bf16.msra.mxu1 %v6618_v5  ;;  %v6631_v25 = vld [vmem:[%s7310_s2 + $0x78] ss:$12 sps:$4 sm:$0xff]   ;;  %v6637_v5 = vld [vmem:[%s7310_s2 + $0x80] ss:$12 sps:$4 sm:$0xff]  }
 0x697   :  { %2516 = vmatprep.subr.bf16.mxu0 %v6624_v11  ;;  %4240 = vmatprep.subr.bf16.mxu1 %v7525_v7  ;;  %7648 = vst [vmem:[#allocation29_spill] sm:$0xff] %v6631_v25  ;;  %7649 = vst [vmem:[#allocation30_spill] sm:$0xff] %v6637_v5  ;;  %v6643_v11 = vld [vmem:[%s7310_s2 + $0x94] ss:$12 sps:$4 sm:$0xff]  }
 0x698   :  { %7650 = vst [vmem:[#allocation8_spill] sm:$0xff] %v6643_v11 }
 0x69a   :  { %2517 = vmatpush1.bf16.msra.mxu0 %v6631_v25  ;;  %4241 = vmatpush3.bf16.msra.mxu1 %v6637_v5  ;;  %v6650_v25 = vld [vmem:[%s7310_s2 + $0x90] ss:$12 sps:$4 sm:$0xff]   ;;  %v6656_v5 = vld [vmem:[%s7310_s2 + $0x98] ss:$12 sps:$4 sm:$0xff]  }
 0x69b   :  { %2518 = vmatprep.subr.bf16.mxu0 %v6643_v11  ;;  %4242 = vmatprep.subr.bf16.mxu1 %v7525_v7  ;;  %7651 = vst [vmem:[#allocation9_spill] sm:$0xff] %v6650_v25  ;;  %7652 = vst [vmem:[#allocation10_spill] sm:$0xff] %v6656_v5  ;;  %v6662_v11 = vld [vmem:[%s7310_s2 + $0xac] ss:$12 sps:$4 sm:$0xff]  }
 0x69c   :  { %7653 = vst [vmem:[#allocation11_spill] sm:$0xff] %v6662_v11 }
 0x69e   :  { %2519 = vmatpush1.bf16.msra.mxu0 %v6650_v25  ;;  %4243 = vmatpush3.bf16.msra.mxu1 %v6656_v5  ;;  %v6669_v25 = vld [vmem:[%s7310_s2 + $0xa8] ss:$12 sps:$4 sm:$0xff]   ;;  %v6675_v5 = vld [vmem:[%s7310_s2 + $0xb0] ss:$12 sps:$4 sm:$0xff]  }
 0x69f   :  { %2520 = vmatprep.subr.bf16.mxu0 %v6662_v11  ;;  %4244 = vmatprep.subr.bf16.mxu1 %v7525_v7  ;;  %7654 = vst [vmem:[#allocation12_spill] sm:$0xff] %v6669_v25  ;;  %7655 = vst [vmem:[#allocation13_spill] sm:$0xff] %v6675_v5  ;;  %v6681_v11 = vld [vmem:[%s7311_s5 + $0x4] ss:$12 sps:$4 sm:$0xff]  }
 0x6a0   :  { %7656 = vst [vmem:[#allocation14_spill] sm:$0xff] %v6681_v11 }
 0x6a2   :  { %2521 = vmatpush1.bf16.msra.mxu0 %v6669_v25  ;;  %4245 = vmatpush3.bf16.msra.mxu1 %v6675_v5  ;;  %v6690_v25 = vld [vmem:[%s7311_s5] ss:$12 sps:$4 sm:$0xff]   ;;  %v6696_v5 = vld [vmem:[%s7311_s5 + $0x8] ss:$12 sps:$4 sm:$0xff]  }
 0x6a3   :  { %2609 = vmatprep.subr.bf16.mxu0 %v6681_v11  ;;  %4250 = vmatprep.subr.bf16.mxu1 %v7525_v7  ;;  %7657 = vst [vmem:[#allocation15_spill] sm:$0xff] %v6690_v25  ;;  %7658 = vst [vmem:[#allocation16_spill] sm:$0xff] %v6696_v5  ;;  %v6702_v11 = vld [vmem:[%s7311_s5 + $0x1c] ss:$12 sps:$4 sm:$0xff]  }
 0x6a4   :  { %7659 = vst [vmem:[#allocation17_spill] sm:$0xff] %v6702_v11 }
 0x6a5   :  { %2539 = vmatmul.mubr.bf16.vlgmr.msra.gmra.mrb[56].mxu0 %v6484_v35  ;;  %4247 = vmatmul.mubr.bf16.vlgmr.msra.gmra.mrb[68].mxu1 %v6484_v35  ;;  %v6712_v35 = vld [vmem:[%s7311_s5 + $0x18] ss:$12 sps:$4 sm:$0xff]  }
 0x6a6   :  { %2610 = vmatpush1.bf16.msra.mxu0 %v6690_v25  ;;  %4251 = vmatpush3.bf16.msra.mxu1 %v6696_v5  ;;  %7660 = vst [vmem:[#allocation18_spill] sm:$0xff] %v6712_v35  ;;  %v6718_v5 = vld [vmem:[%s7311_s5 + $0x20] ss:$12 sps:$4 sm:$0xff]  }
 0x6a7   :  { %2611 = vmatprep.subr.bf16.mxu0 %v6702_v11  ;;  %4252 = vmatprep.subr.bf16.mxu1 %v7525_v7  ;;  %7661 = vst [vmem:[#allocation19_spill] sm:$0xff] %v6718_v5  ;;  %v6724_v11 = vld [vmem:[%s7311_s5 + $0x34] ss:$12 sps:$4 sm:$0xff]  }
 0x6a8   :  { %2641 = vmatprep.mubr.bf16.mxu0 %v7526_v15  ;;  %4266 = vmatprep.mubr.msk.bf16.mxu1 %vm4943_vm0, %v7525_v7  ;;  %7662 = vst [vmem:[#allocation20_spill] sm:$0xff] %v6724_v11 }
 0x6aa   :  { %2612 = vmatpush1.bf16.msra.mxu0 %v6712_v35  ;;  %4253 = vmatpush3.bf16.msra.mxu1 %v6718_v5  ;;  %v6731_v35 = vld [vmem:[%s7311_s5 + $0x30] ss:$12 sps:$4 sm:$0xff]   ;;  %v6737_v5 = vld [vmem:[%s7311_s5 + $0x38] ss:$12 sps:$4 sm:$0xff]  }
 0x6ab   :  { %2613 = vmatprep.subr.bf16.mxu0 %v6724_v11  ;;  %4254 = vmatprep.subr.bf16.mxu1 %v7525_v7  ;;  %7663 = vst [vmem:[#allocation21_spill] sm:$0xff] %v6731_v35  ;;  %7664 = vst [vmem:[#allocation22_spill] sm:$0xff] %v6737_v5  ;;  %v6743_v11 = vld [vmem:[%s7311_s5 + $0x4c] ss:$12 sps:$4 sm:$0xff]  }
 0x6ac   :  { %7665 = vst [vmem:[#allocation23_spill] sm:$0xff] %v6743_v11 }
 0x6ae   :  { %2614 = vmatpush1.bf16.msra.mxu0 %v6731_v35  ;;  %4255 = vmatpush3.bf16.msra.mxu1 %v6737_v5  ;;  %v7666_v35 = vld [vmem:[#allocation6_spill] sm:$0xff] }
 0x6af   :  { %2615 = vmatprep.subr.bf16.mxu0 %v6743_v11  ;;  %4256 = vmatprep.subr.bf16.mxu1 %v7525_v7 }
 0x6b2   :  { %2616 = vmatpush1.bf16.msra.mxu0 %v6130_v60  ;;  %4257 = vmatpush3.bf16.msra.mxu1 %v6136_v38 }
 0x6b3   :  { %2617 = vmatprep.subr.bf16.mxu0 %v7623_v62  ;;  %4258 = vmatprep.subr.bf16.mxu1 %v7525_v7 }
 0x6b6   :  { %2618 = vmatpush1.bf16.msra.mxu0 %v7624_v55  ;;  %4259 = vmatpush3.bf16.msra.mxu1 %v7625_v46 }
 0x6b7   :  { %2619 = vmatprep.subr.bf16.mxu0 %v7626_v1  ;;  %4260 = vmatprep.subr.bf16.mxu1 %v7525_v7 }
 0x6ba   :  { %2620 = vmatpush1.bf16.msra.mxu0 %v7627_v47  ;;  %4261 = vmatpush3.bf16.msra.mxu1 %v7628_v18 }
 0x6bb   :  { %2621 = vmatprep.subr.bf16.mxu0 %v7629_v28  ;;  %4262 = vmatprep.subr.bf16.mxu1 %v7525_v7 }
 0x6be   :  { %2622 = vmatpush1.bf16.msra.mxu0 %v7630_v41  ;;  %4263 = vmatpush3.bf16.msra.mxu1 %v7631_v20 }
 0x6bf   :  { %2623 = vmatprep.subr.bf16.mxu0 %v7632_v42  ;;  %4264 = vmatprep.subr.bf16.mxu1 %v7525_v7 }
 0x6c2   :  { %2624 = vmatpush1.bf16.msra.mxu0 %v7633_v45  ;;  %4265 = vmatpush3.bf16.msra.mxu1 %v7634_v9 }
 0x6c3   :  { %2691 = vmatprep.subr.bf16.mxu0 %v7635_v37  ;;  %4270 = vmatprep.subr.bf16.mxu1 %v7525_v7 }
 0x738   :  { %v2391_v60 = vpop.f32.mrb[60].mxu1 }
 0x739   :  { %v4208_v38 = vpop.f32.mrb[61].mxu1 }
 0x73a   :  { %v2394_v62 = vpop.f32.mrb[62].mxu1 }
 0x73b   :  { %v4209_v55 = vpop.f32.mrb[63].mxu1 }
 0x758   :  { %v2432_v46 = vpop.f32.mrb[52].mxu0  ;;  %v2473_v1 = vpop.f32.mrb[64].mxu1 }
 0x759   :  { %v4447_v47 = vadd.f32 %v7636_v19, %v2432_v46  ;;  %v2434_v18 = vpop.f32.mrb[53].mxu0  ;;  %v4228_v28 = vpop.f32.mrb[65].mxu1  ;;  %v2474_v25 = vadd.f32 %v2473_v1, %v7666_v35  ;;  %v7667_v19 = vld [vmem:[#allocation7_spill] sm:$0xff] }
 0x75a   :  { %v2436_v41 = vpop.f32.mrb[54].mxu0  ;;  %v2476_v20 = vpop.f32.mrb[66].mxu1  ;;  %v4449_v9 = vadd.f32 %v7637_v50, %v2434_v18  ;;  %v2392_v28 = vadd.f32 %v2391_v60, %v7667_v19 }
 0x75b   :  { %v3630_v42 = vmul.f32 -1.442695, %v4447_v47  ;;  %v2437_v45 = vpop.f32.mrb[55].mxu0  ;;  %v4229_v11 = vpop.f32.mrb[67].mxu1  ;;  %v2501_v47 = vld [vmem:[#allocation3 + $0x3c] sm:$0xff] }
 0x75c   :  { %v3631_v37 = vmul.f32 -1.442695, %v4449_v9  ;;  %v2503_v18 = vunpack.c.l.bf16 %v2501_v47  ;;  %v2504_v60 = vunpack.c.h.bf16 %v2501_v47 }
 0x75d   :  { %4727 = vpow2.f32 %v3630_v42 }
 0x75e   :  { %4729 = vpow2.f32 %v3631_v37 }
 0x767   :  { %v4728_v5 = vpop.eup %4727 }
 0x768   :  { %v2483_v38 = vadd.f32 1.0, %v4728_v5  ;;  %v4730_v62 = vpop.eup %4729 }
 0x769   :  { %v2490_v55 = vadd.f32 1.0, %v4730_v62 }
 0x76a   :  { %4731 = vrcp.f32 %v2483_v38 }
 0x76b   :  { %4733 = vrcp.f32 %v2490_v55 }
 0x774   :  { %v4732_v46 = vpop.eup %4731 }
 0x775   :  { %v2493_v41 = vmul.f32 %v4732_v46, %v2474_v25  ;;  %v4734_v46 = vpop.eup %4733 }
 0x777   :  { %v2494_v20 = vadd.f32 %v2493_v41, %v2392_v28  ;;  %v2496_v41 = vsub.f32 1.0, %v4734_v46 }
 0x778   :  { %v2540_v11 = vpop.f32.mrb[56].mxu0  ;;  %v2581_v45 = vpop.f32.mrb[68].mxu1 }
 0x779   :  { %4735 = vtanh.f32 %v2494_v20  ;;  %v2541_v42 = vadd.f32 %v2540_v11, %v5451_v16  ;;  %v2542_v9 = vpop.f32.mrb[57].mxu0  ;;  %v4248_v5 = vpop.f32.mrb[69].mxu1  ;;  %v2498_v11 = vmul.f32 %v4734_v46, %v6475_v8  ;;  %v2582_v47 = vadd.f32 %v2581_v45, %v5461_v14  ;;  %v6893_v45 = vld [vmem:[%s7311_s5 + $0x64] ss:$12 sps:$4 sm:$0xff]  }
 0x77a   :  { %v2543_v37 = vadd.f32 %v2542_v9, %v5454_v6  ;;  %v2544_v38 = vpop.f32.mrb[58].mxu0  ;;  %v2584_v62 = vpop.f32.mrb[70].mxu1  ;;  %7690 = vst [vmem:[#allocation25_spill] sm:$0xff] %v6893_v45 }
 0x77b   :  { %v2587_v1 = vadd.f32 %v2541_v42, %v2503_v18  ;;  %v2545_v35 = vpop.f32.mrb[59].mxu0  ;;  %v4249_v50 = vpop.f32.mrb[71].mxu1 }
 0x77c   :  { %v2594_v55 = vadd.f32 %v2543_v37, %v2504_v60  ;;  %v6776_v50 = vld [vmem:[#allocation3 + $0x44] ss:$12 sps:$4 sm:$0xff]  }
 0x77d   :  { %v3632_v25 = vmul.f32 -1.442695, %v2587_v1  ;;  %v2505_v37 = vunpack.c.l.bf16 %v6776_v50 }
 0x77e   :  { %v3633_v28 = vmul.f32 -1.442695, %v2594_v55 }
 0x77f   :  { %4737 = vpow2.f32 %v3632_v25 }
 0x780   :  { %4739 = vpow2.f32 %v3633_v28 }
 0x783   :  { %v4736_v20 = vpop.eup %4735 }
 0x784   :  { %v2497_v19 = vmul.f32 %v4736_v20, %v2496_v41  ;;  %v6900_v41 = vld [vmem:[%s7311_s5 + $0x60] ss:$12 sps:$4 sm:$0xff]   ;;  %v6906_v20 = vld [vmem:[%s7311_s5 + $0x68] ss:$12 sps:$4 sm:$0xff]  }
 0x786   :  { %v6774_v5 = vadd.f32 %v2498_v11, %v2497_v19  ;;  %v6912_v11 = vld [vmem:[%s7311_s5 + $0x7c] ss:$12 sps:$4 sm:$0xff]  }
 0x789   :  { %v4738_v9 = vpop.eup %4737 }
 0x78a   :  { %v2591_v38 = vadd.f32 1.0, %v4738_v9  ;;  %v4740_v18 = vpop.eup %4739  ;;  %v6919_v9 = vld [vmem:[%s7311_s5 + $0x78] ss:$12 sps:$4 sm:$0xff]  }
 0x78b   :  { %v2598_v35 = vadd.f32 1.0, %v4740_v18  ;;  %v6931_v18 = vld [vmem:[%s7311_s5 + $0x94] ss:$12 sps:$4 sm:$0xff]  }
 0x78c   :  { %4741 = vrcp.f32 %v2591_v38  ;;  %v6925_v38 = vld [vmem:[%s7311_s5 + $0x80] ss:$12 sps:$4 sm:$0xff]  }
 0x78d   :  { %4743 = vrcp.f32 %v2598_v35  ;;  %v6938_v35 = vld [vmem:[%s7311_s5 + $0x90] ss:$12 sps:$4 sm:$0xff]  }
 0x796   :  { %v4742_v42 = vpop.eup %4741 }
 0x797   :  { %v2601_v62 = vmul.f32 %v4742_v42, %v2582_v47  ;;  %v4744_v8 = vpop.eup %4743  ;;  %v6944_v47 = vld [vmem:[%s7311_s5 + $0x98] ss:$12 sps:$4 sm:$0xff]  }
 0x798   :  { %v2604_v60 = vsub.f32 1.0, %v4744_v8  ;;  %v2606_v55 = vmul.f32 %v4744_v8, %v6480_v29  ;;  %v7685_v29 = vld [vmem:[#allocation20_spill] sm:$0xff]  ;;  %v6950_v42 = vld [vmem:[%s7311_s5 + $0xac] ss:$12 sps:$4 sm:$0xff]  }
 0x799   :  { %v2602_v1 = vadd.f32 %v2601_v62, %v2505_v37  ;;  %v6957_v37 = vld [vmem:[%s7311_s5 + $0xa8] ss:$12 sps:$4 sm:$0xff]   ;;  %v6963_v62 = vld [vmem:[%s7311_s5 + $0xb0] ss:$12 sps:$4 sm:$0xff]  }
 0x79b   :  { %4745 = vtanh.f32 %v2602_v1  ;;  %v6969_v1 = vld [vmem:[%s7312_s6 + $0x4] ss:$12 sps:$4 sm:$0xff]  }
 0x7a5   :  { %v4746_v19 = vpop.eup %4745 }
 0x7a6   :  { %v2605_v25 = vmul.f32 %v4746_v19, %v2604_v60 }
 0x7a8   :  { %v6781_v46 = vadd.f32 %v2606_v55, %v2605_v25 }
 0x7aa   :  { %v6785_v28 = vpack.c.bf16 %v6781_v46, %v6781_v46 }
 0x7ac   :  { %2642 = vmatmul.mubr.bf16.vlgmr.msra.gmra.mrb[60].mxu0 %v6785_v28  ;;  %4267 = vmatmul.mubr.bf16.vlgmr.msra.gmra.mrb[72].mxu1 %v6785_v28 }
 0x7ad   :  { %2692 = vmatpush1.bf16.msra.mxu0 %v6247_v31  ;;  %4271 = vmatpush3.bf16.msra.mxu1 %v6253_v24  ;;  %v2690_v31 = vpack.c.bf16 %v6774_v5, %v6774_v5  ;;  %v7668_v24 = vld [vmem:[#allocation26_spill] sm:$0xff] }
 0x7ae   :  { %2693 = vmatprep.subr.bf16.mxu0 %v6259_v40  ;;  %4272 = vmatprep.subr.bf16.mxu1 %v7525_v7  ;;  %v7669_v40 = vld [vmem:[#allocation27_spill] sm:$0xff]  ;;  %7691 = vst [vmem:[#allocation26_spill] sm:$0xff] %v6900_v41 }
 0x7af   :  { %2723 = vmatprep.mubr.bf16.mxu0 %v7526_v15  ;;  %4286 = vmatprep.mubr.msk.bf16.mxu1 %vm4943_vm0, %v7525_v7  ;;  %7692 = vst [vmem:[#allocation27_spill] sm:$0xff] %v6906_v20 }
 0x7b1   :  { %2694 = vmatpush1.bf16.msra.mxu0 %v6269_v30  ;;  %4273 = vmatpush3.bf16.msra.mxu1 %v6275_v2  ;;  %v7670_v30 = vld [vmem:[#allocation28_spill] sm:$0xff]  ;;  %v7671_v2 = vld [vmem:[#allocation29_spill] sm:$0xff] }
 0x7b2   :  { %2695 = vmatprep.subr.bf16.mxu0 %v6281_v36  ;;  %4274 = vmatprep.subr.bf16.mxu1 %v7525_v7  ;;  %v7672_v36 = vld [vmem:[#allocation30_spill] sm:$0xff]  ;;  %7693 = vst [vmem:[#allocation28_spill] sm:$0xff] %v6912_v11  ;;  %7694 = vst [vmem:[#allocation29_spill] sm:$0xff] %v6919_v9 }
 0x7b3   :  { %7695 = vst [vmem:[#allocation30_spill] sm:$0xff] %v6925_v38 }
 0x7b5   :  { %2696 = vmatpush1.bf16.msra.mxu0 %v6288_v0  ;;  %4275 = vmatpush3.bf16.msra.mxu1 %v6294_v44  ;;  %v7673_v0 = vld [vmem:[#allocation8_spill] sm:$0xff]  ;;  %v7674_v44 = vld [vmem:[#allocation9_spill] sm:$0xff] }
 0x7b6   :  { %2697 = vmatprep.subr.bf16.mxu0 %v6300_v33  ;;  %4276 = vmatprep.subr.bf16.mxu1 %v7525_v7  ;;  %v7675_v33 = vld [vmem:[#allocation10_spill] sm:$0xff]  ;;  %7696 = vst [vmem:[#allocation8_spill] sm:$0xff] %v6931_v18  ;;  %7697 = vst [vmem:[#allocation9_spill] sm:$0xff] %v6938_v35 }
 0x7b7   :  { %7698 = vst [vmem:[#allocation10_spill] sm:$0xff] %v6944_v47 }
 0x7b9   :  { %2698 = vmatpush1.bf16.msra.mxu0 %v6307_v54  ;;  %4277 = vmatpush3.bf16.msra.mxu1 %v6313_v63  ;;  %v7676_v54 = vld [vmem:[#allocation11_spill] sm:$0xff]  ;;  %v7677_v63 = vld [vmem:[#allocation12_spill] sm:$0xff] }
 0x7ba   :  { %2699 = vmatprep.subr.bf16.mxu0 %v6319_v3  ;;  %4278 = vmatprep.subr.bf16.mxu1 %v7525_v7  ;;  %v7678_v3 = vld [vmem:[#allocation13_spill] sm:$0xff]  ;;  %7699 = vst [vmem:[#allocation11_spill] sm:$0xff] %v6950_v42  ;;  %7700 = vst [vmem:[#allocation12_spill] sm:$0xff] %v6957_v37 }
 0x7bb   :  { %7701 = vst [vmem:[#allocation13_spill] sm:$0xff] %v6963_v62 }
 0x7bd   :  { %2700 = vmatpush1.bf16.msra.mxu0 %v6326_v58  ;;  %4279 = vmatpush3.bf16.msra.mxu1 %v6332_v26  ;;  %v7679_v58 = vld [vmem:[#allocation14_spill] sm:$0xff]  ;;  %v7680_v26 = vld [vmem:[#allocation15_spill] sm:$0xff] }
 0x7be   :  { %2701 = vmatprep.subr.bf16.mxu0 %v6338_v49  ;;  %4280 = vmatprep.subr.bf16.mxu1 %v7525_v7  ;;  %v7681_v49 = vld [vmem:[#allocation16_spill] sm:$0xff]  ;;  %7702 = vst [vmem:[#allocation14_spill] sm:$0xff] %v6969_v1 }
 0x7c1   :  { %2702 = vmatpush1.bf16.msra.mxu0 %v7640_v39  ;;  %4281 = vmatpush3.bf16.msra.mxu1 %v7641_v48  ;;  %v7686_v39 = vld [vmem:[#allocation21_spill] sm:$0xff]  ;;  %v7687_v48 = vld [vmem:[#allocation22_spill] sm:$0xff] }
 0x7c2   :  { %2703 = vmatprep.subr.bf16.mxu0 %v7642_v17  ;;  %4282 = vmatprep.subr.bf16.mxu1 %v7525_v7  ;;  %v7688_v17 = vld [vmem:[#allocation23_spill] sm:$0xff] }
 0x7c5   :  { %2704 = vmatpush1.bf16.msra.mxu0 %v7643_v43  ;;  %4283 = vmatpush3.bf16.msra.mxu1 %v7644_v22  ;;  %v6881_v43 = vld [vmem:[%s7311_s5 + $0x48] ss:$12 sps:$4 sm:$0xff]   ;;  %v6887_v22 = vld [vmem:[%s7311_s5 + $0x50] ss:$12 sps:$4 sm:$0xff]  }
 0x7c6   :  { %2705 = vmatprep.subr.bf16.mxu0 %v6376_v32  ;;  %4284 = vmatprep.subr.bf16.mxu1 %v7525_v7  ;;  %v7683_v32 = vld [vmem:[#allocation18_spill] sm:$0xff]  ;;  %7689 = vst [vmem:[#allocation24_spill] sm:$0xff] %v6887_v22 }
 0x7c9   :  { %2706 = vmatpush1.bf16.msra.mxu0 %v6383_v51  ;;  %4285 = vmatpush3.bf16.msra.mxu1 %v6389_v52  ;;  %v7682_v52 = vld [vmem:[#allocation17_spill] sm:$0xff]  ;;  %v7684_v51 = vld [vmem:[#allocation19_spill] sm:$0xff] }
 0x7ca   :  { %2799 = vmatprep.subr.bf16.mxu0 %v6526_v10  ;;  %4290 = vmatprep.subr.bf16.mxu1 %v7525_v7 }
 0x7cc   :  { %2724 = vmatmul.mubr.bf16.vlgmr.msra.gmra.mrb[60].mxu0 %v2690_v31  ;;  %4287 = vmatmul.mubr.bf16.vlgmr.msra.gmra.mrb[76].mxu1 %v2690_v31  ;;  %v7703_v31 = vld [vmem:[#allocation4_spill] sm:$0xff] }
 0x7cd   :  { %2800 = vmatpush1.bf16.msra.mxu0 %v6533_v61  ;;  %4291 = vmatpush3.bf16.msra.mxu1 %v6539_v53 }
 0x7ce   :  { %2801 = vmatprep.subr.bf16.mxu0 %v6545_v12  ;;  %4292 = vmatprep.subr.bf16.mxu1 %v7525_v7 }
 0x7cf   :  { %2831 = vmatprep.mubr.bf16.mxu0 %v7526_v15  ;;  %4306 = vmatprep.mubr.msk.bf16.mxu1 %vm4943_vm0, %v7525_v7 }
 0x7d1   :  { %2802 = vmatpush1.bf16.msra.mxu0 %v6555_v23  ;;  %4293 = vmatpush3.bf16.msra.mxu1 %v6561_v27 }
 0x7d2   :  { %2803 = vmatprep.subr.bf16.mxu0 %v6567_v21  ;;  %4294 = vmatprep.subr.bf16.mxu1 %v7525_v7 }
 0x7d5   :  { %2804 = vmatpush1.bf16.msra.mxu0 %v6574_v59  ;;  %4295 = vmatpush3.bf16.msra.mxu1 %v6580_v56 }
 0x7d6   :  { %2805 = vmatprep.subr.bf16.mxu0 %v6586_v4  ;;  %4296 = vmatprep.subr.bf16.mxu1 %v7525_v7 }
 0x7d9   :  { %2806 = vmatpush1.bf16.msra.mxu0 %v6593_v57  ;;  %4297 = vmatpush3.bf16.msra.mxu1 %v6599_v13 }
 0x7da   :  { %2807 = vmatprep.subr.bf16.mxu0 %v6605_v34  ;;  %4298 = vmatprep.subr.bf16.mxu1 %v7525_v7 }
 0x7dd   :  { %2808 = vmatpush1.bf16.msra.mxu0 %v7668_v24  ;;  %4299 = vmatpush3.bf16.msra.mxu1 %v7669_v40 }
 0x7de   :  { %2809 = vmatprep.subr.bf16.mxu0 %v7670_v30  ;;  %4300 = vmatprep.subr.bf16.mxu1 %v7525_v7 }
 0x7e1   :  { %2810 = vmatpush1.bf16.msra.mxu0 %v7671_v2  ;;  %4301 = vmatpush3.bf16.msra.mxu1 %v7672_v36 }
 0x7e2   :  { %2811 = vmatprep.subr.bf16.mxu0 %v7673_v0  ;;  %4302 = vmatprep.subr.bf16.mxu1 %v7525_v7 }
 0x7e5   :  { %2812 = vmatpush1.bf16.msra.mxu0 %v7674_v44  ;;  %4303 = vmatpush3.bf16.msra.mxu1 %v7675_v33 }
 0x7e6   :  { %2813 = vmatprep.subr.bf16.mxu0 %v7676_v54  ;;  %4304 = vmatprep.subr.bf16.mxu1 %v7525_v7 }
 0x7e9   :  { %2814 = vmatpush1.bf16.msra.mxu0 %v7677_v63  ;;  %4305 = vmatpush3.bf16.msra.mxu1 %v7678_v3 }
 0x7ea   :  { %2902 = vmatprep.subr.bf16.mxu0 %v7679_v58  ;;  %4310 = vmatprep.subr.bf16.mxu1 %v7525_v7 }
 0x7ec   :  { %2832 = vmatmul.mubr.bf16.vlgmr.msra.gmra.mrb[64].mxu0 %v6785_v28  ;;  %4307 = vmatmul.mubr.bf16.vlgmr.msra.gmra.mrb[80].mxu1 %v6785_v28 }
 0x7ed   :  { %2903 = vmatpush1.bf16.msra.mxu0 %v7680_v26  ;;  %4311 = vmatpush3.bf16.msra.mxu1 %v7681_v49 }
 0x7ee   :  { %2904 = vmatprep.subr.bf16.mxu0 %v7682_v52  ;;  %4312 = vmatprep.subr.bf16.mxu1 %v7525_v7 }
 0x7ef   :  { %2934 = vmatprep.mubr.bf16.mxu0 %v7526_v15  ;;  %4326 = vmatprep.mubr.msk.bf16.mxu1 %vm4943_vm0, %v7525_v7 }
 0x7f1   :  { %2905 = vmatpush1.bf16.msra.mxu0 %v7683_v32  ;;  %4313 = vmatpush3.bf16.msra.mxu1 %v7684_v51 }
 0x7f2   :  { %2906 = vmatprep.subr.bf16.mxu0 %v7685_v29  ;;  %4314 = vmatprep.subr.bf16.mxu1 %v7525_v7 }
 0x7f5   :  { %2907 = vmatpush1.bf16.msra.mxu0 %v7686_v39  ;;  %4315 = vmatpush3.bf16.msra.mxu1 %v7687_v48 }
 0x7f6   :  { %2908 = vmatprep.subr.bf16.mxu0 %v7688_v17  ;;  %4316 = vmatprep.subr.bf16.mxu1 %v7525_v7 }
 0x7f9   :  { %2909 = vmatpush1.bf16.msra.mxu0 %v6881_v43  ;;  %4317 = vmatpush3.bf16.msra.mxu1 %v6887_v22 }
 0x7fa   :  { %2910 = vmatprep.subr.bf16.mxu0 %v6893_v45  ;;  %4318 = vmatprep.subr.bf16.mxu1 %v7525_v7  ;;  %v7705_v45 = vld [vmem:[#allocation6_spill] sm:$0xff] }
 0x7fd   :  { %2911 = vmatpush1.bf16.msra.mxu0 %v6900_v41  ;;  %4319 = vmatpush3.bf16.msra.mxu1 %v6906_v20 }
 0x7fe   :  { %2912 = vmatprep.subr.bf16.mxu0 %v6912_v11  ;;  %4320 = vmatprep.subr.bf16.mxu1 %v7525_v7  ;;  %v7704_v11 = vld [vmem:[#allocation5_spill] sm:$0xff] }
 0x801   :  { %2913 = vmatpush1.bf16.msra.mxu0 %v6919_v9  ;;  %4321 = vmatpush3.bf16.msra.mxu1 %v6925_v38 }
 0x802   :  { %2914 = vmatprep.subr.bf16.mxu0 %v6931_v18  ;;  %4322 = vmatprep.subr.bf16.mxu1 %v7525_v7 }
 0x805   :  { %2915 = vmatpush1.bf16.msra.mxu0 %v6938_v35  ;;  %4323 = vmatpush3.bf16.msra.mxu1 %v6944_v47 }
 0x806   :  { %2916 = vmatprep.subr.bf16.mxu0 %v6950_v42  ;;  %4324 = vmatprep.subr.bf16.mxu1 %v7525_v7 }
 0x809   :  { %2917 = vmatpush1.bf16.msra.mxu0 %v6957_v37  ;;  %4325 = vmatpush3.bf16.msra.mxu1 %v6963_v62 }
 0x80a   :  { %2984 = vmatprep.subr.bf16.mxu0 %v6969_v1  ;;  %4330 = vmatprep.subr.bf16.mxu1 %v7525_v7 }
 0x87f   :  { %v2684_v8 = vpop.f32.mrb[72].mxu1 }
 0x880   :  { %v4268_v60 = vpop.f32.mrb[73].mxu1 }
 0x881   :  { %v2687_v19 = vpop.f32.mrb[74].mxu1 }
 0x882   :  { %v4269_v25 = vpop.f32.mrb[75].mxu1 }
 0x89f   :  { %v2725_v55 = vpop.f32.mrb[60].mxu0  ;;  %v2766_v28 = vpop.f32.mrb[76].mxu1 }
 0x8a0   :  { %v4451_v37 = vadd.f32 %v7703_v31, %v2725_v55  ;;  %v2727_v42 = vpop.f32.mrb[61].mxu0  ;;  %v4288_v47 = vpop.f32.mrb[77].mxu1  ;;  %v2767_v22 = vadd.f32 %v2766_v28, %v7705_v45  ;;  %v7706_v31 = vld [vmem:[#allocation7_spill] sm:$0xff] }
 0x8a1   :  { %v2729_v62 = vpop.f32.mrb[62].mxu0  ;;  %v2769_v35 = vpop.f32.mrb[78].mxu1  ;;  %v4453_v20 = vadd.f32 %v7704_v11, %v2727_v42  ;;  %v2685_v47 = vadd.f32 %v2684_v8, %v7706_v31 }
 0x8a2   :  { %v3634_v18 = vmul.f32 -1.442695, %v4451_v37  ;;  %v2730_v38 = vpop.f32.mrb[63].mxu0  ;;  %v4289_v9 = vpop.f32.mrb[79].mxu1  ;;  %v2794_v35 = vld [vmem:[#allocation3 + $0x48] sm:$0xff] }
 0x8a3   :  { %v3635_v1 = vmul.f32 -1.442695, %v4453_v20  ;;  %v2797_v8 = vunpack.c.h.bf16 %v2794_v35 }
 0x8a4   :  { %4747 = vpow2.f32 %v3634_v18  ;;  %v2796_v18 = vunpack.c.l.bf16 %v2794_v35 }
 0x8a5   :  { %4749 = vpow2.f32 %v3635_v1 }
 0x8ae   :  { %v4748_v41 = vpop.eup %4747 }
 0x8af   :  { %v2776_v60 = vadd.f32 1.0, %v4748_v41  ;;  %v4750_v19 = vpop.eup %4749 }
 0x8b0   :  { %v2783_v25 = vadd.f32 1.0, %v4750_v19 }
 0x8b1   :  { %4751 = vrcp.f32 %v2776_v60 }
 0x8b2   :  { %4753 = vrcp.f32 %v2783_v25 }
 0x8bb   :  { %v4752_v55 = vpop.eup %4751 }
 0x8bc   :  { %v2786_v62 = vmul.f32 %v4752_v55, %v2767_v22  ;;  %v4754_v55 = vpop.eup %4753 }
 0x8be   :  { %v2787_v38 = vadd.f32 %v2786_v62, %v2685_v47  ;;  %v2789_v62 = vsub.f32 1.0, %v4754_v55 }
 0x8bf   :  { %v2833_v9 = vpop.f32.mrb[64].mxu0  ;;  %v2874_v37 = vpop.f32.mrb[80].mxu1 }
 0x8c0   :  { %4755 = vtanh.f32 %v2787_v38  ;;  %v2834_v20 = vadd.f32 %v2833_v9, %v5451_v16  ;;  %v2835_v42 = vpop.f32.mrb[65].mxu0  ;;  %v4308_v41 = vpop.f32.mrb[81].mxu1  ;;  %v2791_v9 = vmul.f32 %v4754_v55, %v6774_v5 }
 0x8c1   :  { %v2836_v1 = vadd.f32 %v2835_v42, %v5454_v6  ;;  %v2837_v60 = vpop.f32.mrb[66].mxu0  ;;  %v2877_v19 = vpop.f32.mrb[82].mxu1 }
 0x8c2   :  { %v2880_v28 = vadd.f32 %v2834_v20, %v2796_v18  ;;  %v2838_v45 = vpop.f32.mrb[67].mxu0  ;;  %v4309_v11 = vpop.f32.mrb[83].mxu1  ;;  %v2798_v20 = vunpack.c.h.bf16 %v6776_v50  ;;  %v6996_v50 = vld [vmem:[%s7312_s6] ss:$12 sps:$4 sm:$0xff]  }
 0x8c3   :  { %v2887_v25 = vadd.f32 %v2836_v1, %v2797_v8  ;;  %v2875_v11 = vadd.f32 %v2874_v37, %v5461_v14  ;;  %v7008_v37 = vld [vmem:[%s7312_s6 + $0x1c] ss:$12 sps:$4 sm:$0xff]  }
 0x8c4   :  { %v3636_v22 = vmul.f32 -1.442695, %v2880_v28 }
 0x8c5   :  { %v3637_v47 = vmul.f32 -1.442695, %v2887_v25 }
 0x8c6   :  { %4757 = vpow2.f32 %v3636_v22 }
 0x8c7   :  { %4759 = vpow2.f32 %v3637_v47  ;;  %v7018_v47 = vld [vmem:[%s7312_s6 + $0x18] ss:$12 sps:$4 sm:$0xff]  }
 0x8ca   :  { %v4756_v38 = vpop.eup %4755 }
 0x8cb   :  { %v2790_v31 = vmul.f32 %v4756_v38, %v2789_v62  ;;  %v7024_v62 = vld [vmem:[%s7312_s6 + $0x20] ss:$12 sps:$4 sm:$0xff]  }
 0x8cc   :  { %v7030_v38 = vld [vmem:[%s7312_s6 + $0x34] ss:$12 sps:$4 sm:$0xff]  }
 0x8cd   :  { %v6980_v41 = vadd.f32 %v2791_v9, %v2790_v31  ;;  %v7037_v9 = vld [vmem:[%s7312_s6 + $0x30] ss:$12 sps:$4 sm:$0xff]  }
 0x8d0   :  { %v4758_v42 = vpop.eup %4757 }
 0x8d1   :  { %v2884_v60 = vadd.f32 1.0, %v4758_v42  ;;  %v4760_v18 = vpop.eup %4759  ;;  %v7043_v42 = vld [vmem:[%s7312_s6 + $0x38] ss:$12 sps:$4 sm:$0xff]  }
 0x8d2   :  { %v2891_v45 = vadd.f32 1.0, %v4760_v18  ;;  %v7056_v18 = vld [vmem:[%s7312_s6 + $0x48] ss:$12 sps:$4 sm:$0xff]  }
 0x8d3   :  { %4761 = vrcp.f32 %v2884_v60  ;;  %v7049_v60 = vld [vmem:[%s7312_s6 + $0x4c] ss:$12 sps:$4 sm:$0xff]  }
 0x8d4   :  { %4763 = vrcp.f32 %v2891_v45  ;;  %v7062_v45 = vld [vmem:[%s7312_s6 + $0x50] ss:$12 sps:$4 sm:$0xff]  }
 0x8dd   :  { %v4762_v35 = vpop.eup %4761 }
 0x8de   :  { %v2894_v1 = vmul.f32 %v4762_v35, %v2875_v11  ;;  %v4764_v28 = vpop.eup %4763  ;;  %v7068_v11 = vld [vmem:[%s7312_s6 + $0x64] ss:$12 sps:$4 sm:$0xff]   ;;  %v7075_v35 = vld [vmem:[%s7312_s6 + $0x60] ss:$12 sps:$4 sm:$0xff]  }
 0x8df   :  { %v2897_v8 = vsub.f32 1.0, %v4764_v28  ;;  %v2899_v31 = vmul.f32 %v4764_v28, %v6781_v46  ;;  %v7002_v46 = vld [vmem:[%s7312_s6 + $0x8] ss:$12 sps:$4 sm:$0xff]   ;;  %v7100_v28 = vld [vmem:[%s7312_s6 + $0x80] ss:$12 sps:$4 sm:$0xff]  }
 0x8e0   :  { %v2895_v19 = vadd.f32 %v2894_v1, %v2798_v20  ;;  %v7081_v20 = vld [vmem:[%s7312_s6 + $0x68] ss:$12 sps:$4 sm:$0xff]  }
 0x8e1   :  { %v7087_v1 = vld [vmem:[%s7312_s6 + $0x7c] ss:$12 sps:$4 sm:$0xff]  }
 0x8e2   :  { %4765 = vtanh.f32 %v2895_v19  ;;  %v7094_v19 = vld [vmem:[%s7312_s6 + $0x78] ss:$12 sps:$4 sm:$0xff]  }
 0x8ec   :  { %v4766_v5 = vpop.eup %4765 }
 0x8ed   :  { %v2898_v22 = vmul.f32 %v4766_v5, %v2897_v8  ;;  %v7106_v8 = vld [vmem:[%s7312_s6 + $0x94] ss:$12 sps:$4 sm:$0xff]   ;;  %v7113_v5 = vld [vmem:[%s7312_s6 + $0x90] ss:$12 sps:$4 sm:$0xff]  }
 0x8ee   :  { %7707 = vst [vmem:[#allocation15_spill] sm:$0xff] %v7106_v8  ;;  %7708 = vst [vmem:[#allocation16_spill] sm:$0xff] %v7113_v5 }
 0x8ef   :  { %v6985_v25 = vadd.f32 %v2899_v31, %v2898_v22  ;;  %v7119_v22 = vld [vmem:[%s7312_s6 + $0x98] ss:$12 sps:$4 sm:$0xff]  }
 0x8f0   :  { %7709 = vst [vmem:[#allocation17_spill] sm:$0xff] %v7119_v22  ;;  %v7125_v31 = vld [vmem:[%s7312_s6 + $0xac] ss:$12 sps:$4 sm:$0xff]  }
 0x8f1   :  { %v6989_v55 = vpack.c.bf16 %v6985_v25, %v6985_v25 }
 0x8f3   :  { %2935 = vmatmul.mubr.bf16.vlgmr.msra.gmra.mrb[68].mxu0 %v6989_v55  ;;  %4327 = vmatmul.mubr.bf16.vlgmr.msra.gmra.mrb[84].mxu1 %v6989_v55 }
 0x8f4   :  { %2985 = vmatpush1.bf16.msra.mxu0 %v6996_v50  ;;  %4331 = vmatpush3.bf16.msra.mxu1 %v7002_v46 }
 0x8f5   :  { %2986 = vmatprep.subr.bf16.mxu0 %v7008_v37  ;;  %4332 = vmatprep.subr.bf16.mxu1 %v7525_v7 }
 0x8f6   :  { %3016 = vmatprep.mubr.bf16.mxu0 %v7526_v15  ;;  %4346 = vmatprep.mubr.msk.bf16.mxu1 %vm4943_vm0, %v7525_v7 }
 0x8f8   :  { %2987 = vmatpush1.bf16.msra.mxu0 %v7018_v47  ;;  %4333 = vmatpush3.bf16.msra.mxu1 %v7024_v62 }
 0x8f9   :  { %2988 = vmatprep.subr.bf16.mxu0 %v7030_v38  ;;  %4334 = vmatprep.subr.bf16.mxu1 %v7525_v7 }
 0x8fc   :  { %2989 = vmatpush1.bf16.msra.mxu0 %v7037_v9  ;;  %4335 = vmatpush3.bf16.msra.mxu1 %v7043_v42 }
 0x8fd   :  { %2990 = vmatprep.subr.bf16.mxu0 %v7049_v60  ;;  %4336 = vmatprep.subr.bf16.mxu1 %v7525_v7 }
 0x900   :  { %2991 = vmatpush1.bf16.msra.mxu0 %v7056_v18  ;;  %4337 = vmatpush3.bf16.msra.mxu1 %v7062_v45 }
 0x901   :  { %2992 = vmatprep.subr.bf16.mxu0 %v7068_v11  ;;  %4338 = vmatprep.subr.bf16.mxu1 %v7525_v7 }
 0x904   :  { %2993 = vmatpush1.bf16.msra.mxu0 %v7075_v35  ;;  %4339 = vmatpush3.bf16.msra.mxu1 %v7081_v20 }
 0x905   :  { %2994 = vmatprep.subr.bf16.mxu0 %v7087_v1  ;;  %4340 = vmatprep.subr.bf16.mxu1 %v7525_v7 }
 0x908   :  { %2995 = vmatpush1.bf16.msra.mxu0 %v7094_v19  ;;  %4341 = vmatpush3.bf16.msra.mxu1 %v7100_v28 }
 0x909   :  { %2996 = vmatprep.subr.bf16.mxu0 %v7106_v8  ;;  %4342 = vmatprep.subr.bf16.mxu1 %v7525_v7  ;;  %v2983_v8 = vpack.c.bf16 %v6980_v41, %v6980_v41 }
 0x90c   :  { %2997 = vmatpush1.bf16.msra.mxu0 %v7113_v5  ;;  %4343 = vmatpush3.bf16.msra.mxu1 %v7119_v22  ;;  %v7132_v5 = vld [vmem:[%s7312_s6 + $0xa8] ss:$12 sps:$4 sm:$0xff]   ;;  %v7138_v22 = vld [vmem:[%s7312_s6 + $0xb0] ss:$12 sps:$4 sm:$0xff]  }
 0x90d   :  { %2998 = vmatprep.subr.bf16.mxu0 %v7125_v31  ;;  %4344 = vmatprep.subr.bf16.mxu1 %v7525_v7 }
 0x910   :  { %2999 = vmatpush1.bf16.msra.mxu0 %v7132_v5  ;;  %4345 = vmatpush3.bf16.msra.mxu1 %v7138_v22 }
 0x911   :  { %3092 = vmatprep.subr.bf16.mxu0 %v6526_v10  ;;  %4350 = vmatprep.subr.bf16.mxu1 %v7525_v7  ;;  %v7710_v10 = vld [vmem:[#allocation24_spill] sm:$0xff] }
 0x913   :  { %3017 = vmatmul.mubr.bf16.vlgmr.msra.gmra.mrb[68].mxu0 %v2983_v8  ;;  %4347 = vmatmul.mubr.bf16.vlgmr.msra.gmra.mrb[88].mxu1 %v2983_v8  ;;  %v7726_v8 = vld [vmem:[#allocation6_spill] sm:$0xff] }
 0x914   :  { %3093 = vmatpush1.bf16.msra.mxu0 %v6533_v61  ;;  %4351 = vmatpush3.bf16.msra.mxu1 %v6539_v53  ;;  %v7711_v61 = vld [vmem:[#allocation25_spill] sm:$0xff]  ;;  %v7712_v53 = vld [vmem:[#allocation26_spill] sm:$0xff] }
 0x915   :  { %3094 = vmatprep.subr.bf16.mxu0 %v6545_v12  ;;  %4352 = vmatprep.subr.bf16.mxu1 %v7525_v7  ;;  %v7713_v12 = vld [vmem:[#allocation27_spill] sm:$0xff] }
 0x916   :  { %3124 = vmatprep.mubr.bf16.mxu0 %v7526_v15  ;;  %4366 = vmatprep.mubr.msk.bf16.mxu1 %vm4943_vm0, %v7525_v7 }
 0x918   :  { %3095 = vmatpush1.bf16.msra.mxu0 %v6555_v23  ;;  %4353 = vmatpush3.bf16.msra.mxu1 %v6561_v27  ;;  %v7714_v23 = vld [vmem:[#allocation28_spill] sm:$0xff]  ;;  %v7715_v27 = vld [vmem:[#allocation29_spill] sm:$0xff] }
 0x919   :  { %3096 = vmatprep.subr.bf16.mxu0 %v6567_v21  ;;  %4354 = vmatprep.subr.bf16.mxu1 %v7525_v7  ;;  %v7716_v21 = vld [vmem:[#allocation30_spill] sm:$0xff] }
 0x91c   :  { %3097 = vmatpush1.bf16.msra.mxu0 %v6574_v59  ;;  %4355 = vmatpush3.bf16.msra.mxu1 %v6580_v56  ;;  %v7717_v59 = vld [vmem:[#allocation8_spill] sm:$0xff]  ;;  %v7718_v56 = vld [vmem:[#allocation9_spill] sm:$0xff] }
 0x91d   :  { %3098 = vmatprep.subr.bf16.mxu0 %v6586_v4  ;;  %4356 = vmatprep.subr.bf16.mxu1 %v7525_v7  ;;  %v7719_v4 = vld [vmem:[#allocation10_spill] sm:$0xff] }
 0x920   :  { %3099 = vmatpush1.bf16.msra.mxu0 %v6593_v57  ;;  %4357 = vmatpush3.bf16.msra.mxu1 %v6599_v13  ;;  %v7720_v57 = vld [vmem:[#allocation11_spill] sm:$0xff]  ;;  %v7721_v13 = vld [vmem:[#allocation12_spill] sm:$0xff] }
 0x921   :  { %3100 = vmatprep.subr.bf16.mxu0 %v6605_v34  ;;  %4358 = vmatprep.subr.bf16.mxu1 %v7525_v7  ;;  %v7722_v34 = vld [vmem:[#allocation13_spill] sm:$0xff] }
 0x924   :  { %3101 = vmatpush1.bf16.msra.mxu0 %v7668_v24  ;;  %4359 = vmatpush3.bf16.msra.mxu1 %v7669_v40  ;;  %v7723_v24 = vld [vmem:[#allocation14_spill] sm:$0xff] }
 0x925   :  { %3102 = vmatprep.subr.bf16.mxu0 %v7670_v30  ;;  %4360 = vmatprep.subr.bf16.mxu1 %v7525_v7 }
 0x928   :  { %3103 = vmatpush1.bf16.msra.mxu0 %v7671_v2  ;;  %4361 = vmatpush3.bf16.msra.mxu1 %v7672_v36 }
 0x929   :  { %3104 = vmatprep.subr.bf16.mxu0 %v7673_v0  ;;  %4362 = vmatprep.subr.bf16.mxu1 %v7525_v7 }
 0x92c   :  { %3105 = vmatpush1.bf16.msra.mxu0 %v7674_v44  ;;  %4363 = vmatpush3.bf16.msra.mxu1 %v7675_v33  ;;  %v7724_v33 = vld [vmem:[#allocation4_spill] sm:$0xff] }
 0x92d   :  { %3106 = vmatprep.subr.bf16.mxu0 %v7676_v54  ;;  %4364 = vmatprep.subr.bf16.mxu1 %v7525_v7 }
 0x930   :  { %3107 = vmatpush1.bf16.msra.mxu0 %v7677_v63  ;;  %4365 = vmatpush3.bf16.msra.mxu1 %v7678_v3 }
 0x931   :  { %3195 = vmatprep.subr.bf16.mxu0 %v7679_v58  ;;  %4370 = vmatprep.subr.bf16.mxu1 %v7525_v7 }
 0x933   :  { %3125 = vmatmul.mubr.bf16.vlgmr.msra.gmra.mrb[72].mxu0 %v6989_v55  ;;  %4367 = vmatmul.mubr.bf16.vlgmr.msra.gmra.mrb[92].mxu1 %v6989_v55 }
 0x934   :  { %3196 = vmatpush1.bf16.msra.mxu0 %v7680_v26  ;;  %4371 = vmatpush3.bf16.msra.mxu1 %v7681_v49 }
 0x935   :  { %3197 = vmatprep.subr.bf16.mxu0 %v7682_v52  ;;  %4372 = vmatprep.subr.bf16.mxu1 %v7525_v7 }
 0x936   :  { %3227 = vmatprep.mubr.bf16.mxu0 %v7526_v15  ;;  %4386 = vmatprep.mubr.msk.bf16.mxu1 %vm4943_vm0, %v7525_v7 }
 0x938   :  { %3198 = vmatpush1.bf16.msra.mxu0 %v7683_v32  ;;  %4373 = vmatpush3.bf16.msra.mxu1 %v7684_v51  ;;  %v7725_v51 = vld [vmem:[#allocation5_spill] sm:$0xff] }
 0x939   :  { %3199 = vmatprep.subr.bf16.mxu0 %v7685_v29  ;;  %4374 = vmatprep.subr.bf16.mxu1 %v7525_v7 }
 0x93c   :  { %3200 = vmatpush1.bf16.msra.mxu0 %v7686_v39  ;;  %4375 = vmatpush3.bf16.msra.mxu1 %v7687_v48 }
 0x93d   :  { %3201 = vmatprep.subr.bf16.mxu0 %v7688_v17  ;;  %4376 = vmatprep.subr.bf16.mxu1 %v7525_v7 }
 0x940   :  { %3202 = vmatpush1.bf16.msra.mxu0 %v6881_v43  ;;  %4377 = vmatpush3.bf16.msra.mxu1 %v7710_v10 }
 0x941   :  { %3203 = vmatprep.subr.bf16.mxu0 %v7711_v61  ;;  %4378 = vmatprep.subr.bf16.mxu1 %v7525_v7 }
 0x944   :  { %3204 = vmatpush1.bf16.msra.mxu0 %v7712_v53  ;;  %4379 = vmatpush3.bf16.msra.mxu1 %v7713_v12  ;;  %v7727_v53 = vld [vmem:[#allocation7_spill] sm:$0xff] }
 0x945   :  { %3205 = vmatprep.subr.bf16.mxu0 %v7714_v23  ;;  %4380 = vmatprep.subr.bf16.mxu1 %v7525_v7 }
 0x948   :  { %3206 = vmatpush1.bf16.msra.mxu0 %v7715_v27  ;;  %4381 = vmatpush3.bf16.msra.mxu1 %v7716_v21  ;;  %v3087_v27 = vld [vmem:[#allocation3 + $0x54] sm:$0xff] }
 0x949   :  { %3207 = vmatprep.subr.bf16.mxu0 %v7717_v59  ;;  %4382 = vmatprep.subr.bf16.mxu1 %v7525_v7 }
 0x94c   :  { %3208 = vmatpush1.bf16.msra.mxu0 %v7718_v56  ;;  %4383 = vmatpush3.bf16.msra.mxu1 %v7719_v4  ;;  %v3089_v4 = vunpack.c.l.bf16 %v3087_v27 }
 0x94d   :  { %3209 = vmatprep.subr.bf16.mxu0 %v7720_v57  ;;  %4384 = vmatprep.subr.bf16.mxu1 %v7525_v7 }
 0x950   :  { %3210 = vmatpush1.bf16.msra.mxu0 %v7721_v13  ;;  %4385 = vmatpush3.bf16.msra.mxu1 %v7722_v34 }
 0x951   :  { %3277 = vmatprep.subr.bf16.mxu0 %v7723_v24  ;;  %4390 = vmatprep.subr.bf16.mxu1 %v7525_v7 }
 0x9c6   :  { %v2977_v40 = vpop.f32.mrb[84].mxu1 }
 0x9c7   :  { %v4328_v30 = vpop.f32.mrb[85].mxu1  ;;  %v2978_v12 = vadd.f32 %v2977_v40, %v7727_v53  ;;  %v3090_v40 = vunpack.c.h.bf16 %v3087_v27 }
 0x9c8   :  { %v2980_v2 = vpop.f32.mrb[86].mxu1 }
 0x9c9   :  { %v4329_v36 = vpop.f32.mrb[87].mxu1 }
 0x9e6   :  { %v3018_v0 = vpop.f32.mrb[68].mxu0  ;;  %v3059_v44 = vpop.f32.mrb[88].mxu1 }
 0x9e7   :  { %v4455_v54 = vadd.f32 %v7724_v33, %v3018_v0  ;;  %v3020_v63 = vpop.f32.mrb[69].mxu0  ;;  %v4348_v3 = vpop.f32.mrb[89].mxu1  ;;  %v3060_v10 = vadd.f32 %v3059_v44, %v7726_v8 }
 0x9e8   :  { %v3022_v58 = vpop.f32.mrb[70].mxu0  ;;  %v3062_v26 = vpop.f32.mrb[90].mxu1  ;;  %v4457_v29 = vadd.f32 %v7725_v51, %v3020_v63 }
 0x9e9   :  { %v3638_v49 = vmul.f32 -1.442695, %v4455_v54  ;;  %v3023_v52 = vpop.f32.mrb[71].mxu0  ;;  %v4349_v32 = vpop.f32.mrb[91].mxu1 }
 0x9ea   :  { %v3639_v39 = vmul.f32 -1.442695, %v4457_v29 }
 0x9eb   :  { %4767 = vpow2.f32 %v3638_v49 }
 0x9ec   :  { %4769 = vpow2.f32 %v3639_v39 }
 0x9f5   :  { %v4768_v48 = vpop.eup %4767 }
 0x9f6   :  { %v3069_v17 = vadd.f32 1.0, %v4768_v48  ;;  %v4770_v43 = vpop.eup %4769 }
 0x9f7   :  { %v3076_v55 = vadd.f32 1.0, %v4770_v43 }
 0x9f8   :  { %4771 = vrcp.f32 %v3069_v17  ;;  %v3088_v17 = vld [vmem:[#allocation3 + $0x5c] sm:$0xf] }
 0x9f9   :  { %4773 = vrcp.f32 %v3076_v55 }
 0xa02   :  { %v4772_v61 = vpop.eup %4771 }
 0xa03   :  { %v3079_v23 = vmul.f32 %v4772_v61, %v3060_v10  ;;  %v4774_v3 = vpop.eup %4773  ;;  %v3091_v10 = vunpack.c.l.bf16 %v3088_v17 }
 0xa04   :  { %v3082_v26 = vsub.f32 1.0, %v4774_v3 }
 0xa05   :  { %v3080_v21 = vadd.f32 %v3079_v23, %v2978_v12 }
 0xa06   :  { %v3126_v59 = vpop.f32.mrb[72].mxu0  ;;  %v3167_v56 = vpop.f32.mrb[92].mxu1 }
 0xa07   :  { %4775 = vtanh.f32 %v3080_v21  ;;  %v3127_v57 = vadd.f32 %v3126_v59, %v5451_v16  ;;  %v3128_v13 = vpop.f32.mrb[73].mxu0  ;;  %v4368_v34 = vpop.f32.mrb[93].mxu1  ;;  %v3084_v16 = vmul.f32 %v4774_v3, %v6980_v41  ;;  %v3168_v43 = vadd.f32 %v3167_v56, %v5461_v14  ;;  %v7728_v14 = vld [vmem:[#allocation15_spill] sm:$0xff] }
 0xa08   :  { %v3129_v24 = vadd.f32 %v3128_v13, %v5454_v6  ;;  %v3130_v30 = vpop.f32.mrb[74].mxu0  ;;  %v3170_v2 = vpop.f32.mrb[94].mxu1 }
 0xa09   :  { %v3173_v36 = vadd.f32 %v3127_v57, %v3089_v4  ;;  %v3131_v0 = vpop.f32.mrb[75].mxu0  ;;  %v4369_v44 = vpop.f32.mrb[95].mxu1 }
 0xa0a   :  { %v3180_v63 = vadd.f32 %v3129_v24, %v3090_v40 }
 0xa0b   :  { %v3640_v54 = vmul.f32 -1.442695, %v3173_v36 }
 0xa0c   :  { %v3641_v58 = vmul.f32 -1.442695, %v3180_v63 }
 0xa0d   :  { %4777 = vpow2.f32 %v3640_v54 }
 0xa0e   :  { %4779 = vpow2.f32 %v3641_v58 }
 0xa11   :  { %v4776_v49 = vpop.eup %4775 }
 0xa12   :  { %v3083_v52 = vmul.f32 %v4776_v49, %v3082_v26 }
 0xa14   :  { %v7224_v32 = vadd.f32 %v3084_v16, %v3083_v52 }
 0xa17   :  { %v4778_v6 = vpop.eup %4777 }
 0xa18   :  { %v3177_v29 = vadd.f32 1.0, %v4778_v6  ;;  %v4780_v39 = vpop.eup %4779 }
 0xa19   :  { %v3184_v48 = vadd.f32 1.0, %v4780_v39 }
 0xa1a   :  { %4781 = vrcp.f32 %v3177_v29 }
 0xa1b   :  { %4783 = vrcp.f32 %v3184_v48 }
 0xa24   :  { %v4782_v55 = vpop.eup %4781 }
 0xa25   :  { %v3187_v61 = vmul.f32 %v4782_v55, %v3168_v43  ;;  %v4784_v23 = vpop.eup %4783 }
 0xa26   :  { %v3190_v27 = vsub.f32 1.0, %v4784_v23  ;;  %v3192_v59 = vmul.f32 %v4784_v23, %v6985_v25  ;;  %v7730_v25 = vld [vmem:[#allocation17_spill] sm:$0xff] }
 0xa27   :  { %v3188_v12 = vadd.f32 %v3187_v61, %v3091_v10 }
 0xa29   :  { %4785 = vtanh.f32 %v3188_v12 }
 0xa33   :  { %v4786_v41 = vpop.eup %4785 }
 0xa34   :  { %v3191_v21 = vmul.f32 %v4786_v41, %v3190_v27 }
 0xa36   :  { %v3193_v4 = vadd.f32 %v3192_v59, %v3191_v21 }
 0xa38   :  { %v3194_v57 = vpack.c.bf16 %v3193_v4, %v3193_v4 }
 0xa3a   :  { %3228 = vmatmul.mubr.bf16.vlgmr.msra.gmra.mrb[76].mxu0 %v3194_v57  ;;  %4387 = vmatmul.mubr.bf16.vlgmr.msra.gmra.mrb[96].mxu1 %v3194_v57 }
 0xa3b   :  { %3278 = vmatpush1.bf16.msra.mxu0 %v6996_v50  ;;  %4391 = vmatpush3.bf16.msra.mxu1 %v7002_v46  ;;  %v3276_v50 = vpack.c.bf16 %v7224_v32, %v7224_v32  ;;  %v4629_v46 = vld [vmem:[%s7317_s9] sm:$0xff]  }
 0xa3c   :  { %3279 = vmatprep.subr.bf16.mxu0 %v7008_v37  ;;  %4392 = vmatprep.subr.bf16.mxu1 %v7525_v7  ;;  %v4630_v37 = vld [vmem:[%s7317_s9 + $0x8] sm:$0xff]  }
 0xa3d   :  { %3309 = vmatprep.mubr.bf16.mxu0 %v7526_v15  ;;  %4406 = vmatprep.mubr.msk.bf16.mxu1 %vm4943_vm0, %v7525_v7  ;;  %v7729_v15 = vld [vmem:[#allocation16_spill] sm:$0xff] }
 0xa3f   :  { %3280 = vmatpush1.bf16.msra.mxu0 %v7018_v47  ;;  %4393 = vmatpush3.bf16.msra.mxu1 %v7024_v62  ;;  %v4631_v47 = vld [vmem:[%s7317_s9 + $0x10] sm:$0xff]   ;;  %v4632_v62 = vld [vmem:[%s7317_s9 + $0x18] sm:$0xff]  }
 0xa40   :  { %3281 = vmatprep.subr.bf16.mxu0 %v7030_v38  ;;  %4394 = vmatprep.subr.bf16.mxu1 %v7525_v7  ;;  %v4633_v38 = vld [vmem:[%s7317_s9 + $0x20] sm:$0xff]  }
 0xa43   :  { %3282 = vmatpush1.bf16.msra.mxu0 %v7037_v9  ;;  %4395 = vmatpush3.bf16.msra.mxu1 %v7043_v42  ;;  %v4634_v9 = vld [vmem:[%s7317_s9 + $0x28] sm:$0xff]   ;;  %v4635_v42 = vld [vmem:[%s7317_s9 + $0x30] sm:$0xff]  }
 0xa44   :  { %3283 = vmatprep.subr.bf16.mxu0 %v7049_v60  ;;  %4396 = vmatprep.subr.bf16.mxu1 %v7525_v7  ;;  %v4636_v60 = vld [vmem:[%s7317_s9 + $0x38] sm:$0xff]  }
 0xa47   :  { %3284 = vmatpush1.bf16.msra.mxu0 %v7056_v18  ;;  %4397 = vmatpush3.bf16.msra.mxu1 %v7062_v45 }
 0xa48   :  { %3285 = vmatprep.subr.bf16.mxu0 %v7068_v11  ;;  %4398 = vmatprep.subr.bf16.mxu1 %v7525_v7 }
 0xa4b   :  { %3286 = vmatpush1.bf16.msra.mxu0 %v7075_v35  ;;  %4399 = vmatpush3.bf16.msra.mxu1 %v7081_v20 }
 0xa4c   :  { %3287 = vmatprep.subr.bf16.mxu0 %v7087_v1  ;;  %4400 = vmatprep.subr.bf16.mxu1 %v7525_v7 }
 0xa4f   :  { %3288 = vmatpush1.bf16.msra.mxu0 %v7094_v19  ;;  %4401 = vmatpush3.bf16.msra.mxu1 %v7100_v28 }
 0xa50   :  { %3289 = vmatprep.subr.bf16.mxu0 %v7728_v14  ;;  %4402 = vmatprep.subr.bf16.mxu1 %v7525_v7 }
 0xa53   :  { %3290 = vmatpush1.bf16.msra.mxu0 %v7729_v15  ;;  %4403 = vmatpush3.bf16.msra.mxu1 %v7730_v25 }
 0xa54   :  { %3291 = vmatprep.subr.bf16.mxu0 %v7125_v31  ;;  %4404 = vmatprep.subr.bf16.mxu1 %v7525_v7 }
 0xa57   :  { %3292 = vmatpush1.bf16.msra.mxu0 %v7132_v5  ;;  %4405 = vmatpush3.bf16.msra.mxu1 %v7138_v22 }
 0xa58   :  { %4410 = vmatprep.subr.bf16.mxu0 %v7525_v7 }
 0xa5a   :  { %3310 = vmatmul.mubr.bf16.vlgmr.msra.gmra.mrb[76].mxu0 %v3276_v50  ;;  %4407 = vmatmul.mubr.bf16.vlgmr.msra.gmra.mrb[100].mxu1 %v3276_v50 }
 0xa5b   :  { %4426 = vmatprep.mubr.msk.bf16.mxu0 %vm4943_vm0, %v7525_v7  ;;  %4411 = vmatpush3.bf16.msra.mxu0 %v4629_v46 }
 0xa5c   :  { %4412 = vmatprep.subr.bf16.mxu0 %v7525_v7 }
 0xa5f   :  { %4413 = vmatpush3.bf16.msra.mxu0 %v4630_v37 }
 0xa60   :  { %4414 = vmatprep.subr.bf16.mxu0 %v7525_v7 }
 0xa63   :  { %4415 = vmatpush3.bf16.msra.mxu0 %v4631_v47 }
 0xa64   :  { %4416 = vmatprep.subr.bf16.mxu0 %v7525_v7 }
 0xa67   :  { %4417 = vmatpush3.bf16.msra.mxu0 %v4632_v62 }
 0xa68   :  { %4418 = vmatprep.subr.bf16.mxu0 %v7525_v7 }
 0xa6b   :  { %4419 = vmatpush3.bf16.msra.mxu0 %v4633_v38 }
 0xa6c   :  { %4420 = vmatprep.subr.bf16.mxu0 %v7525_v7 }
 0xa6f   :  { %4421 = vmatpush3.bf16.msra.mxu0 %v4634_v9 }
 0xa70   :  { %4422 = vmatprep.subr.bf16.mxu0 %v7525_v7 }
 0xa73   :  { %4423 = vmatpush3.bf16.msra.mxu0 %v4635_v42 }
 0xa74   :  { %4424 = vmatprep.subr.bf16.mxu0 %v7525_v7 }
 0xa77   :  { %4425 = vmatpush3.bf16.msra.mxu0 %v4636_v60 }
 0xb0d   :  { %v3270_v18 = vpop.f32.mrb[96].mxu1 }
 0xb0e   :  { %v4388_v45 = vpop.f32.mrb[97].mxu1  ;;  %v3271_v40 = vadd.f32 %v3270_v18, %v7727_v53 }
 0xb0f   :  { %v3273_v11 = vpop.f32.mrb[98].mxu1 }
 0xb10   :  { %v4389_v35 = vpop.f32.mrb[99].mxu1 }
 0xb2d   :  { %v3311_v20 = vpop.f32.mrb[76].mxu0  ;;  %v3352_v1 = vpop.f32.mrb[100].mxu1 }
 0xb2e   :  { %v4459_v19 = vadd.f32 %v7724_v33, %v3311_v20  ;;  %v3313_v28 = vpop.f32.mrb[77].mxu0  ;;  %v4408_v5 = vpop.f32.mrb[101].mxu1  ;;  %v3353_v44 = vadd.f32 %v3352_v1, %v7726_v8  ;;  %v3644_v8 = vld [vmem:[%s7318_s10] ss:$0 sm:$0xff] }
 0xb2f   :  { %v3315_v22 = vpop.f32.mrb[78].mxu0  ;;  %v3355_v31 = vpop.f32.mrb[102].mxu1  ;;  %v4461_v24 = vadd.f32 %v7725_v51, %v3313_v28 }
 0xb30   :  { %v3642_v56 = vmul.f32 -1.442695, %v4459_v19  ;;  %v3316_v13 = vpop.f32.mrb[79].mxu0  ;;  %v4409_v34 = vpop.f32.mrb[103].mxu1 }
 0xb31   :  { %v3643_v7 = vmul.f32 -1.442695, %v4461_v24 }
 0xb32   :  { %4787 = vpow2.f32 %v3642_v56 }
 0xb33   :  { %4789 = vpow2.f32 %v3643_v7 }
 0xb3c   :  { %v4788_v30 = vpop.eup %4787 }
 0xb3d   :  { %v3362_v2 = vadd.f32 1.0, %v4788_v30  ;;  %v4790_v36 = vpop.eup %4789 }
 0xb3e   :  { %v3369_v0 = vadd.f32 1.0, %v4790_v36 }
 0xb3f   :  { %4791 = vrcp.f32 %v3362_v2 }
 0xb40   :  { %4793 = vrcp.f32 %v3369_v0 }
 0xb49   :  { %v4792_v33 = vpop.eup %4791 }
 0xb4a   :  { %v3372_v54 = vmul.f32 %v4792_v33, %v3353_v44  ;;  %v4794_v3 = vpop.eup %4793 }
 0xb4b   :  { %v3375_v58 = vsub.f32 1.0, %v4794_v3  ;;  %v3377_v49 = vmul.f32 %v4794_v3, %v7224_v32 }
 0xb4c   :  { %v3373_v63 = vadd.f32 %v3372_v54, %v3271_v40 }
 0xb4e   :  { %4795 = vtanh.f32 %v3373_v63 }
 0xb58   :  { %v4796_v51 = vpop.eup %4795 }
 0xb59   :  { %v3376_v26 = vmul.f32 %v4796_v51, %v3375_v58 }
 0xb5b   :  { %v3378_v52 = vadd.f32 %v3377_v49, %v3376_v26 }
 0xb5d   :  { %v3379_v16 = vpack.c.bf16 %v3378_v52, %v3378_v52 }
 0xb5f   :  { %4427 = vmatmul.mubr.bf16.vlgmr.msra.gmra.mrb[80].mxu0 %v3379_v16 }
 0xc32   :  { %v3485_v6 = vpop.f32.mrb[80].mxu0 }
 0xc33   :  { %v3486_v29 = vadd.f32 %v3644_v8, %v3485_v6  ;;  %v4428_v53 = vpop.f32.mrb[81].mxu0 }
 0xc34   :  { %v3488_v39 = vpop.f32.mrb[82].mxu0 }
 0xc35   :  { %3491 = vst [vmem:[%s7319_s11] sm:$0xff] %v3486_v29  ;;  %v4429_v48 = vpop.f32.mrb[83].mxu0 }

</bundles_post_ra>
